<compile_context>
chip_gen: v7x
topology: tpu7x:2x2x1
jax: 0.10.0
libtpu: 0.0.40
codegen_flags: <defaults>
</compile_context>

<pallas_src>
import functools

import jax
import jax.numpy as jnp
from jax.experimental import pallas as pl
from jax.experimental.pallas import tpu as pltpu

F32 = jnp.float32
BF16 = jnp.bfloat16
BN_EPS = 1e-5


def _round_up(x, m):
    return -(-x // m) * m


def _row_block(mp, target=512):
    """Largest row block <= target that divides mp (mp is a multiple of 8)."""
    if mp <= target:
        return mp
    for rm in range(target, 7, -8):
        if mp % rm == 0:
            return rm
    return 8


# --------------------------------------------------------------------------
# Pallas kernels
# --------------------------------------------------------------------------
def _matmul_stats_kernel(a_ref, b_ref, o_ref, sum_ref, sq_ref, acc_ref):
    """Tiled MXU matmul (bf16 in, f32 accumulate).

    In the final K step it also emits per-column sum / sum-of-squares of the
    f32 accumulator for this (i, j) output tile, so BatchNorm statistics do
    not require a separate pass over the conv output in HBM.
    """
    @pl.when(pl.program_id(2) == 0)
    def _():
        acc_ref[...] = jnp.zeros_like(acc_ref)

    acc_ref[...] += jnp.dot(a_ref[...], b_ref[...],
                            preferred_element_type=jnp.float32)

    @pl.when(pl.program_id(2) == pl.num_programs(2) - 1)
    def _():
        acc = acc_ref[...]
        o_ref[...] = acc.astype(o_ref.dtype)
        csum = jnp.sum(acc, axis=0, keepdims=True)          # (1, tn)
        csq = jnp.sum(acc * acc, axis=0, keepdims=True)     # (1, tn)
        # Broadcast along the 8-sublane axis so the stats output block keeps
        # a TPU-friendly (8, 128k) tile; only row 0 is read back.
        sum_ref[...] = jnp.broadcast_to(csum, sum_ref.shape)
        sq_ref[...] = jnp.broadcast_to(csq, sq_ref.shape)


def _colstats_kernel(y_ref, sum_ref, sq_ref):
    # Accumulate per-channel sum and sum-of-squares across the row grid axis
    # (used only for the final standalone BatchNorm, whose input is a ReLU
    # output rather than a matmul output).
    @pl.when(pl.program_id(0) == 0)
    def _():
        sum_ref[...] = jnp.zeros_like(sum_ref)
        sq_ref[...] = jnp.zeros_like(sq_ref)

    y = y_ref[...].astype(jnp.float32)
    sum_ref[...] += jnp.sum(y, axis=0, keepdims=True)
    sq_ref[...] += jnp.sum(y * y, axis=0, keepdims=True)


def _affine_relu_kernel(y_ref, scale_ref, shift_ref, o_ref, *, apply_relu):
    z = y_ref[...].astype(jnp.float32) * scale_ref[...] + shift_ref[...]
    if apply_relu:
        z = jnp.maximum(z, 0.0)
    o_ref[...] = z.astype(o_ref.dtype)


# --------------------------------------------------------------------------
# Wrappers around pallas_call
# --------------------------------------------------------------------------
def _pick_k_tile(K):
    """(tk, Kp): full-extent unpadded K when it fits one step, else 128k tiles."""
    if K <= 1024:
        return K, K
    Kp = _round_up(K, 128)
    for tk in (512, 256, 128):
        if Kp % tk == 0:
            return tk, Kp
    return 128, Kp


def pallas_matmul(a, b, *, out_dtype=BF16):
    """(M,K) @ (K,N) with bf16 MXU inputs and f32 accumulation.

    Returns (out_padded (Mp,Np) out_dtype, col_sum (Np,) f32, col_sq (Np,) f32).
    Zero padding contributes nothing to the column sums.
    """
    M, K = a.shape
    K2, N = b.shape
    assert K == K2

    tm = min(512, _round_up(M, 16))
    tk, Kp = _pick_k_tile(K)
    Np = _round_up(N, 128)
    tn = Np if Np <= 256 else (256 if Np % 256 == 0 else 128)
    Mp = _round_up(M, tm)

    a_p = a.astype(BF16)
    if (Mp, Kp) != (M, K):
        a_p = jnp.pad(a_p, ((0, Mp - M), (0, Kp - K)))
    b_p = b.astype(BF16)
    if (Kp, Np) != (K, N):
        b_p = jnp.pad(b_p, ((0, Kp - K), (0, Np - N)))

    gm, gn, gk = Mp // tm, Np // tn, Kp // tk

    out_p, sum_part, sq_part = pl.pallas_call(
        _matmul_stats_kernel,
        out_shape=(
            jax.ShapeDtypeStruct((Mp, Np), out_dtype),
            jax.ShapeDtypeStruct((8 * gm, Np), F32),
            jax.ShapeDtypeStruct((8 * gm, Np), F32),
        ),
        grid=(gm, gn, gk),
        in_specs=[
            pl.BlockSpec((tm, tk), lambda i, j, k: (i, k)),
            pl.BlockSpec((tk, tn), lambda i, j, k: (k, j)),
        ],
        out_specs=(
            pl.BlockSpec((tm, tn), lambda i, j, k: (i, j)),
            pl.BlockSpec((8, tn), lambda i, j, k: (i, j)),
            pl.BlockSpec((8, tn), lambda i, j, k: (i, j)),
        ),
        scratch_shapes=[pltpu.VMEM((tm, tn), jnp.float32)],
        compiler_params=pltpu.CompilerParams(
            dimension_semantics=("parallel", "parallel", "arbitrary")),
    )(a_p, b_p)

    # Combine the tiny per-(i)-block partial stats on the host-side graph.
    col_sum = jnp.sum(sum_part.reshape(gm, 8, Np)[:, 0, :], axis=0)
    col_sq = jnp.sum(sq_part.reshape(gm, 8, Np)[:, 0, :], axis=0)
    return out_p, col_sum, col_sq


def pallas_affine_relu(y_p, scale, shift, *, apply_relu=True, out_dtype=BF16):
    """Per-channel affine (+ReLU) on a padded (Mp, Cp) activation."""
    Mp, Cp = y_p.shape
    rm = _row_block(Mp)
    return pl.pallas_call(
        functools.partial(_affine_relu_kernel, apply_relu=apply_relu),
        out_shape=jax.ShapeDtypeStruct((Mp, Cp), out_dtype),
        grid=(Mp // rm,),
        in_specs=[
            pl.BlockSpec((rm, Cp), lambda i: (i, 0)),
            pl.BlockSpec((1, Cp), lambda i: (0, 0)),
            pl.BlockSpec((1, Cp), lambda i: (0, 0)),
        ],
        out_specs=pl.BlockSpec((rm, Cp), lambda i: (i, 0)),
        compiler_params=pltpu.CompilerParams(
            dimension_semantics=("parallel",)),
    )(y_p, scale[None, :].astype(F32), shift[None, :].astype(F32))


def batchnorm_relu_standalone(y, gamma, beta, apply_relu=True):
    """Training-mode BatchNorm over axis 0 + ReLU for a (M, C) activation."""
    M, C = y.shape
    Mp = _round_up(M, 8)
    y_p = jnp.pad(y, ((0, Mp - M), (0, 0))) if Mp != M else y
    rm = _row_block(Mp)

    s, sq = pl.pallas_call(
        _colstats_kernel,
        out_shape=(jax.ShapeDtypeStruct((1, C), F32),
                   jax.ShapeDtypeStruct((1, C), F32)),
        grid=(Mp // rm,),
        in_specs=[pl.BlockSpec((rm, C), lambda i: (i, 0))],
        out_specs=(pl.BlockSpec((1, C), lambda i: (0, 0)),
                   pl.BlockSpec((1, C), lambda i: (0, 0))),
        compiler_params=pltpu.CompilerParams(
            dimension_semantics=("arbitrary",)),
    )(y_p)

    mean = s[0] / M
    # biased variance (PyTorch BN forward); f32 stats, clamp vs cancellation.
    var = jnp.maximum(sq[0] / M - mean * mean, 0.0)
    scale = gamma.astype(F32) * jax.lax.rsqrt(var + BN_EPS)
    shift = beta.astype(F32) - mean * scale
    out_p = pallas_affine_relu(y_p, scale, shift, apply_relu=apply_relu)
    return out_p[:M]


# --------------------------------------------------------------------------
# Model glue (layout / parameter plumbing in plain JAX)
# --------------------------------------------------------------------------
def im2col_3x3(x, stride):
    """3x3 patches, padding=1. x: (N,H,W,C) -> ((N*Ho*Wo, 9*C), Ho, Wo)."""
    N, H, W, C = x.shape
    Ho = (H - 1) // stride + 1
    Wo = (W - 1) // stride + 1
    xp = jnp.pad(x, ((0, 0), (1, 1), (1, 1), (0, 0)))
    cols = []
    for kh in range(3):
        for kw in range(3):
            sl = xp[:,
                    kh:kh + (Ho - 1) * stride + 1:stride,
                    kw:kw + (Wo - 1) * stride + 1:stride,
                    :]
            cols.append(sl)
    patches = jnp.stack(cols, axis=3)               # (N, Ho, Wo, 9, C)
    return patches.reshape(N * Ho * Wo, 9 * C), Ho, Wo


def conv3x3(x, w, stride):
    """Conv2d(k=3, pad=1, bias=False) via im2col + Pallas matmul.

    Returns (out_padded (Mp,Np) bf16, col_sum, col_sq, M, Ho, Wo, Cout).
    """
    cin, cout = w.shape[2], w.shape[3]
    patches, Ho, Wo = im2col_3x3(x.astype(BF16), stride)
    M = patches.shape[0]
    out_p, s, sq = pallas_matmul(patches, w.reshape(9 * cin, cout))
    return out_p, s, sq, M, Ho, Wo, cout


def conv_bn_relu(x, w, gamma, beta, stride):
    """conv3x3 -> BatchNorm(train) -> ReLU with stats fused into the matmul."""
    N = x.shape[0]
    out_p, s, sq, M, Ho, Wo, cout = conv3x3(x, w, stride)
    Np = out_p.shape[1]
    mean = s / M
    var = jnp.maximum(sq / M - mean * mean, 0.0)    # biased var, f32 stats
    gamma_p = jnp.pad(gamma.astype(F32), (0, Np - cout))
    beta_p = jnp.pad(beta.astype(F32), (0, Np - cout))
    scale = gamma_p * jax.lax.rsqrt(var + BN_EPS)
    shift = beta_p - mean * scale
    y_p = pallas_affine_relu(out_p, scale, shift, apply_relu=True)
    return y_p[:M, :cout].reshape(N, Ho, Wo, cout)


def wideresnet_forward(x, params):
    N = x.shape[0]
    # conv1 (no BN / ReLU, matching the reference forward)
    out_p, _, _, M, Ho, Wo, cout = conv3x3(x, params["conv1_w"], stride=1)
    h = out_p[:M, :cout].reshape(N, Ho, Wo, cout)
    # layer1 / layer2 / layer3: [conv3x3 -> BN(train) -> ReLU] blocks
    for (w, gamma, beta, stride) in params["blocks"]:
        h = conv_bn_relu(h, w, gamma, beta, stride)
    # final BN + ReLU (standalone stats pass: input is a ReLU output)
    n, ho, wo, c = h.shape
    y = batchnorm_relu_standalone(h.reshape(n * ho * wo, c),
                                  params["bn_gamma"], params["bn_beta"])
    h = y.reshape(n, ho, wo, c)
    # global average pool over the full spatial map (tiny: N*C values -> glue)
    pooled = jnp.mean(h.astype(F32), axis=(1, 2))   # (N, C)
    # FC with bias folded into the Pallas matmul (augmented column / row)
    a_aug = jnp.concatenate([pooled, jnp.ones((N, 1), F32)], axis=1)
    w_aug = jnp.concatenate([params["fc_w"], params["fc_b"][None, :]], axis=0)
    num_classes = params["fc_w"].shape[1]
    logits_p, _, _ = pallas_matmul(a_aug, w_aug, out_dtype=F32)
    return logits_p[:N, :num_classes]


def init_params(key, depth, width, num_classes):
    n_blocks = depth // 3
    ks = iter(jax.random.split(key, 64))

    def conv_w(cin, cout):
        return (jax.random.normal(next(ks), (3, 3, cin, cout), dtype=F32)
                / jnp.sqrt(9.0 * cin))

    params = {"conv1_w": conv_w(3, 16)}
    blocks = []
    in_planes = 16
    for out_planes, stride in ((16 * width, 1), (32 * width, 2), (64 * width, 2)):
        strides = [stride] + [1] * (n_blocks - 1)
        for s in strides:
            w = conv_w(in_planes, out_planes)
            gamma = 1.0 + 0.1 * jax.random.normal(next(ks), (out_planes,), dtype=F32)
            beta = 0.1 * jax.random.normal(next(ks), (out_planes,), dtype=F32)
            blocks.append((w, gamma, beta, s))
            in_planes = out_planes
    params["blocks"] = blocks

    c_final = 64 * width
    params["bn_gamma"] = 1.0 + 0.1 * jax.random.normal(next(ks), (c_final,), dtype=F32)
    params["bn_beta"] = 0.1 * jax.random.normal(next(ks), (c_final,), dtype=F32)
    params["fc_w"] = (jax.random.normal(next(ks), (c_final, num_classes), dtype=F32)
                      / jnp.sqrt(float(c_final)))
    params["fc_b"] = 0.1 * jax.random.normal(next(ks), (num_classes,), dtype=F32)
    return params


if __name__ == "__main__":
    depth, width_factor, num_classes = 3, 1, 10      # depth//3 = 1 block per layer
    key = jax.random.PRNGKey(0)
    kx, kp = jax.random.split(key)

    # NHWC input (2, 16, 16, 3)  <->  PyTorch NCHW (2, 3, 16, 16)
    x = jax.random.normal(kx, (2, 16, 16, 3), dtype=F32)
    params = init_params(kp, depth, width_factor, num_classes)

    fwd = jax.jit(lambda xx: wideresnet_forward(xx, params))
    logits = fwd(x)
    jax.block_until_ready(logits)
    assert logits.shape == (2, num_classes)
    assert bool(jnp.all(jnp.isfinite(logits)))
    print("KERNEL_OK")
</pallas_src>

<mosaic_0001>
module attributes {stable_mosaic.version = 11 : i64} {
  func.func @_matmul_stats_kernel(%arg0: i32, %arg1: i32, %arg2: i32, %arg3: memref<512x27xbf16, #tpu.memory_space<vmem>>, %arg4: memref<27x128xbf16, #tpu.memory_space<vmem>>, %arg5: memref<512x128xbf16, #tpu.memory_space<vmem>>, %arg6: memref<8x128xf32, #tpu.memory_space<vmem>>, %arg7: memref<8x128xf32, #tpu.memory_space<vmem>>, %arg8: memref<512x128xf32, #tpu.memory_space<vmem>>) attributes {dimension_semantics = [#tpu.dimension_semantics<parallel>, #tpu.dimension_semantics<parallel>, #tpu.dimension_semantics<arbitrary>], iteration_bounds = array<i64: 1, 1, 1>, scalar_prefetch = 0 : i64, scratch_operands = 1 : i64, tpu.core_type = #tpu.core_type<tc>, window_params = [{transform_indices = @transform_0, window_bounds = array<i64: 512, 27>}, {transform_indices = @transform_1, window_bounds = array<i64: 27, 128>}, {transform_indices = @transform_2, window_bounds = array<i64: 512, 128>}, {transform_indices = @transform_3, window_bounds = array<i64: 8, 128>}, {transform_indices = @transform_4, window_bounds = array<i64: 8, 128>}]} {
    %c0_i32 = arith.constant 0 : i32
    %0 = arith.cmpi eq, %arg2, %c0_i32 : i32
    %1 = arith.extui %0 : i1 to i32
    %c0_i32_0 = arith.constant 0 : i32
    %2 = arith.cmpi ne, %1, %c0_i32_0 : i32
    scf.if %2 {
      %cst_10 = arith.constant 0.000000e+00 : f32
      %12 = vector.broadcast %cst_10 : f32 to vector<512x128xf32>
      %c0_11 = arith.constant 0 : index
      %c0_12 = arith.constant 0 : index
      %13 = vector.load %arg8[%c0_11, %c0_12] : memref<512x128xf32, #tpu.memory_space<vmem>>, vector<512x128xf32>
      tpu.vector_store %arg8[%c0_11, %c0_12], %12 {strides = array<i32>} : memref<512x128xf32, #tpu.memory_space<vmem>>, vector<512x128xf32>,
    } else {
    }
    %c0 = arith.constant 0 : index
    %c0_1 = arith.constant 0 : index
    %3 = vector.load %arg8[%c0, %c0_1] : memref<512x128xf32, #tpu.memory_space<vmem>>, vector<512x128xf32>
    %c0_2 = arith.constant 0 : index
    %c0_3 = arith.constant 0 : index
    %4 = vector.load %arg3[%c0_2, %c0_3] : memref<512x27xbf16, #tpu.memory_space<vmem>>, vector<512x27xbf16>
    %c0_4 = arith.constant 0 : index
    %c0_5 = arith.constant 0 : index
    %5 = vector.load %arg4[%c0_4, %c0_5] : memref<27x128xbf16, #tpu.memory_space<vmem>>, vector<27x128xbf16>
    %cst = arith.constant dense<0.000000e+00> : vector<512x128xf32>
    %6 = tpu.matmul %4, %5, %cst {dimension_numbers = #tpu.dot_dimension_numbers<[1], [0], [0], [1], [0, 0, 1, 1], [], []>} : vector<512x27xbf16>, vector<27x128xbf16>, vector<512x128xf32> -> vector<512x128xf32>
    %7 = arith.addf %3, %6 : vector<512x128xf32>
    %c0_6 = arith.constant 0 : index
    %c0_7 = arith.constant 0 : index
    %8 = vector.load %arg8[%c0_6, %c0_7] : memref<512x128xf32, #tpu.memory_space<vmem>>, vector<512x128xf32>
    tpu.vector_store %arg8[%c0_6, %c0_7], %7 {strides = array<i32>} : memref<512x128xf32, #tpu.memory_space<vmem>>, vector<512x128xf32>,
    %c0_i32_8 = arith.constant 0 : i32
    %9 = arith.cmpi eq, %arg2, %c0_i32_8 : i32
    %10 = arith.extui %9 : i1 to i32
    %c0_i32_9 = arith.constant 0 : i32
    %11 = arith.cmpi ne, %10, %c0_i32_9 : i32
    scf.if %11 {
      %c0_10 = arith.constant 0 : index
      %c0_11 = arith.constant 0 : index
      %12 = vector.load %arg8[%c0_10, %c0_11] : memref<512x128xf32, #tpu.memory_space<vmem>>, vector<512x128xf32>
      %13 = arith.truncf %12 : vector<512x128xf32> to vector<512x128xbf16>
      %c0_12 = arith.constant 0 : index
      %c0_13 = arith.constant 0 : index
      %14 = vector.load %arg5[%c0_12, %c0_13] : memref<512x128xbf16, #tpu.memory_space<vmem>>, vector<512x128xbf16>
      tpu.vector_store %arg5[%c0_12, %c0_13], %13 {strides = array<i32>} : memref<512x128xbf16, #tpu.memory_space<vmem>>, vector<512x128xbf16>,
      %cst_14 = arith.constant dense<0.000000e+00> : vector<128xf32>
      %15 = vector.multi_reduction <add>, %12, %cst_14 [0] : vector<512x128xf32> to vector<128xf32>
      %16 = vector.shape_cast %15 : vector<128xf32> to vector<1x128xf32>
      %17 = arith.mulf %12, %12 : vector<512x128xf32>
      %cst_15 = arith.constant dense<0.000000e+00> : vector<128xf32>
      %18 = vector.multi_reduction <add>, %17, %cst_15 [0] : vector<512x128xf32> to vector<128xf32>
      %19 = vector.shape_cast %18 : vector<128xf32> to vector<1x128xf32>
      %20 = vector.shape_cast %16 : vector<1x128xf32> to vector<1x128xf32>
      %21 = vector.broadcast %20 : vector<1x128xf32> to vector<8x128xf32>
      %c0_16 = arith.constant 0 : index
      %c0_17 = arith.constant 0 : index
      %22 = vector.load %arg6[%c0_16, %c0_17] : memref<8x128xf32, #tpu.memory_space<vmem>>, vector<8x128xf32>
      tpu.vector_store %arg6[%c0_16, %c0_17], %21 {strides = array<i32>} : memref<8x128xf32, #tpu.memory_space<vmem>>, vector<8x128xf32>,
      %23 = vector.shape_cast %19 : vector<1x128xf32> to vector<1x128xf32>
      %24 = vector.broadcast %23 : vector<1x128xf32> to vector<8x128xf32>
      %c0_18 = arith.constant 0 : index
      %c0_19 = arith.constant 0 : index
      %25 = vector.load %arg7[%c0_18, %c0_19] : memref<8x128xf32, #tpu.memory_space<vmem>>, vector<8x128xf32>
      tpu.vector_store %arg7[%c0_18, %c0_19], %24 {strides = array<i32>} : memref<8x128xf32, #tpu.memory_space<vmem>>, vector<8x128xf32>,
    } else {
    }
    return
  }
  func.func @transform_0(%arg0: i32, %arg1: i32, %arg2: i32) -> (i32, i32) {
    %c0_i32 = arith.constant 0 : i32
    return %arg0, %arg2 : i32, i32
  }
  func.func @transform_1(%arg0: i32, %arg1: i32, %arg2: i32) -> (i32, i32) {
    %c0_i32 = arith.constant 0 : i32
    return %arg2, %arg1 : i32, i32
  }
  func.func @transform_2(%arg0: i32, %arg1: i32, %arg2: i32) -> (i32, i32) {
    %c0_i32 = arith.constant 0 : i32
    return %arg0, %arg1 : i32, i32
  }
  func.func @transform_3(%arg0: i32, %arg1: i32, %arg2: i32) -> (i32, i32) {
    %c0_i32 = arith.constant 0 : i32
    return %arg0, %arg1 : i32, i32
  }
  func.func @transform_4(%arg0: i32, %arg1: i32, %arg2: i32) -> (i32, i32) {
    %c0_i32 = arith.constant 0 : i32
    return %arg0, %arg1 : i32, i32
  }
}

module attributes {stable_mosaic.version = 11 : i64} {
  func.func @_matmul_stats_kernel(%arg0: i32, %arg1: i32, %arg2: i32, %arg3: memref<512x144xbf16, #tpu.memory_space<vmem>>, %arg4: memref<144x128xbf16, #tpu.memory_space<vmem>>, %arg5: memref<512x128xbf16, #tpu.memory_space<vmem>>, %arg6: memref<8x128xf32, #tpu.memory_space<vmem>>, %arg7: memref<8x128xf32, #tpu.memory_space<vmem>>, %arg8: memref<512x128xf32, #tpu.memory_space<vmem>>) attributes {dimension_semantics = [#tpu.dimension_semantics<parallel>, #tpu.dimension_semantics<parallel>, #tpu.dimension_semantics<arbitrary>], iteration_bounds = array<i64: 1, 1, 1>, scalar_prefetch = 0 : i64, scratch_operands = 1 : i64, tpu.core_type = #tpu.core_type<tc>, window_params = [{transform_indices = @transform_0, window_bounds = array<i64: 512, 144>}, {transform_indices = @transform_1, window_bounds = array<i64: 144, 128>}, {transform_indices = @transform_2, window_bounds = array<i64: 512, 128>}, {transform_indices = @transform_3, window_bounds = array<i64: 8, 128>}, {transform_indices = @transform_4, window_bounds = array<i64: 8, 128>}]} {
    %c0_i32 = arith.constant 0 : i32
    %0 = arith.cmpi eq, %arg2, %c0_i32 : i32
    %1 = arith.extui %0 : i1 to i32
    %c0_i32_0 = arith.constant 0 : i32
    %2 = arith.cmpi ne, %1, %c0_i32_0 : i32
    scf.if %2 {
      %cst_10 = arith.constant 0.000000e+00 : f32
      %12 = vector.broadcast %cst_10 : f32 to vector<512x128xf32>
      %c0_11 = arith.constant 0 : index
      %c0_12 = arith.constant 0 : index
      %13 = vector.load %arg8[%c0_11, %c0_12] : memref<512x128xf32, #tpu.memory_space<vmem>>, vector<512x128xf32>
      tpu.vector_store %arg8[%c0_11, %c0_12], %12 {strides = array<i32>} : memref<512x128xf32, #tpu.memory_space<vmem>>, vector<512x128xf32>,
    } else {
    }
    %c0 = arith.constant 0 : index
    %c0_1 = arith.constant 0 : index
    %3 = vector.load %arg8[%c0, %c0_1] : memref<512x128xf32, #tpu.memory_space<vmem>>, vector<512x128xf32>
    %c0_2 = arith.constant 0 : index
    %c0_3 = arith.constant 0 : index
    %4 = vector.load %arg3[%c0_2, %c0_3] : memref<512x144xbf16, #tpu.memory_space<vmem>>, vector<512x144xbf16>
    %c0_4 = arith.constant 0 : index
    %c0_5 = arith.constant 0 : index
    %5 = vector.load %arg4[%c0_4, %c0_5] : memref<144x128xbf16, #tpu.memory_space<vmem>>, vector<144x128xbf16>
    %cst = arith.constant dense<0.000000e+00> : vector<512x128xf32>
    %6 = tpu.matmul %4, %5, %cst {dimension_numbers = #tpu.dot_dimension_numbers<[1], [0], [0], [1], [0, 0, 1, 1], [], []>} : vector<512x144xbf16>, vector<144x128xbf16>, vector<512x128xf32> -> vector<512x128xf32>
    %7 = arith.addf %3, %6 : vector<512x128xf32>
    %c0_6 = arith.constant 0 : index
    %c0_7 = arith.constant 0 : index
    %8 = vector.load %arg8[%c0_6, %c0_7] : memref<512x128xf32, #tpu.memory_space<vmem>>, vector<512x128xf32>
    tpu.vector_store %arg8[%c0_6, %c0_7], %7 {strides = array<i32>} : memref<512x128xf32, #tpu.memory_space<vmem>>, vector<512x128xf32>,
    %c0_i32_8 = arith.constant 0 : i32
    %9 = arith.cmpi eq, %arg2, %c0_i32_8 : i32
    %10 = arith.extui %9 : i1 to i32
    %c0_i32_9 = arith.constant 0 : i32
    %11 = arith.cmpi ne, %10, %c0_i32_9 : i32
    scf.if %11 {
      %c0_10 = arith.constant 0 : index
      %c0_11 = arith.constant 0 : index
      %12 = vector.load %arg8[%c0_10, %c0_11] : memref<512x128xf32, #tpu.memory_space<vmem>>, vector<512x128xf32>
      %13 = arith.truncf %12 : vector<512x128xf32> to vector<512x128xbf16>
      %c0_12 = arith.constant 0 : index
      %c0_13 = arith.constant 0 : index
      %14 = vector.load %arg5[%c0_12, %c0_13] : memref<512x128xbf16, #tpu.memory_space<vmem>>, vector<512x128xbf16>
      tpu.vector_store %arg5[%c0_12, %c0_13], %13 {strides = array<i32>} : memref<512x128xbf16, #tpu.memory_space<vmem>>, vector<512x128xbf16>,
      %cst_14 = arith.constant dense<0.000000e+00> : vector<128xf32>
      %15 = vector.multi_reduction <add>, %12, %cst_14 [0] : vector<512x128xf32> to vector<128xf32>
      %16 = vector.shape_cast %15 : vector<128xf32> to vector<1x128xf32>
      %17 = arith.mulf %12, %12 : vector<512x128xf32>
      %cst_15 = arith.constant dense<0.000000e+00> : vector<128xf32>
      %18 = vector.multi_reduction <add>, %17, %cst_15 [0] : vector<512x128xf32> to vector<128xf32>
      %19 = vector.shape_cast %18 : vector<128xf32> to vector<1x128xf32>
      %20 = vector.shape_cast %16 : vector<1x128xf32> to vector<1x128xf32>
      %21 = vector.broadcast %20 : vector<1x128xf32> to vector<8x128xf32>
      %c0_16 = arith.constant 0 : index
      %c0_17 = arith.constant 0 : index
      %22 = vector.load %arg6[%c0_16, %c0_17] : memref<8x128xf32, #tpu.memory_space<vmem>>, vector<8x128xf32>
      tpu.vector_store %arg6[%c0_16, %c0_17], %21 {strides = array<i32>} : memref<8x128xf32, #tpu.memory_space<vmem>>, vector<8x128xf32>,
      %23 = vector.shape_cast %19 : vector<1x128xf32> to vector<1x128xf32>
      %24 = vector.broadcast %23 : vector<1x128xf32> to vector<8x128xf32>
      %c0_18 = arith.constant 0 : index
      %c0_19 = arith.constant 0 : index
      %25 = vector.load %arg7[%c0_18, %c0_19] : memref<8x128xf32, #tpu.memory_space<vmem>>, vector<8x128xf32>
      tpu.vector_store %arg7[%c0_18, %c0_19], %24 {strides = array<i32>} : memref<8x128xf32, #tpu.memory_space<vmem>>, vector<8x128xf32>,
    } else {
    }
    return
  }
  func.func @transform_0(%arg0: i32, %arg1: i32, %arg2: i32) -> (i32, i32) {
    %c0_i32 = arith.constant 0 : i32
    return %arg0, %arg2 : i32, i32
  }
  func.func @transform_1(%arg0: i32, %arg1: i32, %arg2: i32) -> (i32, i32) {
    %c0_i32 = arith.constant 0 : i32
    return %arg2, %arg1 : i32, i32
  }
  func.func @transform_2(%arg0: i32, %arg1: i32, %arg2: i32) -> (i32, i32) {
    %c0_i32 = arith.constant 0 : i32
    return %arg0, %arg1 : i32, i32
  }
  func.func @transform_3(%arg0: i32, %arg1: i32, %arg2: i32) -> (i32, i32) {
    %c0_i32 = arith.constant 0 : i32
    return %arg0, %arg1 : i32, i32
  }
  func.func @transform_4(%arg0: i32, %arg1: i32, %arg2: i32) -> (i32, i32) {
    %c0_i32 = arith.constant 0 : i32
    return %arg0, %arg1 : i32, i32
  }
}

module attributes {stable_mosaic.version = 11 : i64} {
  func.func @_affine_relu_kernel(%arg0: i32, %arg1: memref<512x128xbf16, #tpu.memory_space<vmem>>, %arg2: memref<1x128xf32, #tpu.memory_space<vmem>>, %arg3: memref<1x128xf32, #tpu.memory_space<vmem>>, %arg4: memref<512x128xbf16, #tpu.memory_space<vmem>>) attributes {dimension_semantics = [#tpu.dimension_semantics<parallel>], iteration_bounds = array<i64: 1>, scalar_prefetch = 0 : i64, scratch_operands = 0 : i64, tpu.core_type = #tpu.core_type<tc>, window_params = [{transform_indices = @transform_0, window_bounds = array<i64: 512, 128>}, {pipeline_mode = #tpu.pipeline_mode<synchronous>, transform_indices = @transform_1, window_bounds = array<i64: 1, 128>}, {pipeline_mode = #tpu.pipeline_mode<synchronous>, transform_indices = @transform_2, window_bounds = array<i64: 1, 128>}, {transform_indices = @transform_3, window_bounds = array<i64: 512, 128>}]} {
    %c0 = arith.constant 0 : index
    %c0_0 = arith.constant 0 : index
    %0 = vector.load %arg1[%c0, %c0_0] : memref<512x128xbf16, #tpu.memory_space<vmem>>, vector<512x128xbf16>
    %1 = arith.extf %0 : vector<512x128xbf16> to vector<512x128xf32>
    %c0_1 = arith.constant 0 : index
    %c0_2 = arith.constant 0 : index
    %2 = vector.load %arg2[%c0_1, %c0_2] : memref<1x128xf32, #tpu.memory_space<vmem>>, vector<1x128xf32>
    %3 = vector.broadcast %2 : vector<1x128xf32> to vector<512x128xf32>
    %4 = arith.mulf %1, %3 : vector<512x128xf32>
    %c0_3 = arith.constant 0 : index
    %c0_4 = arith.constant 0 : index
    %5 = vector.load %arg3[%c0_3, %c0_4] : memref<1x128xf32, #tpu.memory_space<vmem>>, vector<1x128xf32>
    %6 = vector.broadcast %5 : vector<1x128xf32> to vector<512x128xf32>
    %7 = arith.addf %4, %6 : vector<512x128xf32>
    %cst = arith.constant 0.000000e+00 : f32
    %8 = vector.broadcast %cst : f32 to vector<512x128xf32>
    %9 = arith.maximumf %7, %8 : vector<512x128xf32>
    %10 = arith.truncf %9 : vector<512x128xf32> to vector<512x128xbf16>
    %c0_5 = arith.constant 0 : index
    %c0_6 = arith.constant 0 : index
    %11 = vector.load %arg4[%c0_5, %c0_6] : memref<512x128xbf16, #tpu.memory_space<vmem>>, vector<512x128xbf16>
    tpu.vector_store %arg4[%c0_5, %c0_6], %10 {strides = array<i32>} : memref<512x128xbf16, #tpu.memory_space<vmem>>, vector<512x128xbf16>,
    return
  }
  func.func @transform_0(%arg0: i32) -> (i32, i32) {
    %c0_i32 = arith.constant 0 : i32
    %c0_i32_0 = arith.constant 0 : i32
    return %arg0, %c0_i32 : i32, i32
  }
  func.func @transform_1(%arg0: i32) -> (i32, i32) {
    %c0_i32 = arith.constant 0 : i32
    %c0_i32_0 = arith.constant 0 : i32
    %c0_i32_1 = arith.constant 0 : i32
    return %c0_i32, %c0_i32_0 : i32, i32
  }
  func.func @transform_2(%arg0: i32) -> (i32, i32) {
    %c0_i32 = arith.constant 0 : i32
    %c0_i32_0 = arith.constant 0 : i32
    %c0_i32_1 = arith.constant 0 : i32
    return %c0_i32, %c0_i32_0 : i32, i32
  }
  func.func @transform_3(%arg0: i32) -> (i32, i32) {
    %c0_i32 = arith.constant 0 : i32
    %c0_i32_0 = arith.constant 0 : i32
    return %arg0, %c0_i32 : i32, i32
  }
}

module attributes {stable_mosaic.version = 11 : i64} {
  func.func @_matmul_stats_kernel(%arg0: i32, %arg1: i32, %arg2: i32, %arg3: memref<128x144xbf16, #tpu.memory_space<vmem>>, %arg4: memref<144x128xbf16, #tpu.memory_space<vmem>>, %arg5: memref<128x128xbf16, #tpu.memory_space<vmem>>, %arg6: memref<8x128xf32, #tpu.memory_space<vmem>>, %arg7: memref<8x128xf32, #tpu.memory_space<vmem>>, %arg8: memref<128x128xf32, #tpu.memory_space<vmem>>) attributes {dimension_semantics = [#tpu.dimension_semantics<parallel>, #tpu.dimension_semantics<parallel>, #tpu.dimension_semantics<arbitrary>], iteration_bounds = array<i64: 1, 1, 1>, scalar_prefetch = 0 : i64, scratch_operands = 1 : i64, tpu.core_type = #tpu.core_type<tc>, window_params = [{transform_indices = @transform_0, window_bounds = array<i64: 128, 144>}, {transform_indices = @transform_1, window_bounds = array<i64: 144, 128>}, {transform_indices = @transform_2, window_bounds = array<i64: 128, 128>}, {transform_indices = @transform_3, window_bounds = array<i64: 8, 128>}, {transform_indices = @transform_4, window_bounds = array<i64: 8, 128>}]} {
    %c0_i32 = arith.constant 0 : i32
    %0 = arith.cmpi eq, %arg2, %c0_i32 : i32
    %1 = arith.extui %0 : i1 to i32
    %c0_i32_0 = arith.constant 0 : i32
    %2 = arith.cmpi ne, %1, %c0_i32_0 : i32
    scf.if %2 {
      %cst_10 = arith.constant 0.000000e+00 : f32
      %12 = vector.broadcast %cst_10 : f32 to vector<128x128xf32>
      %c0_11 = arith.constant 0 : index
      %c0_12 = arith.constant 0 : index
      %13 = vector.load %arg8[%c0_11, %c0_12] : memref<128x128xf32, #tpu.memory_space<vmem>>, vector<128x128xf32>
      tpu.vector_store %arg8[%c0_11, %c0_12], %12 {strides = array<i32>} : memref<128x128xf32, #tpu.memory_space<vmem>>, vector<128x128xf32>,
    } else {
    }
    %c0 = arith.constant 0 : index
    %c0_1 = arith.constant 0 : index
    %3 = vector.load %arg8[%c0, %c0_1] : memref<128x128xf32, #tpu.memory_space<vmem>>, vector<128x128xf32>
    %c0_2 = arith.constant 0 : index
    %c0_3 = arith.constant 0 : index
    %4 = vector.load %arg3[%c0_2, %c0_3] : memref<128x144xbf16, #tpu.memory_space<vmem>>, vector<128x144xbf16>
    %c0_4 = arith.constant 0 : index
    %c0_5 = arith.constant 0 : index
    %5 = vector.load %arg4[%c0_4, %c0_5] : memref<144x128xbf16, #tpu.memory_space<vmem>>, vector<144x128xbf16>
    %cst = arith.constant dense<0.000000e+00> : vector<128x128xf32>
    %6 = tpu.matmul %4, %5, %cst {dimension_numbers = #tpu.dot_dimension_numbers<[1], [0], [0], [1], [0, 0, 1, 1], [], []>} : vector<128x144xbf16>, vector<144x128xbf16>, vector<128x128xf32> -> vector<128x128xf32>
    %7 = arith.addf %3, %6 : vector<128x128xf32>
    %c0_6 = arith.constant 0 : index
    %c0_7 = arith.constant 0 : index
    %8 = vector.load %arg8[%c0_6, %c0_7] : memref<128x128xf32, #tpu.memory_space<vmem>>, vector<128x128xf32>
    tpu.vector_store %arg8[%c0_6, %c0_7], %7 {strides = array<i32>} : memref<128x128xf32, #tpu.memory_space<vmem>>, vector<128x128xf32>,
    %c0_i32_8 = arith.constant 0 : i32
    %9 = arith.cmpi eq, %arg2, %c0_i32_8 : i32
    %10 = arith.extui %9 : i1 to i32
    %c0_i32_9 = arith.constant 0 : i32
    %11 = arith.cmpi ne, %10, %c0_i32_9 : i32
    scf.if %11 {
      %c0_10 = arith.constant 0 : index
      %c0_11 = arith.constant 0 : index
      %12 = vector.load %arg8[%c0_10, %c0_11] : memref<128x128xf32, #tpu.memory_space<vmem>>, vector<128x128xf32>
      %13 = arith.truncf %12 : vector<128x128xf32> to vector<128x128xbf16>
      %c0_12 = arith.constant 0 : index
      %c0_13 = arith.constant 0 : index
      %14 = vector.load %arg5[%c0_12, %c0_13] : memref<128x128xbf16, #tpu.memory_space<vmem>>, vector<128x128xbf16>
      tpu.vector_store %arg5[%c0_12, %c0_13], %13 {strides = array<i32>} : memref<128x128xbf16, #tpu.memory_space<vmem>>, vector<128x128xbf16>,
      %cst_14 = arith.constant dense<0.000000e+00> : vector<128xf32>
      %15 = vector.multi_reduction <add>, %12, %cst_14 [0] : vector<128x128xf32> to vector<128xf32>
      %16 = vector.shape_cast %15 : vector<128xf32> to vector<1x128xf32>
      %17 = arith.mulf %12, %12 : vector<128x128xf32>
      %cst_15 = arith.constant dense<0.000000e+00> : vector<128xf32>
      %18 = vector.multi_reduction <add>, %17, %cst_15 [0] : vector<128x128xf32> to vector<128xf32>
      %19 = vector.shape_cast %18 : vector<128xf32> to vector<1x128xf32>
      %20 = vector.shape_cast %16 : vector<1x128xf32> to vector<1x128xf32>
      %21 = vector.broadcast %20 : vector<1x128xf32> to vector<8x128xf32>
      %c0_16 = arith.constant 0 : index
      %c0_17 = arith.constant 0 : index
      %22 = vector.load %arg6[%c0_16, %c0_17] : memref<8x128xf32, #tpu.memory_space<vmem>>, vector<8x128xf32>
      tpu.vector_store %arg6[%c0_16, %c0_17], %21 {strides = array<i32>} : memref<8x128xf32, #tpu.memory_space<vmem>>, vector<8x128xf32>,
      %23 = vector.shape_cast %19 : vector<1x128xf32> to vector<1x128xf32>
      %24 = vector.broadcast %23 : vector<1x128xf32> to vector<8x128xf32>
      %c0_18 = arith.constant 0 : index
      %c0_19 = arith.constant 0 : index
      %25 = vector.load %arg7[%c0_18, %c0_19] : memref<8x128xf32, #tpu.memory_space<vmem>>, vector<8x128xf32>
      tpu.vector_store %arg7[%c0_18, %c0_19], %24 {strides = array<i32>} : memref<8x128xf32, #tpu.memory_space<vmem>>, vector<8x128xf32>,
    } else {
    }
    return
  }
  func.func @transform_0(%arg0: i32, %arg1: i32, %arg2: i32) -> (i32, i32) {
    %c0_i32 = arith.constant 0 : i32
    return %arg0, %arg2 : i32, i32
  }
  func.func @transform_1(%arg0: i32, %arg1: i32, %arg2: i32) -> (i32, i32) {
    %c0_i32 = arith.constant 0 : i32
    return %arg2, %arg1 : i32, i32
  }
  func.func @transform_2(%arg0: i32, %arg1: i32, %arg2: i32) -> (i32, i32) {
    %c0_i32 = arith.constant 0 : i32
    return %arg0, %arg1 : i32, i32
  }
  func.func @transform_3(%arg0: i32, %arg1: i32, %arg2: i32) -> (i32, i32) {
    %c0_i32 = arith.constant 0 : i32
    return %arg0, %arg1 : i32, i32
  }
  func.func @transform_4(%arg0: i32, %arg1: i32, %arg2: i32) -> (i32, i32) {
    %c0_i32 = arith.constant 0 : i32
    return %arg0, %arg1 : i32, i32
  }
}

module attributes {stable_mosaic.version = 11 : i64} {
  func.func @_affine_relu_kernel(%arg0: i32, %arg1: memref<128x128xbf16, #tpu.memory_space<vmem>>, %arg2: memref<1x128xf32, #tpu.memory_space<vmem>>, %arg3: memref<1x128xf32, #tpu.memory_space<vmem>>, %arg4: memref<128x128xbf16, #tpu.memory_space<vmem>>) attributes {dimension_semantics = [#tpu.dimension_semantics<parallel>], iteration_bounds = array<i64: 1>, scalar_prefetch = 0 : i64, scratch_operands = 0 : i64, tpu.core_type = #tpu.core_type<tc>, window_params = [{transform_indices = @transform_0, window_bounds = array<i64: 128, 128>}, {pipeline_mode = #tpu.pipeline_mode<synchronous>, transform_indices = @transform_1, window_bounds = array<i64: 1, 128>}, {pipeline_mode = #tpu.pipeline_mode<synchronous>, transform_indices = @transform_2, window_bounds = array<i64: 1, 128>}, {transform_indices = @transform_3, window_bounds = array<i64: 128, 128>}]} {
    %c0 = arith.constant 0 : index
    %c0_0 = arith.constant 0 : index
    %0 = vector.load %arg1[%c0, %c0_0] : memref<128x128xbf16, #tpu.memory_space<vmem>>, vector<128x128xbf16>
    %1 = arith.extf %0 : vector<128x128xbf16> to vector<128x128xf32>
    %c0_1 = arith.constant 0 : index
    %c0_2 = arith.constant 0 : index
    %2 = vector.load %arg2[%c0_1, %c0_2] : memref<1x128xf32, #tpu.memory_space<vmem>>, vector<1x128xf32>
    %3 = vector.broadcast %2 : vector<1x128xf32> to vector<128x128xf32>
    %4 = arith.mulf %1, %3 : vector<128x128xf32>
    %c0_3 = arith.constant 0 : index
    %c0_4 = arith.constant 0 : index
    %5 = vector.load %arg3[%c0_3, %c0_4] : memref<1x128xf32, #tpu.memory_space<vmem>>, vector<1x128xf32>
    %6 = vector.broadcast %5 : vector<1x128xf32> to vector<128x128xf32>
    %7 = arith.addf %4, %6 : vector<128x128xf32>
    %cst = arith.constant 0.000000e+00 : f32
    %8 = vector.broadcast %cst : f32 to vector<128x128xf32>
    %9 = arith.maximumf %7, %8 : vector<128x128xf32>
    %10 = arith.truncf %9 : vector<128x128xf32> to vector<128x128xbf16>
    %c0_5 = arith.constant 0 : index
    %c0_6 = arith.constant 0 : index
    %11 = vector.load %arg4[%c0_5, %c0_6] : memref<128x128xbf16, #tpu.memory_space<vmem>>, vector<128x128xbf16>
    tpu.vector_store %arg4[%c0_5, %c0_6], %10 {strides = array<i32>} : memref<128x128xbf16, #tpu.memory_space<vmem>>, vector<128x128xbf16>,
    return
  }
  func.func @transform_0(%arg0: i32) -> (i32, i32) {
    %c0_i32 = arith.constant 0 : i32
    %c0_i32_0 = arith.constant 0 : i32
    return %arg0, %c0_i32 : i32, i32
  }
  func.func @transform_1(%arg0: i32) -> (i32, i32) {
    %c0_i32 = arith.constant 0 : i32
    %c0_i32_0 = arith.constant 0 : i32
    %c0_i32_1 = arith.constant 0 : i32
    return %c0_i32, %c0_i32_0 : i32, i32
  }
  func.func @transform_2(%arg0: i32) -> (i32, i32) {
    %c0_i32 = arith.constant 0 : i32
    %c0_i32_0 = arith.constant 0 : i32
    %c0_i32_1 = arith.constant 0 : i32
    return %c0_i32, %c0_i32_0 : i32, i32
  }
  func.func @transform_3(%arg0: i32) -> (i32, i32) {
    %c0_i32 = arith.constant 0 : i32
    %c0_i32_0 = arith.constant 0 : i32
    return %arg0, %c0_i32 : i32, i32
  }
}

module attributes {stable_mosaic.version = 11 : i64} {
  func.func @_matmul_stats_kernel(%arg0: i32, %arg1: i32, %arg2: i32, %arg3: memref<32x288xbf16, #tpu.memory_space<vmem>>, %arg4: memref<288x128xbf16, #tpu.memory_space<vmem>>, %arg5: memref<32x128xbf16, #tpu.memory_space<vmem>>, %arg6: memref<8x128xf32, #tpu.memory_space<vmem>>, %arg7: memref<8x128xf32, #tpu.memory_space<vmem>>, %arg8: memref<32x128xf32, #tpu.memory_space<vmem>>) attributes {dimension_semantics = [#tpu.dimension_semantics<parallel>, #tpu.dimension_semantics<parallel>, #tpu.dimension_semantics<arbitrary>], iteration_bounds = array<i64: 1, 1, 1>, scalar_prefetch = 0 : i64, scratch_operands = 1 : i64, tpu.core_type = #tpu.core_type<tc>, window_params = [{transform_indices = @transform_0, window_bounds = array<i64: 32, 288>}, {transform_indices = @transform_1, window_bounds = array<i64: 288, 128>}, {transform_indices = @transform_2, window_bounds = array<i64: 32, 128>}, {transform_indices = @transform_3, window_bounds = array<i64: 8, 128>}, {transform_indices = @transform_4, window_bounds = array<i64: 8, 128>}]} {
    %c0_i32 = arith.constant 0 : i32
    %0 = arith.cmpi eq, %arg2, %c0_i32 : i32
    %1 = arith.extui %0 : i1 to i32
    %c0_i32_0 = arith.constant 0 : i32
    %2 = arith.cmpi ne, %1, %c0_i32_0 : i32
    scf.if %2 {
      %cst_10 = arith.constant 0.000000e+00 : f32
      %12 = vector.broadcast %cst_10 : f32 to vector<32x128xf32>
      %c0_11 = arith.constant 0 : index
      %c0_12 = arith.constant 0 : index
      %13 = vector.load %arg8[%c0_11, %c0_12] : memref<32x128xf32, #tpu.memory_space<vmem>>, vector<32x128xf32>
      tpu.vector_store %arg8[%c0_11, %c0_12], %12 {strides = array<i32>} : memref<32x128xf32, #tpu.memory_space<vmem>>, vector<32x128xf32>,
    } else {
    }
    %c0 = arith.constant 0 : index
    %c0_1 = arith.constant 0 : index
    %3 = vector.load %arg8[%c0, %c0_1] : memref<32x128xf32, #tpu.memory_space<vmem>>, vector<32x128xf32>
    %c0_2 = arith.constant 0 : index
    %c0_3 = arith.constant 0 : index
    %4 = vector.load %arg3[%c0_2, %c0_3] : memref<32x288xbf16, #tpu.memory_space<vmem>>, vector<32x288xbf16>
    %c0_4 = arith.constant 0 : index
    %c0_5 = arith.constant 0 : index
    %5 = vector.load %arg4[%c0_4, %c0_5] : memref<288x128xbf16, #tpu.memory_space<vmem>>, vector<288x128xbf16>
    %cst = arith.constant dense<0.000000e+00> : vector<32x128xf32>
    %6 = tpu.matmul %4, %5, %cst {dimension_numbers = #tpu.dot_dimension_numbers<[1], [0], [0], [1], [0, 0, 1, 1], [], []>} : vector<32x288xbf16>, vector<288x128xbf16>, vector<32x128xf32> -> vector<32x128xf32>
    %7 = arith.addf %3, %6 : vector<32x128xf32>
    %c0_6 = arith.constant 0 : index
    %c0_7 = arith.constant 0 : index
    %8 = vector.load %arg8[%c0_6, %c0_7] : memref<32x128xf32, #tpu.memory_space<vmem>>, vector<32x128xf32>
    tpu.vector_store %arg8[%c0_6, %c0_7], %7 {strides = array<i32>} : memref<32x128xf32, #tpu.memory_space<vmem>>, vector<32x128xf32>,
    %c0_i32_8 = arith.constant 0 : i32
    %9 = arith.cmpi eq, %arg2, %c0_i32_8 : i32
    %10 = arith.extui %9 : i1 to i32
    %c0_i32_9 = arith.constant 0 : i32
    %11 = arith.cmpi ne, %10, %c0_i32_9 : i32
    scf.if %11 {
      %c0_10 = arith.constant 0 : index
      %c0_11 = arith.constant 0 : index
      %12 = vector.load %arg8[%c0_10, %c0_11] : memref<32x128xf32, #tpu.memory_space<vmem>>, vector<32x128xf32>
      %13 = arith.truncf %12 : vector<32x128xf32> to vector<32x128xbf16>
      %c0_12 = arith.constant 0 : index
      %c0_13 = arith.constant 0 : index
      %14 = vector.load %arg5[%c0_12, %c0_13] : memref<32x128xbf16, #tpu.memory_space<vmem>>, vector<32x128xbf16>
      tpu.vector_store %arg5[%c0_12, %c0_13], %13 {strides = array<i32>} : memref<32x128xbf16, #tpu.memory_space<vmem>>, vector<32x128xbf16>,
      %cst_14 = arith.constant dense<0.000000e+00> : vector<128xf32>
      %15 = vector.multi_reduction <add>, %12, %cst_14 [0] : vector<32x128xf32> to vector<128xf32>
      %16 = vector.shape_cast %15 : vector<128xf32> to vector<1x128xf32>
      %17 = arith.mulf %12, %12 : vector<32x128xf32>
      %cst_15 = arith.constant dense<0.000000e+00> : vector<128xf32>
      %18 = vector.multi_reduction <add>, %17, %cst_15 [0] : vector<32x128xf32> to vector<128xf32>
      %19 = vector.shape_cast %18 : vector<128xf32> to vector<1x128xf32>
      %20 = vector.shape_cast %16 : vector<1x128xf32> to vector<1x128xf32>
      %21 = vector.broadcast %20 : vector<1x128xf32> to vector<8x128xf32>
      %c0_16 = arith.constant 0 : index
      %c0_17 = arith.constant 0 : index
      %22 = vector.load %arg6[%c0_16, %c0_17] : memref<8x128xf32, #tpu.memory_space<vmem>>, vector<8x128xf32>
      tpu.vector_store %arg6[%c0_16, %c0_17], %21 {strides = array<i32>} : memref<8x128xf32, #tpu.memory_space<vmem>>, vector<8x128xf32>,
      %23 = vector.shape_cast %19 : vector<1x128xf32> to vector<1x128xf32>
      %24 = vector.broadcast %23 : vector<1x128xf32> to vector<8x128xf32>
      %c0_18 = arith.constant 0 : index
      %c0_19 = arith.constant 0 : index
      %25 = vector.load %arg7[%c0_18, %c0_19] : memref<8x128xf32, #tpu.memory_space<vmem>>, vector<8x128xf32>
      tpu.vector_store %arg7[%c0_18, %c0_19], %24 {strides = array<i32>} : memref<8x128xf32, #tpu.memory_space<vmem>>, vector<8x128xf32>,
    } else {
    }
    return
  }
  func.func @transform_0(%arg0: i32, %arg1: i32, %arg2: i32) -> (i32, i32) {
    %c0_i32 = arith.constant 0 : i32
    return %arg0, %arg2 : i32, i32
  }
  func.func @transform_1(%arg0: i32, %arg1: i32, %arg2: i32) -> (i32, i32) {
    %c0_i32 = arith.constant 0 : i32
    return %arg2, %arg1 : i32, i32
  }
  func.func @transform_2(%arg0: i32, %arg1: i32, %arg2: i32) -> (i32, i32) {
    %c0_i32 = arith.constant 0 : i32
    return %arg0, %arg1 : i32, i32
  }
  func.func @transform_3(%arg0: i32, %arg1: i32, %arg2: i32) -> (i32, i32) {
    %c0_i32 = arith.constant 0 : i32
    return %arg0, %arg1 : i32, i32
  }
  func.func @transform_4(%arg0: i32, %arg1: i32, %arg2: i32) -> (i32, i32) {
    %c0_i32 = arith.constant 0 : i32
    return %arg0, %arg1 : i32, i32
  }
}

module attributes {stable_mosaic.version = 11 : i64} {
  func.func @_affine_relu_kernel(%arg0: i32, %arg1: memref<32x128xbf16, #tpu.memory_space<vmem>>, %arg2: memref<1x128xf32, #tpu.memory_space<vmem>>, %arg3: memref<1x128xf32, #tpu.memory_space<vmem>>, %arg4: memref<32x128xbf16, #tpu.memory_space<vmem>>) attributes {dimension_semantics = [#tpu.dimension_semantics<parallel>], iteration_bounds = array<i64: 1>, scalar_prefetch = 0 : i64, scratch_operands = 0 : i64, tpu.core_type = #tpu.core_type<tc>, window_params = [{transform_indices = @transform_0, window_bounds = array<i64: 32, 128>}, {pipeline_mode = #tpu.pipeline_mode<synchronous>, transform_indices = @transform_1, window_bounds = array<i64: 1, 128>}, {pipeline_mode = #tpu.pipeline_mode<synchronous>, transform_indices = @transform_2, window_bounds = array<i64: 1, 128>}, {transform_indices = @transform_3, window_bounds = array<i64: 32, 128>}]} {
    %c0 = arith.constant 0 : index
    %c0_0 = arith.constant 0 : index
    %0 = vector.load %arg1[%c0, %c0_0] : memref<32x128xbf16, #tpu.memory_space<vmem>>, vector<32x128xbf16>
    %1 = arith.extf %0 : vector<32x128xbf16> to vector<32x128xf32>
    %c0_1 = arith.constant 0 : index
    %c0_2 = arith.constant 0 : index
    %2 = vector.load %arg2[%c0_1, %c0_2] : memref<1x128xf32, #tpu.memory_space<vmem>>, vector<1x128xf32>
    %3 = vector.broadcast %2 : vector<1x128xf32> to vector<32x128xf32>
    %4 = arith.mulf %1, %3 : vector<32x128xf32>
    %c0_3 = arith.constant 0 : index
    %c0_4 = arith.constant 0 : index
    %5 = vector.load %arg3[%c0_3, %c0_4] : memref<1x128xf32, #tpu.memory_space<vmem>>, vector<1x128xf32>
    %6 = vector.broadcast %5 : vector<1x128xf32> to vector<32x128xf32>
    %7 = arith.addf %4, %6 : vector<32x128xf32>
    %cst = arith.constant 0.000000e+00 : f32
    %8 = vector.broadcast %cst : f32 to vector<32x128xf32>
    %9 = arith.maximumf %7, %8 : vector<32x128xf32>
    %10 = arith.truncf %9 : vector<32x128xf32> to vector<32x128xbf16>
    %c0_5 = arith.constant 0 : index
    %c0_6 = arith.constant 0 : index
    %11 = vector.load %arg4[%c0_5, %c0_6] : memref<32x128xbf16, #tpu.memory_space<vmem>>, vector<32x128xbf16>
    tpu.vector_store %arg4[%c0_5, %c0_6], %10 {strides = array<i32>} : memref<32x128xbf16, #tpu.memory_space<vmem>>, vector<32x128xbf16>,
    return
  }
  func.func @transform_0(%arg0: i32) -> (i32, i32) {
    %c0_i32 = arith.constant 0 : i32
    %c0_i32_0 = arith.constant 0 : i32
    return %arg0, %c0_i32 : i32, i32
  }
  func.func @transform_1(%arg0: i32) -> (i32, i32) {
    %c0_i32 = arith.constant 0 : i32
    %c0_i32_0 = arith.constant 0 : i32
    %c0_i32_1 = arith.constant 0 : i32
    return %c0_i32, %c0_i32_0 : i32, i32
  }
  func.func @transform_2(%arg0: i32) -> (i32, i32) {
    %c0_i32 = arith.constant 0 : i32
    %c0_i32_0 = arith.constant 0 : i32
    %c0_i32_1 = arith.constant 0 : i32
    return %c0_i32, %c0_i32_0 : i32, i32
  }
  func.func @transform_3(%arg0: i32) -> (i32, i32) {
    %c0_i32 = arith.constant 0 : i32
    %c0_i32_0 = arith.constant 0 : i32
    return %arg0, %c0_i32 : i32, i32
  }
}

module attributes {stable_mosaic.version = 11 : i64} {
  func.func @_colstats_kernel(%arg0: i32, %arg1: memref<32x64xbf16, #tpu.memory_space<vmem>>, %arg2: memref<1x64xf32, #tpu.memory_space<vmem>>, %arg3: memref<1x64xf32, #tpu.memory_space<vmem>>) attributes {dimension_semantics = [#tpu.dimension_semantics<arbitrary>], iteration_bounds = array<i64: 1>, scalar_prefetch = 0 : i64, scratch_operands = 0 : i64, tpu.core_type = #tpu.core_type<tc>, window_params = [{transform_indices = @transform_0, window_bounds = array<i64: 32, 64>}, {pipeline_mode = #tpu.pipeline_mode<synchronous>, transform_indices = @transform_1, window_bounds = array<i64: 1, 64>}, {pipeline_mode = #tpu.pipeline_mode<synchronous>, transform_indices = @transform_2, window_bounds = array<i64: 1, 64>}]} {
    %c0_i32 = arith.constant 0 : i32
    %0 = arith.cmpi eq, %arg0, %c0_i32 : i32
    %1 = arith.extui %0 : i1 to i32
    %c0_i32_0 = arith.constant 0 : i32
    %2 = arith.cmpi ne, %1, %c0_i32_0 : i32
    scf.if %2 {
      %cst_11 = arith.constant 0.000000e+00 : f32
      %16 = vector.broadcast %cst_11 : f32 to vector<1x64xf32>
      %c0_12 = arith.constant 0 : index
      %c0_13 = arith.constant 0 : index
      %17 = vector.load %arg2[%c0_12, %c0_13] : memref<1x64xf32, #tpu.memory_space<vmem>>, vector<1x64xf32>
      tpu.vector_store %arg2[%c0_12, %c0_13], %16 {strides = array<i32>} : memref<1x64xf32, #tpu.memory_space<vmem>>, vector<1x64xf32>,
      %cst_14 = arith.constant 0.000000e+00 : f32
      %18 = vector.broadcast %cst_14 : f32 to vector<1x64xf32>
      %c0_15 = arith.constant 0 : index
      %c0_16 = arith.constant 0 : index
      %19 = vector.load %arg3[%c0_15, %c0_16] : memref<1x64xf32, #tpu.memory_space<vmem>>, vector<1x64xf32>
      tpu.vector_store %arg3[%c0_15, %c0_16], %18 {strides = array<i32>} : memref<1x64xf32, #tpu.memory_space<vmem>>, vector<1x64xf32>,
    } else {
    }
    %c0 = arith.constant 0 : index
    %c0_1 = arith.constant 0 : index
    %3 = vector.load %arg1[%c0, %c0_1] : memref<32x64xbf16, #tpu.memory_space<vmem>>, vector<32x64xbf16>
    %4 = arith.extf %3 : vector<32x64xbf16> to vector<32x64xf32>
    %c0_2 = arith.constant 0 : index
    %c0_3 = arith.constant 0 : index
    %5 = vector.load %arg2[%c0_2, %c0_3] : memref<1x64xf32, #tpu.memory_space<vmem>>, vector<1x64xf32>
    %cst = arith.constant dense<0.000000e+00> : vector<64xf32>
    %6 = vector.multi_reduction <add>, %4, %cst [0] : vector<32x64xf32> to vector<64xf32>
    %7 = vector.shape_cast %6 : vector<64xf32> to vector<1x64xf32>
    %8 = arith.addf %5, %7 : vector<1x64xf32>
    %c0_4 = arith.constant 0 : index
    %c0_5 = arith.constant 0 : index
    %9 = vector.load %arg2[%c0_4, %c0_5] : memref<1x64xf32, #tpu.memory_space<vmem>>, vector<1x64xf32>
    tpu.vector_store %arg2[%c0_4, %c0_5], %8 {strides = array<i32>} : memref<1x64xf32, #tpu.memory_space<vmem>>, vector<1x64xf32>,
    %c0_6 = arith.constant 0 : index
    %c0_7 = arith.constant 0 : index
    %10 = vector.load %arg3[%c0_6, %c0_7] : memref<1x64xf32, #tpu.memory_space<vmem>>, vector<1x64xf32>
    %11 = arith.mulf %4, %4 : vector<32x64xf32>
    %cst_8 = arith.constant dense<0.000000e+00> : vector<64xf32>
    %12 = vector.multi_reduction <add>, %11, %cst_8 [0] : vector<32x64xf32> to vector<64xf32>
    %13 = vector.shape_cast %12 : vector<64xf32> to vector<1x64xf32>
    %14 = arith.addf %10, %13 : vector<1x64xf32>
    %c0_9 = arith.constant 0 : index
    %c0_10 = arith.constant 0 : index
    %15 = vector.load %arg3[%c0_9, %c0_10] : memref<1x64xf32, #tpu.memory_space<vmem>>, vector<1x64xf32>
    tpu.vector_store %arg3[%c0_9, %c0_10], %14 {strides = array<i32>} : memref<1x64xf32, #tpu.memory_space<vmem>>, vector<1x64xf32>,
    return
  }
  func.func @transform_0(%arg0: i32) -> (i32, i32) {
    %c0_i32 = arith.constant 0 : i32
    %c0_i32_0 = arith.constant 0 : i32
    return %arg0, %c0_i32 : i32, i32
  }
  func.func @transform_1(%arg0: i32) -> (i32, i32) {
    %c0_i32 = arith.constant 0 : i32
    %c0_i32_0 = arith.constant 0 : i32
    %c0_i32_1 = arith.constant 0 : i32
    return %c0_i32, %c0_i32_0 : i32, i32
  }
  func.func @transform_2(%arg0: i32) -> (i32, i32) {
    %c0_i32 = arith.constant 0 : i32
    %c0_i32_0 = arith.constant 0 : i32
    %c0_i32_1 = arith.constant 0 : i32
    return %c0_i32, %c0_i32_0 : i32, i32
  }
}

module attributes {stable_mosaic.version = 11 : i64} {
  func.func @_affine_relu_kernel(%arg0: i32, %arg1: memref<32x64xbf16, #tpu.memory_space<vmem>>, %arg2: memref<1x64xf32, #tpu.memory_space<vmem>>, %arg3: memref<1x64xf32, #tpu.memory_space<vmem>>, %arg4: memref<32x64xbf16, #tpu.memory_space<vmem>>) attributes {dimension_semantics = [#tpu.dimension_semantics<parallel>], iteration_bounds = array<i64: 1>, scalar_prefetch = 0 : i64, scratch_operands = 0 : i64, tpu.core_type = #tpu.core_type<tc>, window_params = [{transform_indices = @transform_0, window_bounds = array<i64: 32, 64>}, {pipeline_mode = #tpu.pipeline_mode<synchronous>, transform_indices = @transform_1, window_bounds = array<i64: 1, 64>}, {pipeline_mode = #tpu.pipeline_mode<synchronous>, transform_indices = @transform_2, window_bounds = array<i64: 1, 64>}, {transform_indices = @transform_3, window_bounds = array<i64: 32, 64>}]} {
    %c0 = arith.constant 0 : index
    %c0_0 = arith.constant 0 : index
    %0 = vector.load %arg1[%c0, %c0_0] : memref<32x64xbf16, #tpu.memory_space<vmem>>, vector<32x64xbf16>
    %1 = arith.extf %0 : vector<32x64xbf16> to vector<32x64xf32>
    %c0_1 = arith.constant 0 : index
    %c0_2 = arith.constant 0 : index
    %2 = vector.load %arg2[%c0_1, %c0_2] : memref<1x64xf32, #tpu.memory_space<vmem>>, vector<1x64xf32>
    %3 = vector.broadcast %2 : vector<1x64xf32> to vector<32x64xf32>
    %4 = arith.mulf %1, %3 : vector<32x64xf32>
    %c0_3 = arith.constant 0 : index
    %c0_4 = arith.constant 0 : index
    %5 = vector.load %arg3[%c0_3, %c0_4] : memref<1x64xf32, #tpu.memory_space<vmem>>, vector<1x64xf32>
    %6 = vector.broadcast %5 : vector<1x64xf32> to vector<32x64xf32>
    %7 = arith.addf %4, %6 : vector<32x64xf32>
    %cst = arith.constant 0.000000e+00 : f32
    %8 = vector.broadcast %cst : f32 to vector<32x64xf32>
    %9 = arith.maximumf %7, %8 : vector<32x64xf32>
    %10 = arith.truncf %9 : vector<32x64xf32> to vector<32x64xbf16>
    %c0_5 = arith.constant 0 : index
    %c0_6 = arith.constant 0 : index
    %11 = vector.load %arg4[%c0_5, %c0_6] : memref<32x64xbf16, #tpu.memory_space<vmem>>, vector<32x64xbf16>
    tpu.vector_store %arg4[%c0_5, %c0_6], %10 {strides = array<i32>} : memref<32x64xbf16, #tpu.memory_space<vmem>>, vector<32x64xbf16>,
    return
  }
  func.func @transform_0(%arg0: i32) -> (i32, i32) {
    %c0_i32 = arith.constant 0 : i32
    %c0_i32_0 = arith.constant 0 : i32
    return %arg0, %c0_i32 : i32, i32
  }
  func.func @transform_1(%arg0: i32) -> (i32, i32) {
    %c0_i32 = arith.constant 0 : i32
    %c0_i32_0 = arith.constant 0 : i32
    %c0_i32_1 = arith.constant 0 : i32
    return %c0_i32, %c0_i32_0 : i32, i32
  }
  func.func @transform_2(%arg0: i32) -> (i32, i32) {
    %c0_i32 = arith.constant 0 : i32
    %c0_i32_0 = arith.constant 0 : i32
    %c0_i32_1 = arith.constant 0 : i32
    return %c0_i32, %c0_i32_0 : i32, i32
  }
  func.func @transform_3(%arg0: i32) -> (i32, i32) {
    %c0_i32 = arith.constant 0 : i32
    %c0_i32_0 = arith.constant 0 : i32
    return %arg0, %c0_i32 : i32, i32
  }
}

module attributes {stable_mosaic.version = 11 : i64} {
  func.func @_matmul_stats_kernel(%arg0: i32, %arg1: i32, %arg2: i32, %arg3: memref<16x65xbf16, #tpu.memory_space<vmem>>, %arg4: memref<65x128xbf16, #tpu.memory_space<vmem>>, %arg5: memref<16x128xf32, #tpu.memory_space<vmem>>, %arg6: memref<8x128xf32, #tpu.memory_space<vmem>>, %arg7: memref<8x128xf32, #tpu.memory_space<vmem>>, %arg8: memref<16x128xf32, #tpu.memory_space<vmem>>) attributes {dimension_semantics = [#tpu.dimension_semantics<parallel>, #tpu.dimension_semantics<parallel>, #tpu.dimension_semantics<arbitrary>], iteration_bounds = array<i64: 1, 1, 1>, scalar_prefetch = 0 : i64, scratch_operands = 1 : i64, tpu.core_type = #tpu.core_type<tc>, window_params = [{transform_indices = @transform_0, window_bounds = array<i64: 16, 65>}, {transform_indices = @transform_1, window_bounds = array<i64: 65, 128>}, {transform_indices = @transform_2, window_bounds = array<i64: 16, 128>}, {transform_indices = @transform_3, window_bounds = array<i64: 8, 128>}, {transform_indices = @transform_4, window_bounds = array<i64: 8, 128>}]} {
    %c0_i32 = arith.constant 0 : i32
    %0 = arith.cmpi eq, %arg2, %c0_i32 : i32
    %1 = arith.extui %0 : i1 to i32
    %c0_i32_0 = arith.constant 0 : i32
    %2 = arith.cmpi ne, %1, %c0_i32_0 : i32
    scf.if %2 {
      %cst_10 = arith.constant 0.000000e+00 : f32
      %12 = vector.broadcast %cst_10 : f32 to vector<16x128xf32>
      %c0_11 = arith.constant 0 : index
      %c0_12 = arith.constant 0 : index
      %13 = vector.load %arg8[%c0_11, %c0_12] : memref<16x128xf32, #tpu.memory_space<vmem>>, vector<16x128xf32>
      tpu.vector_store %arg8[%c0_11, %c0_12], %12 {strides = array<i32>} : memref<16x128xf32, #tpu.memory_space<vmem>>, vector<16x128xf32>,
    } else {
    }
    %c0 = arith.constant 0 : index
    %c0_1 = arith.constant 0 : index
    %3 = vector.load %arg8[%c0, %c0_1] : memref<16x128xf32, #tpu.memory_space<vmem>>, vector<16x128xf32>
    %c0_2 = arith.constant 0 : index
    %c0_3 = arith.constant 0 : index
    %4 = vector.load %arg3[%c0_2, %c0_3] : memref<16x65xbf16, #tpu.memory_space<vmem>>, vector<16x65xbf16>
    %c0_4 = arith.constant 0 : index
    %c0_5 = arith.constant 0 : index
    %5 = vector.load %arg4[%c0_4, %c0_5] : memref<65x128xbf16, #tpu.memory_space<vmem>>, vector<65x128xbf16>
    %cst = arith.constant dense<0.000000e+00> : vector<16x128xf32>
    %6 = tpu.matmul %4, %5, %cst {dimension_numbers = #tpu.dot_dimension_numbers<[1], [0], [0], [1], [0, 0, 1, 1], [], []>} : vector<16x65xbf16>, vector<65x128xbf16>, vector<16x128xf32> -> vector<16x128xf32>
    %7 = arith.addf %3, %6 : vector<16x128xf32>
    %c0_6 = arith.constant 0 : index
    %c0_7 = arith.constant 0 : index
    %8 = vector.load %arg8[%c0_6, %c0_7] : memref<16x128xf32, #tpu.memory_space<vmem>>, vector<16x128xf32>
    tpu.vector_store %arg8[%c0_6, %c0_7], %7 {strides = array<i32>} : memref<16x128xf32, #tpu.memory_space<vmem>>, vector<16x128xf32>,
    %c0_i32_8 = arith.constant 0 : i32
    %9 = arith.cmpi eq, %arg2, %c0_i32_8 : i32
    %10 = arith.extui %9 : i1 to i32
    %c0_i32_9 = arith.constant 0 : i32
    %11 = arith.cmpi ne, %10, %c0_i32_9 : i32
    scf.if %11 {
      %c0_10 = arith.constant 0 : index
      %c0_11 = arith.constant 0 : index
      %12 = vector.load %arg8[%c0_10, %c0_11] : memref<16x128xf32, #tpu.memory_space<vmem>>, vector<16x128xf32>
      %c0_12 = arith.constant 0 : index
      %c0_13 = arith.constant 0 : index
      %13 = vector.load %arg5[%c0_12, %c0_13] : memref<16x128xf32, #tpu.memory_space<vmem>>, vector<16x128xf32>
      tpu.vector_store %arg5[%c0_12, %c0_13], %12 {strides = array<i32>} : memref<16x128xf32, #tpu.memory_space<vmem>>, vector<16x128xf32>,
      %cst_14 = arith.constant dense<0.000000e+00> : vector<128xf32>
      %14 = vector.multi_reduction <add>, %12, %cst_14 [0] : vector<16x128xf32> to vector<128xf32>
      %15 = vector.shape_cast %14 : vector<128xf32> to vector<1x128xf32>
      %16 = arith.mulf %12, %12 : vector<16x128xf32>
      %cst_15 = arith.constant dense<0.000000e+00> : vector<128xf32>
      %17 = vector.multi_reduction <add>, %16, %cst_15 [0] : vector<16x128xf32> to vector<128xf32>
      %18 = vector.shape_cast %17 : vector<128xf32> to vector<1x128xf32>
      %19 = vector.shape_cast %15 : vector<1x128xf32> to vector<1x128xf32>
      %20 = vector.broadcast %19 : vector<1x128xf32> to vector<8x128xf32>
      %c0_16 = arith.constant 0 : index
      %c0_17 = arith.constant 0 : index
      %21 = vector.load %arg6[%c0_16, %c0_17] : memref<8x128xf32, #tpu.memory_space<vmem>>, vector<8x128xf32>
      tpu.vector_store %arg6[%c0_16, %c0_17], %20 {strides = array<i32>} : memref<8x128xf32, #tpu.memory_space<vmem>>, vector<8x128xf32>,
      %22 = vector.shape_cast %18 : vector<1x128xf32> to vector<1x128xf32>
      %23 = vector.broadcast %22 : vector<1x128xf32> to vector<8x128xf32>
      %c0_18 = arith.constant 0 : index
      %c0_19 = arith.constant 0 : index
      %24 = vector.load %arg7[%c0_18, %c0_19] : memref<8x128xf32, #tpu.memory_space<vmem>>, vector<8x128xf32>
      tpu.vector_store %arg7[%c0_18, %c0_19], %23 {strides = array<i32>} : memref<8x128xf32, #tpu.memory_space<vmem>>, vector<8x128xf32>,
    } else {
    }
    return
  }
  func.func @transform_0(%arg0: i32, %arg1: i32, %arg2: i32) -> (i32, i32) {
    %c0_i32 = arith.constant 0 : i32
    return %arg0, %arg2 : i32, i32
  }
  func.func @transform_1(%arg0: i32, %arg1: i32, %arg2: i32) -> (i32, i32) {
    %c0_i32 = arith.constant 0 : i32
    return %arg2, %arg1 : i32, i32
  }
  func.func @transform_2(%arg0: i32, %arg1: i32, %arg2: i32) -> (i32, i32) {
    %c0_i32 = arith.constant 0 : i32
    return %arg0, %arg1 : i32, i32
  }
  func.func @transform_3(%arg0: i32, %arg1: i32, %arg2: i32) -> (i32, i32) {
    %c0_i32 = arith.constant 0 : i32
    return %arg0, %arg1 : i32, i32
  }
  func.func @transform_4(%arg0: i32, %arg1: i32, %arg2: i32) -> (i32, i32) {
    %c0_i32 = arith.constant 0 : i32
    return %arg0, %arg1 : i32, i32
  }
}

</mosaic_0001>

<bundles_post_ra>
// kernel: _lambda_.10
= control target key start
LH: loop header
LB: loop body
LE: loop exit
PB: predicated region body
PF: predicated region fallthrough
CT: control target
= control target key end

     0   :  { %10 = vsyncpa [#allocation4], 0  ;;  %vm485_vm0 = vcmask 1044480   ;;  %vm486_vm1 = vcmask 1045504   ;;  %v2108_v2 = vmov 65535   ;;  %vm388_vm2 = vcmask 220160   ;;  %s2582_s0 = inlined_call_operand.vmem [shape: bf16[512,27], index: 0, kind: input, shape index: {}]   ;;  %s2583_s1 = inlined_call_operand.vmem [shape: bf16[27,128], index: 1, kind: input, shape index: {}]   ;;  %s2584_s2 = inlined_call_operand.vmem [shape: bf16[512,128], index: 2, kind: output, shape index: {0}]   ;;  %s2585_s3 = inlined_call_operand.hbm [shape: f32[8,128], index: 3, kind: output, shape index: {1}]   ;;  %s2586_s4 = inlined_call_operand.hbm [shape: f32[8,128], index: 4, kind: output, shape index: {2}]  }
   0x1   :  { %v2026_v0 = vld [vmem:[%s2583_s1] sm:$0xff]   ;;  %v2027_v1 = vld [vmem:[%s2583_s1 + $0x8] sm:$0x3f]   ;;  %v487_v3 = vsel %vm485_vm0, 4294967295, %v2108_v2  ;;  %v2030_v8 = vld [vmem:[%s2582_s0 + $0x10] sm:$0xff]  }
   0x2   :  { %1951 = vmatprep.subr.bf16.mxu0 %v2026_v0  ;;  %2019 = vmatprep.subr.bf16.mxu1 %v2026_v0  ;;  %v2028_v4 = vld [vmem:[%s2582_s0] sm:$0xff]   ;;  %v488_v5 = vsel %vm486_vm1, %v487_v3, 0  ;;  %v2029_v7 = vld [vmem:[%s2582_s0 + $0x8] sm:$0xff]   ;;  %v2031_v9 = vld [vmem:[%s2582_s0 + $0x18] sm:$0xff]  }
   0x3   :  { %1952 = vmatpush3.bf16.msra.mxu0 %v2026_v0  ;;  %2021 = vmatpush3.bf16.msra.mxu1 %v2026_v0  ;;  %v490_v6 = vand.u32 %v2027_v1, %v488_v5  ;;  %v2032_v10 = vld [vmem:[%s2582_s0 + $0x20] sm:$0xff]   ;;  %v2045_v12 = vld [vmem:[%s2582_s0 + $0x88] sm:$0xff]   ;;  %v2046_v13 = vld [vmem:[%s2582_s0 + $0x90] sm:$0xff]  }
   0x4   :  { %1955 = vmatprep.mubr.msk.bf16.mxu0 %vm388_vm2, %v2028_v4  ;;  %v2044_v11 = vld [vmem:[%s2582_s0 + $0x80] sm:$0xff]   ;;  %v2033_v14 = vld [vmem:[%s2582_s0 + $0x28] sm:$0xff]   ;;  %v2034_v15 = vld [vmem:[%s2582_s0 + $0x30] sm:$0xff]  }
   0x5   :  { %1953 = vmatprep.subr.bf16.mxu0 %v490_v6  ;;  %2020 = vmatprep.subr.bf16.mxu1 %v490_v6  ;;  %v2047_v16 = vld [vmem:[%s2582_s0 + $0x98] sm:$0xff]   ;;  %v2048_v17 = vld [vmem:[%s2582_s0 + $0xa0] sm:$0xff]   ;;  %v2049_v20 = vld [vmem:[%s2582_s0 + $0xa8] sm:$0xff]  }
   0x6   :  { %1987 = vmatprep.mubr.msk.bf16.mxu1 %vm388_vm2, %v2044_v11  ;;  %v2035_v18 = vld [vmem:[%s2582_s0 + $0x38] sm:$0xff]   ;;  %v2036_v19 = vld [vmem:[%s2582_s0 + $0x40] sm:$0xff]  }
   0x7   :  { %1954 = vmatpush3.bf16.msra.mxu0 %v490_v6  ;;  %2022 = vmatpush3.bf16.msra.mxu1 %v490_v6 }
   0xa   :  { %1956 = vmatmul.mubr.msk.bf16.vlgmr.msra.gmra.mrb[0].mxu0 %vm388_vm2, %v2029_v7  ;;  %1988 = vmatmul.mubr.msk.bf16.vlgmr.msra.gmra.mrb[0].mxu1 %vm388_vm2, %v2045_v12 }
   0xb   :  { %1959 = vmatprep.mubr.msk.bf16.mxu0 %vm388_vm2, %v2030_v8  ;;  %1991 = vmatprep.mubr.msk.bf16.mxu1 %vm388_vm2, %v2046_v13 }
  0x12   :  { %1960 = vmatmul.mubr.msk.bf16.gmra.mrb[4].mxu0 %vm388_vm2, %v2031_v9  ;;  %1992 = vmatmul.mubr.msk.bf16.gmra.mrb[4].mxu1 %vm388_vm2, %v2047_v16 }
  0x13   :  { %1963 = vmatprep.mubr.msk.bf16.mxu0 %vm388_vm2, %v2032_v10  ;;  %1995 = vmatprep.mubr.msk.bf16.mxu1 %vm388_vm2, %v2048_v17 }
  0x1a   :  { %1964 = vmatmul.mubr.msk.bf16.gmra.mrb[8].mxu0 %vm388_vm2, %v2033_v14 }
  0x1b   :  { %1967 = vmatprep.mubr.msk.bf16.mxu0 %vm388_vm2, %v2034_v15 }
  0x1c   :  { %11 = vsyncpa [#allocation6], 0  ;;  %v2050_v21 = vld [vmem:[%s2582_s0 + $0xb0] sm:$0xff]   ;;  %1996 = vmatmul.mubr.msk.bf16.gmra.mrb[8].mxu1 %vm388_vm2, %v2049_v20  ;;  %v2037_v22 = vld [vmem:[%s2582_s0 + $0x48] sm:$0xff]   ;;  %s2110_s10 = smov [#allocation5]  }
  0x1d   :  { %1999 = vmatprep.mubr.msk.bf16.mxu1 %vm388_vm2, %v2050_v21  ;;  %v2038_v23 = vld [vmem:[%s2582_s0 + $0x50] sm:$0xff]   ;;  %v2051_v24 = vld [vmem:[%s2582_s0 + $0xb8] sm:$0xff]   ;;  %v2052_v25 = vld [vmem:[%s2582_s0 + $0xc0] sm:$0xff]   ;;  %s1518_s11 = sshll.u32 %s2110_s10, 4  ;;  %s1519_s11 = int_to_ptr.vmem [resolvable:$true] %s1518_s11 }
  0x1e   :  { %v2039_v26 = vld [vmem:[%s2582_s0 + $0x58] sm:$0xff]   ;;  %v2040_v27 = vld [vmem:[%s2582_s0 + $0x60] sm:$0xff]   ;;  %v2053_v28 = vld [vmem:[%s2582_s0 + $0xc8] sm:$0xff]  }
  0x1f   :  { %v2054_v29 = vld [vmem:[%s2582_s0 + $0xd0] sm:$0xff]   ;;  %v2041_v30 = vld [vmem:[%s2582_s0 + $0x68] sm:$0xff]   ;;  %v2055_v32 = vld [vmem:[%s2582_s0 + $0xd8] sm:$0xff]  }
  0x20   :  { %v2042_v31 = vld [vmem:[%s2582_s0 + $0x70] sm:$0xff]   ;;  %v2056_v33 = vld [vmem:[%s2582_s0 + $0xe0] sm:$0xff]   ;;  %v2043_v34 = vld [vmem:[%s2582_s0 + $0x78] sm:$0xff]  }
  0x21   :  { %v2057_v35 = vld [vmem:[%s2582_s0 + $0xe8] sm:$0xff]   ;;  %v2058_v36 = vld [vmem:[%s2582_s0 + $0xf0] sm:$0xff]   ;;  %v2059_v37 = vld [vmem:[%s2582_s0 + $0xf8] sm:$0xff]  }
  0x22   :  { %1968 = vmatmul.mubr.msk.bf16.gmra.mrb[12].mxu0 %vm388_vm2, %v2035_v18 }
  0x23   :  { %1971 = vmatprep.mubr.msk.bf16.mxu0 %vm388_vm2, %v2036_v19 }
  0x24   :  { %2000 = vmatmul.mubr.msk.bf16.gmra.mrb[12].mxu1 %vm388_vm2, %v2051_v24 }
  0x25   :  { %2003 = vmatprep.mubr.msk.bf16.mxu1 %vm388_vm2, %v2052_v25 }
  0x2a   :  { %1972 = vmatmul.mubr.msk.bf16.gmra.mrb[16].mxu0 %vm388_vm2, %v2037_v22 }
  0x2b   :  { %1975 = vmatprep.mubr.msk.bf16.mxu0 %vm388_vm2, %v2038_v23 }
  0x2c   :  { %2004 = vmatmul.mubr.msk.bf16.gmra.mrb[16].mxu1 %vm388_vm2, %v2053_v28 }
  0x2d   :  { %2007 = vmatprep.mubr.msk.bf16.mxu1 %vm388_vm2, %v2054_v29 }
  0x32   :  { %1976 = vmatmul.mubr.msk.bf16.gmra.mrb[20].mxu0 %vm388_vm2, %v2039_v26 }
  0x33   :  { %1979 = vmatprep.mubr.msk.bf16.mxu0 %vm388_vm2, %v2040_v27 }
  0x34   :  { %2008 = vmatmul.mubr.msk.bf16.gmra.mrb[20].mxu1 %vm388_vm2, %v2055_v32 }
  0x35   :  { %2011 = vmatprep.mubr.msk.bf16.mxu1 %vm388_vm2, %v2056_v33 }
  0x3a   :  { %1980 = vmatmul.mubr.msk.bf16.gmra.mrb[24].mxu0 %vm388_vm2, %v2041_v30 }
  0x3b   :  { %1983 = vmatprep.mubr.msk.bf16.mxu0 %vm388_vm2, %v2042_v31 }
  0x3c   :  { %2012 = vmatmul.mubr.msk.bf16.gmra.mrb[24].mxu1 %vm388_vm2, %v2057_v35 }
  0x3d   :  { %2015 = vmatprep.mubr.msk.bf16.mxu1 %vm388_vm2, %v2058_v36 }
  0x42   :  { %1984 = vmatmul.mubr.msk.bf16.gmra.mrb[28].mxu0 %vm388_vm2, %v2043_v34 }
  0x44   :  { %2016 = vmatmul.mubr.msk.bf16.gmra.mrb[28].mxu1 %vm388_vm2, %v2059_v37 }
  0xdd   :  { %v1957_v38 = vpop.f32.mrb[0].mxu0  ;;  %v2276_v61 = vpop.f32.mrb[0].mxu1 }
  0xde   :  { %v526_v39 = vpop.f32.mrb[1].mxu0  ;;  %v1367_v47 = vmul.f32 %v1957_v38, %v1957_v38  ;;  %v2278_v2 = vpop.f32.mrb[1].mxu1 }
  0xdf   :  { %v1958_v40 = vpop.f32.mrb[2].mxu0  ;;  %v1365_v43 = vmul.f32 %v526_v39, %v526_v39  ;;  %v2283_v3 = vpop.f32.mrb[2].mxu1 }
  0xe0   :  { %v1734_v41 = vpack.c.bf16 %v1958_v40, %v1957_v38  ;;  %v529_v42 = vpop.f32.mrb[3].mxu0  ;;  %v1368_v50 = vmul.f32 %v1958_v40, %v1958_v40  ;;  %v1814_v7 = vpack.c.bf16 %v2283_v3, %v2276_v61  ;;  %v2290_v8 = vpop.f32.mrb[3].mxu1 }
  0xe1   :  { %v1729_v44 = vpack.c.bf16 %v529_v42, %v526_v39  ;;  %v1296_v45 = vadd.f32 %v529_v42, %v526_v39  ;;  %v1366_v46 = vmul.f32 %v529_v42, %v529_v42  ;;  %v1809_v9 = vpack.c.bf16 %v2290_v8, %v2278_v2 }
  0xe2   :  { %1886 = vst [vmem:[%s2584_s2 + $0x8] sm:$0xff] %v1734_v41   ;;  %1902 = vst [vmem:[%s2584_s2 + $0x88] sm:$0xff] %v1814_v7  }
  0xe3   :  { %1730 = vst [vmem:[%s2584_s2] sm:$0xff] %v1729_v44   ;;  %v1297_v48 = vadd.f32 %v1957_v38, %v1296_v45  ;;  %v1429_v49 = vadd.f32 %v1366_v46, %v1365_v43  ;;  %1901 = vst [vmem:[%s2584_s2 + $0x80] sm:$0xff] %v1809_v9  }
  0xe5   :  { %v1430_v51 = vadd.f32 %v1429_v49, %v1367_v47  ;;  %v1961_v52 = vpop.f32.mrb[4].mxu0  ;;  %v1298_v53 = vadd.f32 %v1958_v40, %v1297_v48  ;;  %v2300_v21 = vpop.f32.mrb[4].mxu1 }
  0xe6   :  { %v542_v54 = vpop.f32.mrb[5].mxu0  ;;  %v1371_v4 = vmul.f32 %v1961_v52, %v1961_v52  ;;  %v2302_v26 = vpop.f32.mrb[5].mxu1 }
  0xe7   :  { %v1299_v55 = vadd.f32 %v1298_v53, %v542_v54  ;;  %v1369_v56 = vmul.f32 %v542_v54, %v542_v54  ;;  %v1431_v57 = vadd.f32 %v1430_v51, %v1368_v50  ;;  %v1962_v58 = vpop.f32.mrb[6].mxu0  ;;  %v2307_v27 = vpop.f32.mrb[6].mxu1 }
  0xe8   :  { %v1744_v59 = vpack.c.bf16 %v1962_v58, %v1961_v52  ;;  %v545_v60 = vpop.f32.mrb[7].mxu0  ;;  %v1372_v10 = vmul.f32 %v1962_v58, %v1962_v58  ;;  %v1824_v31 = vpack.c.bf16 %v2307_v27, %v2300_v21  ;;  %v2314_v32 = vpop.f32.mrb[7].mxu1 }
  0xe9   :  { %v1432_v62 = vadd.f32 %v1431_v57, %v1369_v56  ;;  %v1739_v63 = vpack.c.bf16 %v545_v60, %v542_v54  ;;  %v1300_v0 = vadd.f32 %v1299_v55, %v545_v60  ;;  %v1370_v1 = vmul.f32 %v545_v60, %v545_v60 }
  0xea   :  { %1888 = vst [vmem:[%s2584_s2 + $0x18] sm:$0xff] %v1744_v59   ;;  %v1819_v33 = vpack.c.bf16 %v2314_v32, %v2302_v26  ;;  %1904 = vst [vmem:[%s2584_s2 + $0x98] sm:$0xff] %v1824_v31  }
  0xeb   :  { %1887 = vst [vmem:[%s2584_s2 + $0x10] sm:$0xff] %v1739_v63   ;;  %v1301_v5 = vadd.f32 %v1961_v52, %v1300_v0  ;;  %v1433_v6 = vadd.f32 %v1432_v62, %v1370_v1 }
  0xec   :  { %1903 = vst [vmem:[%s2584_s2 + $0x90] sm:$0xff] %v1819_v33  }
  0xed   :  { %v1434_v11 = vadd.f32 %v1433_v6, %v1371_v4  ;;  %v1965_v12 = vpop.f32.mrb[8].mxu0  ;;  %v1302_v13 = vadd.f32 %v1962_v58, %v1301_v5 }
  0xee   :  { %v558_v14 = vpop.f32.mrb[9].mxu0  ;;  %v1375_v28 = vmul.f32 %v1965_v12, %v1965_v12 }
  0xef   :  { %v1303_v15 = vadd.f32 %v1302_v13, %v558_v14  ;;  %v1373_v16 = vmul.f32 %v558_v14, %v558_v14  ;;  %v1435_v17 = vadd.f32 %v1434_v11, %v1372_v10  ;;  %v1966_v18 = vpop.f32.mrb[10].mxu0  ;;  %v2324_v45 = vpop.f32.mrb[8].mxu1 }
  0xf0   :  { %v1754_v19 = vpack.c.bf16 %v1966_v18, %v1965_v12  ;;  %v561_v20 = vpop.f32.mrb[11].mxu0  ;;  %v1376_v34 = vmul.f32 %v1966_v18, %v1966_v18  ;;  %v2326_v50 = vpop.f32.mrb[9].mxu1 }
  0xf1   :  { %v1436_v22 = vadd.f32 %v1435_v17, %v1373_v16  ;;  %v1749_v23 = vpack.c.bf16 %v561_v20, %v558_v14  ;;  %v1304_v24 = vadd.f32 %v1303_v15, %v561_v20  ;;  %v1374_v25 = vmul.f32 %v561_v20, %v561_v20  ;;  %v2331_v51 = vpop.f32.mrb[10].mxu1 }
  0xf2   :  { %1890 = vst [vmem:[%s2584_s2 + $0x28] sm:$0xff] %v1754_v19   ;;  %v1834_v55 = vpack.c.bf16 %v2331_v51, %v2324_v45  ;;  %v2338_v56 = vpop.f32.mrb[11].mxu1 }
  0xf3   :  { %1889 = vst [vmem:[%s2584_s2 + $0x20] sm:$0xff] %v1749_v23   ;;  %v1305_v29 = vadd.f32 %v1965_v12, %v1304_v24  ;;  %v1437_v30 = vadd.f32 %v1436_v22, %v1374_v25  ;;  %v1829_v57 = vpack.c.bf16 %v2338_v56, %v2326_v50 }
  0xf4   :  { %1906 = vst [vmem:[%s2584_s2 + $0xa8] sm:$0xff] %v1834_v55  }
  0xf5   :  { %v1438_v35 = vadd.f32 %v1437_v30, %v1375_v28  ;;  %v1969_v36 = vpop.f32.mrb[12].mxu0  ;;  %v1306_v37 = vadd.f32 %v1966_v18, %v1305_v29  ;;  %1905 = vst [vmem:[%s2584_s2 + $0xa0] sm:$0xff] %v1829_v57  }
  0xf6   :  { %v574_v38 = vpop.f32.mrb[13].mxu0  ;;  %v1379_v52 = vmul.f32 %v1969_v36, %v1969_v36 }
  0xf7   :  { %v1307_v39 = vadd.f32 %v1306_v37, %v574_v38  ;;  %v1377_v40 = vmul.f32 %v574_v38, %v574_v38  ;;  %v1439_v41 = vadd.f32 %v1438_v35, %v1376_v34  ;;  %v1970_v42 = vpop.f32.mrb[14].mxu0  ;;  %v2348_v9 = vpop.f32.mrb[12].mxu1 }
  0xf8   :  { %v1764_v43 = vpack.c.bf16 %v1970_v42, %v1969_v36  ;;  %v577_v44 = vpop.f32.mrb[15].mxu0  ;;  %v1380_v58 = vmul.f32 %v1970_v42, %v1970_v42  ;;  %v2350_v14 = vpop.f32.mrb[13].mxu1 }
  0xf9   :  { %v1440_v46 = vadd.f32 %v1439_v41, %v1377_v40  ;;  %v1759_v47 = vpack.c.bf16 %v577_v44, %v574_v38  ;;  %v1308_v48 = vadd.f32 %v1307_v39, %v577_v44  ;;  %v1378_v49 = vmul.f32 %v577_v44, %v577_v44  ;;  %v2355_v15 = vpop.f32.mrb[14].mxu1 }
  0xfa   :  { %1892 = vst [vmem:[%s2584_s2 + $0x38] sm:$0xff] %v1764_v43   ;;  %v1844_v19 = vpack.c.bf16 %v2355_v15, %v2348_v9  ;;  %v2362_v20 = vpop.f32.mrb[15].mxu1 }
  0xfb   :  { %1891 = vst [vmem:[%s2584_s2 + $0x30] sm:$0xff] %v1759_v47   ;;  %v1309_v53 = vadd.f32 %v1969_v36, %v1308_v48  ;;  %v1441_v54 = vadd.f32 %v1440_v46, %v1378_v49  ;;  %v1839_v22 = vpack.c.bf16 %v2362_v20, %v2350_v14 }
  0xfc   :  { %1908 = vst [vmem:[%s2584_s2 + $0xb8] sm:$0xff] %v1844_v19  }
  0xfd   :  { %v1442_v59 = vadd.f32 %v1441_v54, %v1379_v52  ;;  %v1973_v60 = vpop.f32.mrb[16].mxu0  ;;  %v1310_v62 = vadd.f32 %v1970_v42, %v1309_v53  ;;  %1907 = vst [vmem:[%s2584_s2 + $0xb0] sm:$0xff] %v1839_v22  }
  0xfe   :  { %v590_v63 = vpop.f32.mrb[17].mxu0  ;;  %v1383_v16 = vmul.f32 %v1973_v60, %v1973_v60 }
  0xff   :  { %v1311_v0 = vadd.f32 %v1310_v62, %v590_v63  ;;  %v1381_v1 = vmul.f32 %v590_v63, %v590_v63  ;;  %v1443_v4 = vadd.f32 %v1442_v59, %v1380_v58  ;;  %v1974_v5 = vpop.f32.mrb[18].mxu0  ;;  %v2372_v37 = vpop.f32.mrb[16].mxu1 }
 0x100   :  { %v1774_v6 = vpack.c.bf16 %v1974_v5, %v1973_v60  ;;  %v593_v7 = vpop.f32.mrb[19].mxu0  ;;  %v1384_v23 = vmul.f32 %v1974_v5, %v1974_v5  ;;  %v2374_v42 = vpop.f32.mrb[17].mxu1 }
 0x101   :  { %v1444_v10 = vadd.f32 %v1443_v4, %v1381_v1  ;;  %v1769_v11 = vpack.c.bf16 %v593_v7, %v590_v63  ;;  %v1312_v12 = vadd.f32 %v1311_v0, %v593_v7  ;;  %v1382_v13 = vmul.f32 %v593_v7, %v593_v7  ;;  %v2379_v43 = vpop.f32.mrb[18].mxu1 }
 0x102   :  { %1894 = vst [vmem:[%s2584_s2 + $0x48] sm:$0xff] %v1774_v6   ;;  %v1854_v48 = vpack.c.bf16 %v2379_v43, %v2372_v37  ;;  %v2386_v49 = vpop.f32.mrb[19].mxu1 }
 0x103   :  { %1893 = vst [vmem:[%s2584_s2 + $0x40] sm:$0xff] %v1769_v11   ;;  %v1313_v17 = vadd.f32 %v1973_v60, %v1312_v12  ;;  %v1445_v18 = vadd.f32 %v1444_v10, %v1382_v13  ;;  %v1849_v52 = vpack.c.bf16 %v2386_v49, %v2374_v42 }
 0x104   :  { %1910 = vst [vmem:[%s2584_s2 + $0xc8] sm:$0xff] %v1854_v48  }
 0x105   :  { %v1446_v24 = vadd.f32 %v1445_v18, %v1383_v16  ;;  %v1977_v25 = vpop.f32.mrb[20].mxu0  ;;  %v1314_v28 = vadd.f32 %v1974_v5, %v1313_v17  ;;  %1909 = vst [vmem:[%s2584_s2 + $0xc0] sm:$0xff] %v1849_v52  }
 0x106   :  { %v606_v29 = vpop.f32.mrb[21].mxu0  ;;  %v1387_v44 = vmul.f32 %v1977_v25, %v1977_v25 }
 0x107   :  { %v1315_v30 = vadd.f32 %v1314_v28, %v606_v29  ;;  %v1385_v31 = vmul.f32 %v606_v29, %v606_v29  ;;  %v1447_v33 = vadd.f32 %v1446_v24, %v1384_v23  ;;  %v1978_v34 = vpop.f32.mrb[22].mxu0  ;;  %v2396_v4 = vpop.f32.mrb[20].mxu1 }
 0x108   :  { %v1784_v35 = vpack.c.bf16 %v1978_v34, %v1977_v25  ;;  %v609_v36 = vpop.f32.mrb[23].mxu0  ;;  %v1388_v53 = vmul.f32 %v1978_v34, %v1978_v34  ;;  %v2398_v11 = vpop.f32.mrb[21].mxu1 }
 0x109   :  { %v1448_v38 = vadd.f32 %v1447_v33, %v1385_v31  ;;  %v1779_v39 = vpack.c.bf16 %v609_v36, %v606_v29  ;;  %v1316_v40 = vadd.f32 %v1315_v30, %v609_v36  ;;  %v1386_v41 = vmul.f32 %v609_v36, %v609_v36  ;;  %v2403_v12 = vpop.f32.mrb[22].mxu1 }
 0x10a   :  { %1896 = vst [vmem:[%s2584_s2 + $0x58] sm:$0xff] %v1784_v35   ;;  %v1864_v18 = vpack.c.bf16 %v2403_v12, %v2396_v4  ;;  %v2410_v19 = vpop.f32.mrb[23].mxu1 }
 0x10b   :  { %1895 = vst [vmem:[%s2584_s2 + $0x50] sm:$0xff] %v1779_v39   ;;  %v1317_v46 = vadd.f32 %v1977_v25, %v1316_v40  ;;  %v1449_v47 = vadd.f32 %v1448_v38, %v1386_v41  ;;  %v1859_v22 = vpack.c.bf16 %v2410_v19, %v2398_v11 }
 0x10c   :  { %1912 = vst [vmem:[%s2584_s2 + $0xd8] sm:$0xff] %v1864_v18  }
 0x10d   :  { %v1450_v54 = vadd.f32 %v1449_v47, %v1387_v44  ;;  %v1981_v55 = vpop.f32.mrb[24].mxu0  ;;  %v1318_v57 = vadd.f32 %v1978_v34, %v1317_v46  ;;  %1911 = vst [vmem:[%s2584_s2 + $0xd0] sm:$0xff] %v1859_v22  }
 0x10e   :  { %v622_v58 = vpop.f32.mrb[25].mxu0  ;;  %v1391_v13 = vmul.f32 %v1981_v55, %v1981_v55 }
 0x10f   :  { %v1319_v59 = vadd.f32 %v1318_v57, %v622_v58  ;;  %v1389_v60 = vmul.f32 %v622_v58, %v622_v58  ;;  %v1451_v62 = vadd.f32 %v1450_v54, %v1388_v53  ;;  %v1982_v63 = vpop.f32.mrb[26].mxu0  ;;  %v2420_v38 = vpop.f32.mrb[24].mxu1 }
 0x110   :  { %v1794_v0 = vpack.c.bf16 %v1982_v63, %v1981_v55  ;;  %v625_v1 = vpop.f32.mrb[27].mxu0  ;;  %v1392_v23 = vmul.f32 %v1982_v63, %v1982_v63  ;;  %v2422_v46 = vpop.f32.mrb[25].mxu1 }
 0x111   :  { %v1452_v5 = vadd.f32 %v1451_v62, %v1389_v60  ;;  %v1789_v6 = vpack.c.bf16 %v625_v1, %v622_v58  ;;  %v1320_v7 = vadd.f32 %v1319_v59, %v625_v1  ;;  %v1390_v10 = vmul.f32 %v625_v1, %v625_v1  ;;  %v2427_v47 = vpop.f32.mrb[26].mxu1 }
 0x112   :  { %1898 = vst [vmem:[%s2584_s2 + $0x68] sm:$0xff] %v1794_v0   ;;  %v1874_v54 = vpack.c.bf16 %v2427_v47, %v2420_v38  ;;  %v1397_v62 = vmul.f32 %v2278_v2, %v2278_v2 }
 0x113   :  { %1897 = vst [vmem:[%s2584_s2 + $0x60] sm:$0xff] %v1789_v6   ;;  %v1321_v16 = vadd.f32 %v1981_v55, %v1320_v7  ;;  %v1453_v17 = vadd.f32 %v1452_v5, %v1390_v10  ;;  %v2434_v55 = vpop.f32.mrb[27].mxu1  ;;  %v1398_v7 = vmul.f32 %v2290_v8, %v2290_v8 }
 0x114   :  { %v1869_v57 = vpack.c.bf16 %v2434_v55, %v2422_v46  ;;  %1914 = vst [vmem:[%s2584_s2 + $0xe8] sm:$0xff] %v1874_v54  }
 0x115   :  { %v1454_v24 = vadd.f32 %v1453_v17, %v1391_v13  ;;  %v1985_v25 = vpop.f32.mrb[28].mxu0  ;;  %v1322_v28 = vadd.f32 %v1982_v63, %v1321_v16  ;;  %v1399_v16 = vmul.f32 %v2276_v61, %v2276_v61 }
 0x116   :  { %v638_v29 = vpop.f32.mrb[29].mxu0  ;;  %v1395_v48 = vmul.f32 %v1985_v25, %v1985_v25  ;;  %1913 = vst [vmem:[%s2584_s2 + $0xe0] sm:$0xff] %v1869_v57  }
 0x117   :  { %v1323_v30 = vadd.f32 %v1322_v28, %v638_v29  ;;  %v1393_v31 = vmul.f32 %v638_v29, %v638_v29  ;;  %v1455_v33 = vadd.f32 %v1454_v24, %v1392_v23  ;;  %v1986_v34 = vpop.f32.mrb[30].mxu0  ;;  %v2447_v1 = vpop.f32.mrb[28].mxu1  ;;  %v1401_v28 = vmul.f32 %v2302_v26, %v2302_v26 }
 0x118   :  { %v1804_v35 = vpack.c.bf16 %v1986_v34, %v1985_v25  ;;  %v641_v36 = vpop.f32.mrb[31].mxu0  ;;  %v1396_v58 = vmul.f32 %v1986_v34, %v1986_v34  ;;  %v2452_v10 = vpop.f32.mrb[29].mxu1 }
 0x119   :  { %v1456_v39 = vadd.f32 %v1455_v33, %v1393_v31  ;;  %v1799_v40 = vpack.c.bf16 %v641_v36, %v638_v29  ;;  %v1324_v41 = vadd.f32 %v1323_v30, %v641_v36  ;;  %v1394_v44 = vmul.f32 %v641_v36, %v641_v36  ;;  %v2454_v13 = vpop.f32.mrb[30].mxu1 }
 0x11a   :  { %1900 = vst [vmem:[%s2584_s2 + $0x78] sm:$0xff] %v1804_v35   ;;  %v2461_v22 = vpop.f32.mrb[31].mxu1  ;;  %v1403_v33 = vmul.f32 %v2300_v21, %v2300_v21  ;;  %v1404_v36 = vmul.f32 %v2307_v27, %v2307_v27 }
 0x11b   :  { %1899 = vst [vmem:[%s2584_s2 + $0x70] sm:$0xff] %v1799_v40   ;;  %v1325_v52 = vadd.f32 %v1985_v25, %v1324_v41  ;;  %v1457_v53 = vadd.f32 %v1456_v39, %v1394_v44  ;;  %v1879_v23 = vpack.c.bf16 %v2461_v22, %v2452_v10 }
 0x11d   :  { %v1458_v59 = vadd.f32 %v1457_v53, %v1395_v48  ;;  %v1326_v60 = vadd.f32 %v1986_v34, %v1325_v52  ;;  %1915 = vst [vmem:[%s2584_s2 + $0xf0] sm:$0xff] %v1879_v23   ;;  %v1406_v52 = vmul.f32 %v2338_v56, %v2338_v56 }
 0x11f   :  { %v1327_v63 = vadd.f32 %v1326_v60, %v2278_v2  ;;  %v1459_v0 = vadd.f32 %v1458_v59, %v1396_v58  ;;  %v1884_v2 = vpack.c.bf16 %v2454_v13, %v2447_v1 }
 0x121   :  { %v1460_v5 = vadd.f32 %v1459_v0, %v1397_v62  ;;  %v1328_v6 = vadd.f32 %v1327_v63, %v2290_v8  ;;  %v1400_v8 = vmul.f32 %v2283_v3, %v2283_v3  ;;  %1916 = vst [vmem:[%s2584_s2 + $0xf8] sm:$0xff] %v1884_v2   ;;  %v1410_v63 = vmul.f32 %v2362_v20, %v2362_v20  ;;  %s2109_s2 = smov [#allocation3]  }
 0x122   :  { %v1414_v2 = vmul.f32 %v2386_v49, %v2386_v49  ;;  %s1508_s9 = sshll.u32 %s2109_s2, 4  ;;  %s1509_s9 = int_to_ptr.vmem [resolvable:$true] %s1508_s9 }
 0x123   :  { %v1329_v17 = vadd.f32 %v2276_v61, %v1328_v6  ;;  %v1461_v18 = vadd.f32 %v1460_v5, %v1398_v7  ;;  %s2060_s12 = scalar_lea.vmem %s1509_s9, 128  ;;  %p2065_p1 = scmp.lt.s32.totalorder %s1509_s9, %s1509_s9 }
 0x124   :  { %p2061_p0 = scmp.ne.s32.totalorder %s1509_s9, %s2060_s12  ;;  %p2066_p2 = scmp.lt.s32.totalorder %s2060_s12, %s2060_s12 }
 0x125   :  { %v1462_v24 = vadd.f32 %v1461_v18, %v1399_v16  ;;  %v1330_v25 = vadd.f32 %v2283_v3, %v1329_v17  ;;  %v1402_v3 = vmul.f32 %v2314_v32, %v2314_v32 }
 0x126   :  { %p2067_p3 = por %p2066_p2, %p2065_p1 }
 0x127   :  { %v1331_v61 = vadd.f32 %v1330_v25, %v2302_v26  ;;  %v1463_v29 = vadd.f32 %v1462_v24, %v1400_v8  ;;  %v1405_v26 = vmul.f32 %v2326_v50, %v2326_v50 }
 0x128   :  { %p2068_p4 = pnand %p2067_p3, %p2061_p0 }
 0x129   :  { %v1464_v30 = vadd.f32 %v1463_v29, %v1401_v28  ;;  %v1332_v31 = vadd.f32 %v1331_v61, %v2314_v32 }
 0x12b   :  { %v1333_v34 = vadd.f32 %v2300_v21, %v1332_v31  ;;  %v1465_v35 = vadd.f32 %v1464_v30, %v1402_v3  ;;  %v1407_v21 = vmul.f32 %v2324_v45, %v2324_v45  ;;  %v1418_v30 = vmul.f32 %v2410_v19, %v2410_v19 }
 0x12d   :  { %v1466_v39 = vadd.f32 %v1465_v35, %v1403_v33  ;;  %v1334_v40 = vadd.f32 %v2307_v27, %v1333_v34  ;;  %v1408_v27 = vmul.f32 %v2331_v51, %v2331_v51 }
 0x12f   :  { %v1335_v41 = vadd.f32 %v1334_v40, %v2326_v50  ;;  %v1467_v44 = vadd.f32 %v1466_v39, %v1404_v36  ;;  %v1409_v50 = vmul.f32 %v2350_v14, %v2350_v14  ;;  %v1422_v40 = vmul.f32 %v2434_v55, %v2434_v55 }
 0x131   :  { %v1468_v48 = vadd.f32 %v1467_v44, %v1405_v26  ;;  %v1336_v32 = vadd.f32 %v1335_v41, %v2338_v56 }
 0x133   :  { %v1337_v53 = vadd.f32 %v2324_v45, %v1336_v32  ;;  %v1469_v54 = vadd.f32 %v1468_v48, %v1406_v52  ;;  %v1411_v45 = vmul.f32 %v2348_v9, %v2348_v9 }
 0x135   :  { %v1470_v57 = vadd.f32 %v1469_v54, %v1407_v21  ;;  %v1338_v58 = vadd.f32 %v2331_v51, %v1337_v53  ;;  %v1412_v51 = vmul.f32 %v2355_v15, %v2355_v15  ;;  %v1426_v53 = vmul.f32 %v2461_v22, %v2461_v22 }
 0x137   :  { %v1339_v59 = vadd.f32 %v1338_v58, %v2350_v14  ;;  %v1471_v60 = vadd.f32 %v1470_v57, %v1408_v27  ;;  %v1413_v14 = vmul.f32 %v2374_v42, %v2374_v42 }
 0x139   :  { %v1472_v62 = vadd.f32 %v1471_v60, %v1409_v50  ;;  %v1340_v56 = vadd.f32 %v1339_v59, %v2362_v20 }
 0x13b   :  { %v1341_v0 = vadd.f32 %v2348_v9, %v1340_v56  ;;  %v1473_v5 = vadd.f32 %v1472_v62, %v1410_v63  ;;  %v1415_v9 = vmul.f32 %v2372_v37, %v2372_v37 }
 0x13d   :  { %v1474_v6 = vadd.f32 %v1473_v5, %v1411_v45  ;;  %v1342_v7 = vadd.f32 %v2355_v15, %v1341_v0  ;;  %v1416_v15 = vmul.f32 %v2379_v43, %v2379_v43 }
 0x13f   :  { %v1343_v16 = vadd.f32 %v1342_v7, %v2374_v42  ;;  %v1475_v17 = vadd.f32 %v1474_v6, %v1412_v51  ;;  %v1417_v42 = vmul.f32 %v2398_v11, %v2398_v11 }
 0x141   :  { %v1476_v18 = vadd.f32 %v1475_v17, %v1413_v14  ;;  %v1344_v20 = vadd.f32 %v1343_v16, %v2386_v49 }
 0x143   :  { %v1345_v23 = vadd.f32 %v2372_v37, %v1344_v20  ;;  %v1477_v8 = vadd.f32 %v1476_v18, %v1414_v2  ;;  %v1419_v37 = vmul.f32 %v2396_v4, %v2396_v4 }
 0x145   :  { %v1478_v24 = vadd.f32 %v1477_v8, %v1415_v9  ;;  %v1346_v25 = vadd.f32 %v2379_v43, %v1345_v23  ;;  %v1420_v43 = vmul.f32 %v2403_v12, %v2403_v12 }
 0x147   :  { %v1347_v28 = vadd.f32 %v1346_v25, %v2398_v11  ;;  %v1479_v61 = vadd.f32 %v1478_v24, %v1416_v15  ;;  %v1421_v11 = vmul.f32 %v2422_v46, %v2422_v46 }
 0x149   :  { %v1480_v29 = vadd.f32 %v1479_v61, %v1417_v42  ;;  %v1348_v49 = vadd.f32 %v1347_v28, %v2410_v19 }
 0x14b   :  { %v1349_v31 = vadd.f32 %v2396_v4, %v1348_v49  ;;  %v1481_v3 = vadd.f32 %v1480_v29, %v1418_v30  ;;  %v1423_v4 = vmul.f32 %v2420_v38, %v2420_v38 }
 0x14d   :  { %v1482_v33 = vadd.f32 %v1481_v3, %v1419_v37  ;;  %v1350_v34 = vadd.f32 %v2403_v12, %v1349_v31  ;;  %v1424_v12 = vmul.f32 %v2427_v47, %v2427_v47 }
 0x14f   :  { %v1351_v35 = vadd.f32 %v1350_v34, %v2422_v46  ;;  %v1483_v36 = vadd.f32 %v1482_v33, %v1420_v43  ;;  %v1425_v46 = vmul.f32 %v2452_v10, %v2452_v10 }
 0x151   :  { %v1484_v39 = vadd.f32 %v1483_v36, %v1421_v11  ;;  %v1352_v19 = vadd.f32 %v1351_v35, %v2434_v55 }
 0x153   :  { %v1353_v26 = vadd.f32 %v2420_v38, %v1352_v19  ;;  %v1485_v41 = vadd.f32 %v1484_v39, %v1422_v40  ;;  %v1427_v38 = vmul.f32 %v2447_v1, %v2447_v1 }
 0x155   :  { %v1486_v44 = vadd.f32 %v1485_v41, %v1423_v4  ;;  %v1354_v48 = vadd.f32 %v2427_v47, %v1353_v26  ;;  %v1428_v47 = vmul.f32 %v2454_v13, %v2454_v13 }
 0x157   :  { %v1355_v32 = vadd.f32 %v1354_v48, %v2452_v10  ;;  %v1487_v52 = vadd.f32 %v1486_v44, %v1424_v12 }
 0x159   :  { %v1488_v21 = vadd.f32 %v1487_v52, %v1425_v46  ;;  %v1356_v55 = vadd.f32 %v1355_v32, %v2461_v22 }
 0x15b   :  { %v1357_v54 = vadd.f32 %v2447_v1, %v1356_v55  ;;  %v1489_v27 = vadd.f32 %v1488_v21, %v1426_v53 }
 0x15d   :  { %v1358_v57 = vadd.f32 %v2454_v13, %v1357_v54  ;;  %v1490_v58 = vadd.f32 %v1489_v27, %v1427_v38 }
 0x15f   :  { %v1491_v10 = vadd.f32 %v1490_v58, %v1428_v47  ;;  %v1359_v50 = vrot.slane %v1358_v57, 4 }
 0x161   :  { %v1360_v59 = vadd.f32 %v1359_v50, %v1358_v57  ;;  %v1492_v60 = vrot.slane %v1491_v10, 4 }
 0x163   :  { %v1361_v62 = vrot.slane %v1360_v59, 2  ;;  %v1493_v56 = vadd.f32 %v1492_v60, %v1491_v10 }
 0x165   :  { %v1362_v63 = vadd.f32 %v1361_v62, %v1360_v59  ;;  %v1494_v22 = vrot.slane %v1493_v56, 2 }
 0x167   :  { %v1363_v45 = vrot.slane %v1362_v63, 1  ;;  %v1495_v0 = vadd.f32 %v1494_v22, %v1493_v56 }
 0x169   :  { %v1364_v1 = vadd.f32 %v1363_v45, %v1362_v63  ;;  %v1496_v5 = vrot.slane %v1495_v0, 1 }
 0x16b   :  { %1498 = vst [vmem:[#allocation3] sm:$0xff] %v1364_v1  ;;  %v1497_v13 = vadd.f32 %v1496_v5, %v1495_v0 }
 0x16c   :  { %2071 = shalt.err (!%p2068_p4)
}
 0x16d   :  { %s2072_s15 = scalar_lea.hbm %s2585_s3, 128 }
 0x16e   :  { %p2073_p5 = scmp.ne.s32.totalorder %s2585_s3, %s2072_s15  ;;  %p2076_p6 = scmp.lt.u32.totalorder %s2072_s15, %s2585_s3 }
 0x170   :  { %p2078_p7 = pnand %p2076_p6, %p2073_p5 }
 0x172   :  { %2081 = shalt.err (!%p2078_p7)
}
 0x173   :  { %1511 = dma.vmem_to_hbm [thread:$0]  %s1509_s9, 128, %s2585_s3, [#allocation4]   ;;  %1499 = vst [vmem:[#allocation5] sm:$0xff] %v1497_v13 }
 0x174   :  { %s2082_s22 = scalar_lea.vmem %s1519_s11, 128  ;;  %p2087_p9 = scmp.lt.s32.totalorder %s1519_s11, %s1519_s11 }
 0x175   :  { %p2083_p8 = scmp.ne.s32.totalorder %s1519_s11, %s2082_s22  ;;  %p2088_p10 = scmp.lt.s32.totalorder %s2082_s22, %s2082_s22 }
 0x177   :  { %p2089_p11 = por %p2088_p10, %p2087_p9 }
 0x179   :  { %p2090_p12 = pnand %p2089_p11, %p2083_p8 }
 0x17b   :  { %2093 = shalt.err (!%p2090_p12)
}
 0x17c   :  { %s2094_s24 = scalar_lea.hbm %s2586_s4, 128 }
 0x17d   :  { %p2095_p13 = scmp.ne.s32.totalorder %s2586_s4, %s2094_s24  ;;  %p2098_p0 = scmp.lt.u32.totalorder %s2094_s24, %s2586_s4 }
 0x17f   :  { %p2100_p1 = pnand %p2098_p0, %p2095_p13 }
 0x181   :  { %2103 = shalt.err (!%p2100_p1)
}
 0x182   :  { %1521 = dma.vmem_to_hbm [thread:$0]  %s1519_s11, 128, %s2586_s4, [#allocation6]  }
 0x183   :  { %2104 = dma.done.wait [#allocation4], 128  }
 0x184   :  { %2105 = vsyncadd [#allocation4], 4294967168 }
 0x185   :  { %2106 = dma.done.wait [#allocation6], 128  }
 0x186   :  { %2107 = vsyncadd [#allocation6], 4294967168 }
 0x187   :  { %1530 = vsyncpa [#allocation4], 1 }
 0x188   :  { %1531 = vsyncpa [#allocation6], 1 }

// kernel: _lambda_.12
= control target key start
LH: loop header
LB: loop body
LE: loop exit
PB: predicated region body
PF: predicated region fallthrough
CT: control target
= control target key end

     0   :  { %s1502_s0 = inlined_call_operand.vmem [shape: bf16[512,128], index: 0, kind: input, shape index: {}]   ;;  %s1503_s1 = inlined_call_operand.vmem [shape: f32[1,128], index: 1, kind: input, shape index: {}]   ;;  %s1504_s2 = inlined_call_operand.vmem [shape: f32[1,128], index: 2, kind: input, shape index: {}]   ;;  %s1505_s3 = inlined_call_operand.vmem [shape: bf16[512,128], index: 3, kind: output, shape index: {}]  }
   0x1   :  { %v803_v0 = vld [vmem:[%s1502_s0] sm:$0xff]   ;;  %v1090_v4 = vld [vmem:[%s1502_s0 + $0x8] sm:$0xff]   ;;  %v1091_v5 = vld [vmem:[%s1502_s0 + $0x10] sm:$0xff]  }
   0x2   :  { %v1178_v1 = vld [vmem:[%s1503_s1] ss:$0 sm:$0xff]  ;;  %v804_v2 = vunpack.c.l.bf16 %v803_v0  ;;  %v805_v3 = vunpack.c.h.bf16 %v803_v0  ;;  %v1092_v6 = vld [vmem:[%s1502_s0 + $0x18] sm:$0xff]   ;;  %v808_v8 = vunpack.c.l.bf16 %v1090_v4  ;;  %v809_v9 = vunpack.c.h.bf16 %v1090_v4  ;;  %v1094_v33 = vld [vmem:[%s1502_s0 + $0x28] sm:$0xff]  }
   0x3   :  { %v1192_v7 = vld [vmem:[%s1504_s2] ss:$0 sm:$0xff]  ;;  %v812_v10 = vunpack.c.l.bf16 %v1091_v5  ;;  %v813_v11 = vunpack.c.h.bf16 %v1091_v5  ;;  %v816_v14 = vunpack.c.l.bf16 %v1092_v6  ;;  %v817_v15 = vunpack.c.h.bf16 %v1092_v6  ;;  %v1095_v38 = vld [vmem:[%s1502_s0 + $0x30] sm:$0xff]   ;;  %v1096_v43 = vld [vmem:[%s1502_s0 + $0x38] sm:$0xff]  }
   0x4   :  { %v149_v12 = vmul.f32 %v804_v2, %v1178_v1  ;;  %v150_v13 = vmul.f32 %v805_v3, %v1178_v1  ;;  %v151_v16 = vmul.f32 %v808_v8, %v1178_v1  ;;  %v152_v17 = vmul.f32 %v809_v9, %v1178_v1  ;;  %v1093_v28 = vld [vmem:[%s1502_s0 + $0x20] sm:$0xff]  }
   0x5   :  { %v153_v18 = vmul.f32 %v812_v10, %v1178_v1  ;;  %v154_v19 = vmul.f32 %v813_v11, %v1178_v1  ;;  %v155_v22 = vmul.f32 %v816_v14, %v1178_v1  ;;  %v156_v23 = vmul.f32 %v817_v15, %v1178_v1  ;;  %v1097_v0 = vld [vmem:[%s1502_s0 + $0x40] sm:$0xff]   ;;  %v1098_v11 = vld [vmem:[%s1502_s0 + $0x48] sm:$0xff]  }
   0x6   :  { %v220_v20 = vadd.f32 %v1192_v7, %v149_v12  ;;  %v221_v21 = vadd.f32 %v1192_v7, %v150_v13  ;;  %v222_v24 = vadd.f32 %v1192_v7, %v151_v16  ;;  %v223_v25 = vadd.f32 %v1192_v7, %v152_v17  ;;  %v1099_v16 = vld [vmem:[%s1502_s0 + $0x50] sm:$0xff]  }
   0x7   :  { %v224_v26 = vadd.f32 %v1192_v7, %v153_v18  ;;  %v225_v27 = vadd.f32 %v1192_v7, %v154_v19  ;;  %v226_v31 = vadd.f32 %v1192_v7, %v155_v22  ;;  %v227_v32 = vadd.f32 %v1192_v7, %v156_v23 }
   0x8   :  { %v284_v29 = vmax.f32 %v220_v20, 0.0  ;;  %v285_v30 = vmax.f32 %v221_v21, 0.0  ;;  %v286_v34 = vmax.f32 %v222_v24, 0.0  ;;  %v287_v35 = vmax.f32 %v223_v25, 0.0  ;;  %v1100_v25 = vld [vmem:[%s1502_s0 + $0x58] sm:$0xff]  }
   0x9   :  { %v288_v36 = vmax.f32 %v224_v26, 0.0  ;;  %v289_v37 = vmax.f32 %v225_v27, 0.0  ;;  %v290_v40 = vmax.f32 %v226_v31, 0.0  ;;  %v291_v41 = vmax.f32 %v227_v32, 0.0 }
   0xa   :  { %v933_v39 = vpack.c.bf16 %v285_v30, %v284_v29  ;;  %v820_v42 = vunpack.c.l.bf16 %v1093_v28  ;;  %v938_v44 = vpack.c.bf16 %v287_v35, %v286_v34  ;;  %v821_v46 = vunpack.c.h.bf16 %v1093_v28 }
   0xb   :  { %v943_v45 = vpack.c.bf16 %v289_v37, %v288_v36  ;;  %v824_v47 = vunpack.c.l.bf16 %v1094_v33  ;;  %v948_v48 = vpack.c.bf16 %v291_v41, %v290_v40  ;;  %v825_v50 = vunpack.c.h.bf16 %v1094_v33 }
   0xc   :  { %934 = vst [vmem:[%s1505_s3] sm:$0xff] %v933_v39   ;;  %v157_v49 = vmul.f32 %v820_v42, %v1178_v1  ;;  %v828_v51 = vunpack.c.l.bf16 %v1095_v38  ;;  %1121 = vst [vmem:[%s1505_s3 + $0x8] sm:$0xff] %v938_v44   ;;  %v158_v52 = vmul.f32 %v821_v46, %v1178_v1  ;;  %v829_v54 = vunpack.c.h.bf16 %v1095_v38  ;;  %v1101_v38 = vld [vmem:[%s1502_s0 + $0x60] sm:$0xff]  }
   0xd   :  { %1122 = vst [vmem:[%s1505_s3 + $0x10] sm:$0xff] %v943_v45   ;;  %v159_v53 = vmul.f32 %v824_v47, %v1178_v1  ;;  %v832_v55 = vunpack.c.l.bf16 %v1096_v43  ;;  %1123 = vst [vmem:[%s1505_s3 + $0x18] sm:$0xff] %v948_v48   ;;  %v160_v57 = vmul.f32 %v825_v50, %v1178_v1  ;;  %v833_v59 = vunpack.c.h.bf16 %v1096_v43 }
   0xe   :  { %v228_v56 = vadd.f32 %v1192_v7, %v157_v49  ;;  %v161_v58 = vmul.f32 %v828_v51, %v1178_v1  ;;  %v229_v60 = vadd.f32 %v1192_v7, %v158_v52  ;;  %v162_v62 = vmul.f32 %v829_v54, %v1178_v1  ;;  %v1102_v51 = vld [vmem:[%s1502_s0 + $0x68] sm:$0xff]  }
   0xf   :  { %v230_v61 = vadd.f32 %v1192_v7, %v159_v53  ;;  %v163_v63 = vmul.f32 %v832_v55, %v1178_v1  ;;  %v231_v3 = vadd.f32 %v1192_v7, %v160_v57  ;;  %v164_v5 = vmul.f32 %v833_v59, %v1178_v1 }
  0x10   :  { %v292_v2 = vmax.f32 %v228_v56, 0.0  ;;  %v232_v4 = vadd.f32 %v1192_v7, %v161_v58  ;;  %v293_v6 = vmax.f32 %v229_v60, 0.0  ;;  %v233_v9 = vadd.f32 %v1192_v7, %v162_v62  ;;  %v1103_v60 = vld [vmem:[%s1502_s0 + $0x70] sm:$0xff]  }
  0x11   :  { %v294_v8 = vmax.f32 %v230_v61, 0.0  ;;  %v234_v10 = vadd.f32 %v1192_v7, %v163_v63  ;;  %v295_v12 = vmax.f32 %v231_v3, 0.0  ;;  %v235_v14 = vadd.f32 %v1192_v7, %v164_v5 }
  0x12   :  { %v296_v13 = vmax.f32 %v232_v4, 0.0  ;;  %v836_v15 = vunpack.c.l.bf16 %v1097_v0  ;;  %v953_v17 = vpack.c.bf16 %v293_v6, %v292_v2  ;;  %v297_v18 = vmax.f32 %v233_v9, 0.0  ;;  %v1104_v2 = vld [vmem:[%s1502_s0 + $0x78] sm:$0xff]  }
  0x13   :  { %v298_v19 = vmax.f32 %v234_v10, 0.0  ;;  %v837_v20 = vunpack.c.h.bf16 %v1097_v0  ;;  %v958_v21 = vpack.c.bf16 %v295_v12, %v294_v8  ;;  %v299_v22 = vmax.f32 %v235_v14, 0.0  ;;  %v1105_v12 = vld [vmem:[%s1502_s0 + $0x80] sm:$0xff]  }
  0x14   :  { %v165_v23 = vmul.f32 %v836_v15, %v1178_v1  ;;  %v840_v24 = vunpack.c.l.bf16 %v1098_v11  ;;  %1124 = vst [vmem:[%s1505_s3 + $0x20] sm:$0xff] %v953_v17   ;;  %v963_v26 = vpack.c.bf16 %v297_v18, %v296_v13  ;;  %v841_v28 = vunpack.c.h.bf16 %v1098_v11 }
  0x15   :  { %v166_v27 = vmul.f32 %v837_v20, %v1178_v1  ;;  %v844_v29 = vunpack.c.l.bf16 %v1099_v16  ;;  %1125 = vst [vmem:[%s1505_s3 + $0x28] sm:$0xff] %v958_v21   ;;  %v968_v30 = vpack.c.bf16 %v299_v22, %v298_v19  ;;  %v845_v33 = vunpack.c.h.bf16 %v1099_v16 }
  0x16   :  { %v236_v31 = vadd.f32 %v1192_v7, %v165_v23  ;;  %v167_v32 = vmul.f32 %v840_v24, %v1178_v1  ;;  %1126 = vst [vmem:[%s1505_s3 + $0x30] sm:$0xff] %v963_v26   ;;  %v168_v35 = vmul.f32 %v841_v28, %v1178_v1  ;;  %v848_v37 = vunpack.c.l.bf16 %v1100_v25 }
  0x17   :  { %v237_v34 = vadd.f32 %v1192_v7, %v166_v27  ;;  %v169_v36 = vmul.f32 %v844_v29, %v1178_v1  ;;  %1127 = vst [vmem:[%s1505_s3 + $0x38] sm:$0xff] %v968_v30   ;;  %v170_v41 = vmul.f32 %v845_v33, %v1178_v1  ;;  %v849_v42 = vunpack.c.h.bf16 %v1100_v25  ;;  %v1106_v29 = vld [vmem:[%s1502_s0 + $0x88] sm:$0xff]  }
  0x18   :  { %v300_v39 = vmax.f32 %v236_v31, 0.0  ;;  %v238_v40 = vadd.f32 %v1192_v7, %v167_v32  ;;  %v239_v44 = vadd.f32 %v1192_v7, %v168_v35  ;;  %v171_v46 = vmul.f32 %v848_v37, %v1178_v1 }
  0x19   :  { %v301_v43 = vmax.f32 %v237_v34, 0.0  ;;  %v240_v45 = vadd.f32 %v1192_v7, %v169_v36  ;;  %v241_v48 = vadd.f32 %v1192_v7, %v170_v41  ;;  %v172_v49 = vmul.f32 %v849_v42, %v1178_v1  ;;  %v1107_v34 = vld [vmem:[%s1502_s0 + $0x90] sm:$0xff]  }
  0x1a   :  { %v302_v47 = vmax.f32 %v238_v40, 0.0  ;;  %v852_v50 = vunpack.c.l.bf16 %v1101_v38  ;;  %v303_v53 = vmax.f32 %v239_v44, 0.0  ;;  %v242_v55 = vadd.f32 %v1192_v7, %v171_v46 }
  0x1b   :  { %v973_v52 = vpack.c.bf16 %v301_v43, %v300_v39  ;;  %v304_v54 = vmax.f32 %v240_v45, 0.0  ;;  %v305_v56 = vmax.f32 %v241_v48, 0.0  ;;  %v243_v57 = vadd.f32 %v1192_v7, %v172_v49  ;;  %v1108_v43 = vld [vmem:[%s1502_s0 + $0x98] sm:$0xff]  }
  0x1c   :  { %v853_v58 = vunpack.c.h.bf16 %v1101_v38  ;;  %v173_v59 = vmul.f32 %v852_v50, %v1178_v1  ;;  %v978_v61 = vpack.c.bf16 %v303_v53, %v302_v47  ;;  %v306_v62 = vmax.f32 %v242_v55, 0.0 }
  0x1d   :  { %1128 = vst [vmem:[%s1505_s3 + $0x40] sm:$0xff] %v973_v52   ;;  %v856_v63 = vunpack.c.l.bf16 %v1102_v51  ;;  %v857_v0 = vunpack.c.h.bf16 %v1102_v51  ;;  %v983_v3 = vpack.c.bf16 %v305_v56, %v304_v54  ;;  %v307_v4 = vmax.f32 %v243_v57, 0.0  ;;  %v1109_v56 = vld [vmem:[%s1502_s0 + $0xa0] sm:$0xff]  }
  0x1e   :  { %v174_v5 = vmul.f32 %v853_v58, %v1178_v1  ;;  %v244_v6 = vadd.f32 %v1192_v7, %v173_v59  ;;  %1129 = vst [vmem:[%s1505_s3 + $0x48] sm:$0xff] %v978_v61   ;;  %v860_v10 = vunpack.c.l.bf16 %v1103_v60  ;;  %v861_v11 = vunpack.c.h.bf16 %v1103_v60 }
  0x1f   :  { %v175_v8 = vmul.f32 %v856_v63, %v1178_v1  ;;  %v176_v9 = vmul.f32 %v857_v0, %v1178_v1  ;;  %1130 = vst [vmem:[%s1505_s3 + $0x50] sm:$0xff] %v983_v3   ;;  %v988_v13 = vpack.c.bf16 %v307_v4, %v306_v62  ;;  %v864_v16 = vunpack.c.l.bf16 %v1104_v2 }
  0x20   :  { %v245_v14 = vadd.f32 %v1192_v7, %v174_v5  ;;  %v308_v15 = vmax.f32 %v244_v6, 0.0  ;;  %v177_v19 = vmul.f32 %v860_v10, %v1178_v1  ;;  %v178_v20 = vmul.f32 %v861_v11, %v1178_v1 }
  0x21   :  { %v246_v17 = vadd.f32 %v1192_v7, %v175_v8  ;;  %v247_v18 = vadd.f32 %v1192_v7, %v176_v9  ;;  %1131 = vst [vmem:[%s1505_s3 + $0x58] sm:$0xff] %v988_v13   ;;  %v865_v22 = vunpack.c.h.bf16 %v1104_v2  ;;  %v179_v23 = vmul.f32 %v864_v16, %v1178_v1  ;;  %v1110_v2 = vld [vmem:[%s1502_s0 + $0xa8] sm:$0xff]   ;;  %v1111_v16 = vld [vmem:[%s1502_s0 + $0xb0] sm:$0xff]  }
  0x22   :  { %v309_v21 = vmax.f32 %v245_v14, 0.0  ;;  %v868_v24 = vunpack.c.l.bf16 %v1105_v12  ;;  %v248_v27 = vadd.f32 %v1192_v7, %v177_v19  ;;  %v249_v28 = vadd.f32 %v1192_v7, %v178_v20 }
  0x23   :  { %v310_v25 = vmax.f32 %v246_v17, 0.0  ;;  %v311_v26 = vmax.f32 %v247_v18, 0.0  ;;  %v180_v31 = vmul.f32 %v865_v22, %v1178_v1  ;;  %v250_v32 = vadd.f32 %v1192_v7, %v179_v23 }
  0x24   :  { %v993_v30 = vpack.c.bf16 %v309_v21, %v308_v15  ;;  %v869_v33 = vunpack.c.h.bf16 %v1105_v12  ;;  %v312_v36 = vmax.f32 %v248_v27, 0.0  ;;  %v313_v37 = vmax.f32 %v249_v28, 0.0  ;;  %v1112_v21 = vld [vmem:[%s1502_s0 + $0xb8] sm:$0xff]  }
  0x25   :  { %v998_v35 = vpack.c.bf16 %v311_v26, %v310_v25  ;;  %v181_v38 = vmul.f32 %v868_v24, %v1178_v1  ;;  %v251_v39 = vadd.f32 %v1192_v7, %v180_v31  ;;  %v314_v40 = vmax.f32 %v250_v32, 0.0 }
  0x26   :  { %1132 = vst [vmem:[%s1505_s3 + $0x60] sm:$0xff] %v993_v30   ;;  %v182_v41 = vmul.f32 %v869_v33, %v1178_v1  ;;  %v872_v42 = vunpack.c.l.bf16 %v1106_v29  ;;  %v1003_v44 = vpack.c.bf16 %v313_v37, %v312_v36  ;;  %v873_v46 = vunpack.c.h.bf16 %v1106_v29 }
  0x27   :  { %1133 = vst [vmem:[%s1505_s3 + $0x68] sm:$0xff] %v998_v35   ;;  %v252_v45 = vadd.f32 %v1192_v7, %v181_v38  ;;  %v876_v47 = vunpack.c.l.bf16 %v1107_v34  ;;  %v315_v48 = vmax.f32 %v251_v39, 0.0  ;;  %v877_v51 = vunpack.c.h.bf16 %v1107_v34  ;;  %v1113_v34 = vld [vmem:[%s1502_s0 + $0xc0] sm:$0xff]  }
  0x28   :  { %v253_v49 = vadd.f32 %v1192_v7, %v182_v41  ;;  %v183_v50 = vmul.f32 %v872_v42, %v1178_v1  ;;  %1134 = vst [vmem:[%s1505_s3 + $0x70] sm:$0xff] %v1003_v44   ;;  %v184_v53 = vmul.f32 %v873_v46, %v1178_v1  ;;  %v880_v55 = vunpack.c.l.bf16 %v1108_v43 }
  0x29   :  { %v316_v52 = vmax.f32 %v252_v45, 0.0  ;;  %v185_v54 = vmul.f32 %v876_v47, %v1178_v1  ;;  %v1008_v57 = vpack.c.bf16 %v315_v48, %v314_v40  ;;  %v186_v60 = vmul.f32 %v877_v51, %v1178_v1  ;;  %v1114_v47 = vld [vmem:[%s1502_s0 + $0xc8] sm:$0xff]  }
  0x2a   :  { %v317_v58 = vmax.f32 %v253_v49, 0.0  ;;  %v254_v59 = vadd.f32 %v1192_v7, %v183_v50  ;;  %v255_v61 = vadd.f32 %v1192_v7, %v184_v53  ;;  %v881_v63 = vunpack.c.h.bf16 %v1108_v43 }
  0x2b   :  { %v256_v62 = vadd.f32 %v1192_v7, %v185_v54  ;;  %v187_v0 = vmul.f32 %v880_v55, %v1178_v1  ;;  %1135 = vst [vmem:[%s1505_s3 + $0x78] sm:$0xff] %v1008_v57   ;;  %v257_v5 = vadd.f32 %v1192_v7, %v186_v60  ;;  %v884_v6 = vunpack.c.l.bf16 %v1109_v56 }
  0x2c   :  { %v1013_v3 = vpack.c.bf16 %v317_v58, %v316_v52  ;;  %v318_v4 = vmax.f32 %v254_v59, 0.0  ;;  %v319_v8 = vmax.f32 %v255_v61, 0.0  ;;  %v188_v10 = vmul.f32 %v881_v63, %v1178_v1  ;;  %v1115_v52 = vld [vmem:[%s1502_s0 + $0xd0] sm:$0xff]   ;;  %v1116_v61 = vld [vmem:[%s1502_s0 + $0xd8] sm:$0xff]  }
  0x2d   :  { %v320_v9 = vmax.f32 %v256_v62, 0.0  ;;  %v258_v11 = vadd.f32 %v1192_v7, %v187_v0  ;;  %v321_v12 = vmax.f32 %v257_v5, 0.0  ;;  %v885_v13 = vunpack.c.h.bf16 %v1109_v56 }
  0x2e   :  { %1136 = vst [vmem:[%s1505_s3 + $0x80] sm:$0xff] %v1013_v3   ;;  %v189_v14 = vmul.f32 %v884_v6, %v1178_v1  ;;  %v888_v15 = vunpack.c.l.bf16 %v1110_v2  ;;  %v1018_v17 = vpack.c.bf16 %v319_v8, %v318_v4  ;;  %v259_v18 = vadd.f32 %v1192_v7, %v188_v10 }
  0x2f   :  { %v322_v19 = vmax.f32 %v258_v11, 0.0  ;;  %v889_v20 = vunpack.c.h.bf16 %v1110_v2  ;;  %v1023_v22 = vpack.c.bf16 %v321_v12, %v320_v9  ;;  %v190_v23 = vmul.f32 %v885_v13, %v1178_v1  ;;  %v1117_v12 = vld [vmem:[%s1502_s0 + $0xe0] sm:$0xff]  }
  0x30   :  { %v260_v24 = vadd.f32 %v1192_v7, %v189_v14  ;;  %v191_v25 = vmul.f32 %v888_v15, %v1178_v1  ;;  %1137 = vst [vmem:[%s1505_s3 + $0x88] sm:$0xff] %v1018_v17   ;;  %v323_v26 = vmax.f32 %v259_v18, 0.0  ;;  %v892_v28 = vunpack.c.l.bf16 %v1111_v16 }
  0x31   :  { %v192_v27 = vmul.f32 %v889_v20, %v1178_v1  ;;  %v893_v29 = vunpack.c.h.bf16 %v1111_v16  ;;  %1138 = vst [vmem:[%s1505_s3 + $0x90] sm:$0xff] %v1023_v22   ;;  %v261_v30 = vadd.f32 %v1192_v7, %v190_v23  ;;  %v896_v33 = vunpack.c.l.bf16 %v1112_v21 }
  0x32   :  { %v324_v31 = vmax.f32 %v260_v24, 0.0  ;;  %v262_v32 = vadd.f32 %v1192_v7, %v191_v25  ;;  %v1028_v35 = vpack.c.bf16 %v323_v26, %v322_v19  ;;  %v193_v37 = vmul.f32 %v892_v28, %v1178_v1 }
  0x33   :  { %v263_v36 = vadd.f32 %v1192_v7, %v192_v27  ;;  %v194_v38 = vmul.f32 %v893_v29, %v1178_v1  ;;  %v325_v39 = vmax.f32 %v261_v30, 0.0  ;;  %v897_v41 = vunpack.c.h.bf16 %v1112_v21  ;;  %v1118_v21 = vld [vmem:[%s1502_s0 + $0xe8] sm:$0xff]  }
  0x34   :  { %v326_v40 = vmax.f32 %v262_v32, 0.0  ;;  %v195_v42 = vmul.f32 %v896_v33, %v1178_v1  ;;  %1139 = vst [vmem:[%s1505_s3 + $0x98] sm:$0xff] %v1028_v35   ;;  %v264_v44 = vadd.f32 %v1192_v7, %v193_v37  ;;  %v900_v46 = vunpack.c.l.bf16 %v1113_v34 }
  0x35   :  { %v327_v43 = vmax.f32 %v263_v36, 0.0  ;;  %v265_v45 = vadd.f32 %v1192_v7, %v194_v38  ;;  %v1033_v48 = vpack.c.bf16 %v325_v39, %v324_v31  ;;  %v196_v49 = vmul.f32 %v897_v41, %v1178_v1  ;;  %v1120_v39 = vld [vmem:[%s1502_s0 + $0xf8] sm:$0xff]  }
  0x36   :  { %v266_v50 = vadd.f32 %v1192_v7, %v195_v42  ;;  %v901_v51 = vunpack.c.h.bf16 %v1113_v34  ;;  %v328_v54 = vmax.f32 %v264_v44, 0.0  ;;  %v197_v56 = vmul.f32 %v900_v46, %v1178_v1  ;;  %v1119_v34 = vld [vmem:[%s1502_s0 + $0xf0] sm:$0xff]  }
  0x37   :  { %v1038_v53 = vpack.c.bf16 %v327_v43, %v326_v40  ;;  %v329_v55 = vmax.f32 %v265_v45, 0.0  ;;  %1140 = vst [vmem:[%s1505_s3 + $0xa0] sm:$0xff] %v1033_v48   ;;  %v267_v57 = vadd.f32 %v1192_v7, %v196_v49  ;;  %v904_v60 = vunpack.c.l.bf16 %v1114_v47 }
  0x38   :  { %v330_v58 = vmax.f32 %v266_v50, 0.0  ;;  %v198_v59 = vmul.f32 %v901_v51, %v1178_v1  ;;  %v268_v63 = vadd.f32 %v1192_v7, %v197_v56  ;;  %v905_v0 = vunpack.c.h.bf16 %v1114_v47 }
  0x39   :  { %1141 = vst [vmem:[%s1505_s3 + $0xa8] sm:$0xff] %v1038_v53   ;;  %v1043_v62 = vpack.c.bf16 %v329_v55, %v328_v54  ;;  %v908_v2 = vunpack.c.l.bf16 %v1115_v52  ;;  %v331_v3 = vmax.f32 %v267_v57, 0.0  ;;  %v199_v5 = vmul.f32 %v904_v60, %v1178_v1 }
  0x3a   :  { %v269_v4 = vadd.f32 %v1192_v7, %v198_v59  ;;  %v909_v6 = vunpack.c.h.bf16 %v1115_v52  ;;  %v332_v8 = vmax.f32 %v268_v63, 0.0  ;;  %v200_v9 = vmul.f32 %v905_v0, %v1178_v1 }
  0x3b   :  { %1142 = vst [vmem:[%s1505_s3 + $0xb0] sm:$0xff] %v1043_v62   ;;  %v201_v10 = vmul.f32 %v908_v2, %v1178_v1  ;;  %v912_v11 = vunpack.c.l.bf16 %v1116_v61  ;;  %v1048_v13 = vpack.c.bf16 %v331_v3, %v330_v58  ;;  %v270_v15 = vadd.f32 %v1192_v7, %v199_v5 }
  0x3c   :  { %v333_v14 = vmax.f32 %v269_v4, 0.0  ;;  %v202_v16 = vmul.f32 %v909_v6, %v1178_v1  ;;  %v271_v17 = vadd.f32 %v1192_v7, %v200_v9  ;;  %v913_v19 = vunpack.c.h.bf16 %v1116_v61 }
  0x3d   :  { %v272_v18 = vadd.f32 %v1192_v7, %v201_v10  ;;  %v203_v20 = vmul.f32 %v912_v11, %v1178_v1  ;;  %1143 = vst [vmem:[%s1505_s3 + $0xb8] sm:$0xff] %v1048_v13   ;;  %v334_v23 = vmax.f32 %v270_v15, 0.0  ;;  %v916_v25 = vunpack.c.l.bf16 %v1117_v12 }
  0x3e   :  { %v1053_v22 = vpack.c.bf16 %v333_v14, %v332_v8  ;;  %v273_v24 = vadd.f32 %v1192_v7, %v202_v16  ;;  %v335_v26 = vmax.f32 %v271_v17, 0.0  ;;  %v204_v28 = vmul.f32 %v913_v19, %v1178_v1 }
  0x3f   :  { %v336_v27 = vmax.f32 %v272_v18, 0.0  ;;  %v274_v29 = vadd.f32 %v1192_v7, %v203_v20  ;;  %v917_v31 = vunpack.c.h.bf16 %v1117_v12  ;;  %v205_v32 = vmul.f32 %v916_v25, %v1178_v1 }
  0x40   :  { %1144 = vst [vmem:[%s1505_s3 + $0xc0] sm:$0xff] %v1053_v22   ;;  %v337_v30 = vmax.f32 %v273_v24, 0.0  ;;  %v920_v33 = vunpack.c.l.bf16 %v1118_v21  ;;  %v1058_v35 = vpack.c.bf16 %v335_v26, %v334_v23  ;;  %v275_v36 = vadd.f32 %v1192_v7, %v204_v28 }
  0x41   :  { %v338_v37 = vmax.f32 %v274_v29, 0.0  ;;  %v921_v38 = vunpack.c.h.bf16 %v1118_v21  ;;  %v206_v41 = vmul.f32 %v917_v31, %v1178_v1  ;;  %v276_v42 = vadd.f32 %v1192_v7, %v205_v32 }
  0x42   :  { %v1063_v40 = vpack.c.bf16 %v337_v30, %v336_v27  ;;  %v207_v43 = vmul.f32 %v920_v33, %v1178_v1  ;;  %1145 = vst [vmem:[%s1505_s3 + $0xc8] sm:$0xff] %v1058_v35   ;;  %v339_v44 = vmax.f32 %v275_v36, 0.0  ;;  %v924_v46 = vunpack.c.l.bf16 %v1119_v34 }
  0x43   :  { %v208_v45 = vmul.f32 %v921_v38, %v1178_v1  ;;  %v925_v47 = vunpack.c.h.bf16 %v1119_v34  ;;  %v277_v48 = vadd.f32 %v1192_v7, %v206_v41  ;;  %v340_v49 = vmax.f32 %v276_v42, 0.0 }
  0x44   :  { %1146 = vst [vmem:[%s1505_s3 + $0xd0] sm:$0xff] %v1063_v40   ;;  %v278_v50 = vadd.f32 %v1192_v7, %v207_v43  ;;  %v928_v51 = vunpack.c.l.bf16 %v1120_v39  ;;  %v1068_v52 = vpack.c.bf16 %v339_v44, %v338_v37  ;;  %v209_v54 = vmul.f32 %v924_v46, %v1178_v1 }
  0x45   :  { %v279_v53 = vadd.f32 %v1192_v7, %v208_v45  ;;  %v210_v55 = vmul.f32 %v925_v47, %v1178_v1  ;;  %v341_v56 = vmax.f32 %v277_v48, 0.0  ;;  %v929_v58 = vunpack.c.h.bf16 %v1120_v39 }
  0x46   :  { %v342_v57 = vmax.f32 %v278_v50, 0.0  ;;  %v211_v59 = vmul.f32 %v928_v51, %v1178_v1  ;;  %1147 = vst [vmem:[%s1505_s3 + $0xd8] sm:$0xff] %v1068_v52   ;;  %v280_v61 = vadd.f32 %v1192_v7, %v209_v54 }
  0x47   :  { %v343_v60 = vmax.f32 %v279_v53, 0.0  ;;  %v281_v62 = vadd.f32 %v1192_v7, %v210_v55  ;;  %v1073_v63 = vpack.c.bf16 %v341_v56, %v340_v49  ;;  %v212_v0 = vmul.f32 %v929_v58, %v1178_v1 }
  0x48   :  { %v282_v2 = vadd.f32 %v1192_v7, %v211_v59  ;;  %v344_v4 = vmax.f32 %v280_v61, 0.0 }
  0x49   :  { %v1078_v3 = vpack.c.bf16 %v343_v60, %v342_v57  ;;  %v345_v5 = vmax.f32 %v281_v62, 0.0  ;;  %1148 = vst [vmem:[%s1505_s3 + $0xe0] sm:$0xff] %v1073_v63   ;;  %v283_v6 = vadd.f32 %v1192_v7, %v212_v0 }
  0x4a   :  { %v346_v8 = vmax.f32 %v282_v2, 0.0 }
  0x4b   :  { %1149 = vst [vmem:[%s1505_s3 + $0xe8] sm:$0xff] %v1078_v3   ;;  %v1083_v9 = vpack.c.bf16 %v345_v5, %v344_v4  ;;  %v347_v10 = vmax.f32 %v283_v6, 0.0 }
  0x4d   :  { %1150 = vst [vmem:[%s1505_s3 + $0xf0] sm:$0xff] %v1083_v9   ;;  %v1088_v1 = vpack.c.bf16 %v347_v10, %v346_v8 }
  0x4f   :  { %1151 = vst [vmem:[%s1505_s3 + $0xf8] sm:$0xff] %v1088_v1  }

// kernel: _lambda_.11
= control target key start
LH: loop header
LB: loop body
LE: loop exit
PB: predicated region body
PF: predicated region fallthrough
CT: control target
= control target key end

     0   :  { %v2236_v0 = vmov 0   ;;  %vm571_vm0 = vcmask 130048   ;;  %s2807_s1 = inlined_call_operand.vmem [shape: bf16[144,128], index: 1, kind: input, shape index: {}]   ;;  %s2808_s0 = inlined_call_operand.vmem [shape: bf16[512,144], index: 0, kind: input, shape index: {}]   ;;  %s2809_s2 = inlined_call_operand.vmem [shape: bf16[512,128], index: 2, kind: output, shape index: {0}]   ;;  %s2810_s3 = inlined_call_operand.vmem [shape: f32[8,128], index: 3, kind: output, shape index: {1}]   ;;  %s2811_s4 = inlined_call_operand.vmem [shape: f32[8,128], index: 4, kind: output, shape index: {2}]  }
   0x1   :  { %668 = vmatprep.subr.bf16.mxu0 %v2236_v0  ;;  %v2131_v1 = vld [vmem:[%s2807_s1] sm:$0xff]   ;;  %2112 = vmatprep.subr.bf16.mxu1 %v2236_v0  ;;  %v2132_v2 = vld [vmem:[%s2807_s1 + $0x8] sm:$0xff]   ;;  %v2133_v3 = vld [vmem:[%s2807_s1 + $0x10] sm:$0xff]  }
   0x2   :  { %669 = vmatpush1.bf16.msra.mxu0 %v2131_v1  ;;  %2121 = vmatpush1.bf16.msra.mxu1 %v2131_v1  ;;  %v2134_v4 = vld [vmem:[%s2807_s1 + $0x18] sm:$0xff]   ;;  %v2142_v5 = vld [vmem:[%s2808_s0 + $0x4] ss:$8 sps:$4 sm:$0xff]   ;;  %v2137_v9 = vld [vmem:[%s2807_s1 + $0x30] sm:$0xff]  }
   0x3   :  { %670 = vmatprep.subr.bf16.mxu0 %v2236_v0  ;;  %2113 = vmatprep.subr.bf16.mxu1 %v2236_v0  ;;  %v2135_v6 = vld [vmem:[%s2807_s1 + $0x20] sm:$0xff]   ;;  %v2136_v7 = vld [vmem:[%s2807_s1 + $0x28] sm:$0xff]   ;;  %v2138_v10 = vld [vmem:[%s2807_s1 + $0x38] sm:$0xff]  }
   0x4   :  { %1761 = vmatprep.mubr.msk.bf16.mxu0 %vm571_vm0, %v2142_v5  ;;  %v2166_v8 = vld [vmem:[%s2808_s0 + $0x104] ss:$8 sps:$4 sm:$0xff]   ;;  %v2140_v12 = vld [vmem:[%s2808_s0] ss:$8 sps:$4 sm:$0xff]   ;;  %v2143_v13 = vld [vmem:[%s2808_s0 + $0x14] ss:$8 sps:$4 sm:$0xff]  }
   0x5   :  { %1777 = vmatprep.mubr.msk.bf16.mxu1 %vm571_vm0, %v2166_v8  ;;  %v2139_v11 = vld [vmem:[%s2807_s1 + $0x40] sm:$0xff]   ;;  %v2170_v15 = vld [vmem:[%s2808_s0 + $0x114] ss:$8 sps:$4 sm:$0xff]   ;;  %v2145_v16 = vld [vmem:[%s2808_s0 + $0x10] ss:$8 sps:$4 sm:$0xff]  }
   0x6   :  { %671 = vmatpush1.bf16.msra.mxu0 %v2132_v2  ;;  %2122 = vmatpush1.bf16.msra.mxu1 %v2132_v2  ;;  %v2164_v14 = vld [vmem:[%s2808_s0 + $0x100] ss:$8 sps:$4 sm:$0xff]   ;;  %v2146_v17 = vld [vmem:[%s2808_s0 + $0x24] ss:$8 sps:$4 sm:$0xff]   ;;  %v2172_v18 = vld [vmem:[%s2808_s0 + $0x110] ss:$8 sps:$4 sm:$0xff]  }
   0x7   :  { %672 = vmatprep.subr.bf16.mxu0 %v2236_v0  ;;  %2114 = vmatprep.subr.bf16.mxu1 %v2236_v0  ;;  %v2176_v19 = vld [vmem:[%s2808_s0 + $0x124] ss:$8 sps:$4 sm:$0xff]   ;;  %v2148_v20 = vld [vmem:[%s2808_s0 + $0x20] ss:$8 sps:$4 sm:$0xff]   ;;  %v2149_v21 = vld [vmem:[%s2808_s0 + $0x34] ss:$8 sps:$4 sm:$0xff]  }
   0x8   :  { %v2178_v22 = vld [vmem:[%s2808_s0 + $0x120] ss:$8 sps:$4 sm:$0xff]   ;;  %v2182_v23 = vld [vmem:[%s2808_s0 + $0x134] ss:$8 sps:$4 sm:$0xff]   ;;  %v2151_v24 = vld [vmem:[%s2808_s0 + $0x30] ss:$8 sps:$4 sm:$0xff]  }
   0x9   :  { %v2184_v25 = vld [vmem:[%s2808_s0 + $0x130] ss:$8 sps:$4 sm:$0xff]   ;;  %v2152_v26 = vld [vmem:[%s2808_s0 + $0x44] ss:$8 sps:$4 sm:$0xff]   ;;  %v2154_v28 = vld [vmem:[%s2808_s0 + $0x40] ss:$8 sps:$4 sm:$0xff]  }
   0xa   :  { %673 = vmatpush1.bf16.msra.mxu0 %v2133_v3  ;;  %2123 = vmatpush1.bf16.msra.mxu1 %v2133_v3  ;;  %v2188_v27 = vld [vmem:[%s2808_s0 + $0x144] ss:$8 sps:$4 sm:$0xff]   ;;  %v2190_v29 = vld [vmem:[%s2808_s0 + $0x140] ss:$8 sps:$4 sm:$0xff]   ;;  %v2155_v30 = vld [vmem:[%s2808_s0 + $0x54] ss:$8 sps:$4 sm:$0xff]  }
   0xb   :  { %674 = vmatprep.subr.bf16.mxu0 %v2236_v0  ;;  %2115 = vmatprep.subr.bf16.mxu1 %v2236_v0  ;;  %v2194_v31 = vld [vmem:[%s2808_s0 + $0x154] ss:$8 sps:$4 sm:$0xff]   ;;  %v2157_v32 = vld [vmem:[%s2808_s0 + $0x50] ss:$8 sps:$4 sm:$0xff]   ;;  %v2158_v34 = vld [vmem:[%s2808_s0 + $0x64] ss:$8 sps:$4 sm:$0xff]  }
   0xc   :  { %v2196_v33 = vld [vmem:[%s2808_s0 + $0x150] ss:$8 sps:$4 sm:$0xff]   ;;  %v2200_v35 = vld [vmem:[%s2808_s0 + $0x164] ss:$8 sps:$4 sm:$0xff]   ;;  %v2160_v36 = vld [vmem:[%s2808_s0 + $0x60] ss:$8 sps:$4 sm:$0xff]  }
   0xd   :  { %v2202_v37 = vld [vmem:[%s2808_s0 + $0x160] ss:$8 sps:$4 sm:$0xff]   ;;  %v2161_v38 = vld [vmem:[%s2808_s0 + $0x74] ss:$8 sps:$4 sm:$0xff]   ;;  %v2163_v40 = vld [vmem:[%s2808_s0 + $0x70] ss:$8 sps:$4 sm:$0xff]  }
   0xe   :  { %675 = vmatpush1.bf16.msra.mxu0 %v2134_v4  ;;  %2124 = vmatpush1.bf16.msra.mxu1 %v2134_v4  ;;  %v2206_v39 = vld [vmem:[%s2808_s0 + $0x174] ss:$8 sps:$4 sm:$0xff]   ;;  %v2208_v41 = vld [vmem:[%s2808_s0 + $0x170] ss:$8 sps:$4 sm:$0xff]   ;;  %v2167_v42 = vld [vmem:[%s2808_s0 + $0x84] ss:$8 sps:$4 sm:$0xff]  }
   0xf   :  { %676 = vmatprep.subr.bf16.mxu0 %v2236_v0  ;;  %2116 = vmatprep.subr.bf16.mxu1 %v2236_v0  ;;  %v2212_v43 = vld [vmem:[%s2808_s0 + $0x184] ss:$8 sps:$4 sm:$0xff]   ;;  %v2169_v44 = vld [vmem:[%s2808_s0 + $0x80] ss:$8 sps:$4 sm:$0xff]   ;;  %v2173_v46 = vld [vmem:[%s2808_s0 + $0x94] ss:$8 sps:$4 sm:$0xff]  }
  0x10   :  { %v2214_v45 = vld [vmem:[%s2808_s0 + $0x180] ss:$8 sps:$4 sm:$0xff]   ;;  %v2215_v47 = vld [vmem:[%s2808_s0 + $0x194] ss:$8 sps:$4 sm:$0xff]   ;;  %v2175_v48 = vld [vmem:[%s2808_s0 + $0x90] ss:$8 sps:$4 sm:$0xff]  }
  0x11   :  { %v2217_v49 = vld [vmem:[%s2808_s0 + $0x190] ss:$8 sps:$4 sm:$0xff]   ;;  %v2179_v50 = vld [vmem:[%s2808_s0 + $0xa4] ss:$8 sps:$4 sm:$0xff]   ;;  %v2181_v52 = vld [vmem:[%s2808_s0 + $0xa0] ss:$8 sps:$4 sm:$0xff]  }
  0x12   :  { %677 = vmatpush1.bf16.msra.mxu0 %v2135_v6  ;;  %2125 = vmatpush1.bf16.msra.mxu1 %v2135_v6  ;;  %v2218_v51 = vld [vmem:[%s2808_s0 + $0x1a4] ss:$8 sps:$4 sm:$0xff]   ;;  %v2220_v53 = vld [vmem:[%s2808_s0 + $0x1a0] ss:$8 sps:$4 sm:$0xff]   ;;  %v2185_v54 = vld [vmem:[%s2808_s0 + $0xb4] ss:$8 sps:$4 sm:$0xff]  }
  0x13   :  { %678 = vmatprep.subr.bf16.mxu0 %v2236_v0  ;;  %2117 = vmatprep.subr.bf16.mxu1 %v2236_v0  ;;  %v2221_v55 = vld [vmem:[%s2808_s0 + $0x1b4] ss:$8 sps:$4 sm:$0xff]   ;;  %v2187_v56 = vld [vmem:[%s2808_s0 + $0xb0] ss:$8 sps:$4 sm:$0xff]   ;;  %v2191_v58 = vld [vmem:[%s2808_s0 + $0xc4] ss:$8 sps:$4 sm:$0xff]  }
  0x14   :  { %v2223_v57 = vld [vmem:[%s2808_s0 + $0x1b0] ss:$8 sps:$4 sm:$0xff]   ;;  %v2224_v59 = vld [vmem:[%s2808_s0 + $0x1c4] ss:$8 sps:$4 sm:$0xff]   ;;  %v2193_v60 = vld [vmem:[%s2808_s0 + $0xc0] ss:$8 sps:$4 sm:$0xff]  }
  0x15   :  { %v2226_v61 = vld [vmem:[%s2808_s0 + $0x1c0] ss:$8 sps:$4 sm:$0xff]   ;;  %v2197_v62 = vld [vmem:[%s2808_s0 + $0xd4] ss:$8 sps:$4 sm:$0xff]   ;;  %v2229_v1 = vld [vmem:[%s2808_s0 + $0x1d0] ss:$8 sps:$4 sm:$0xff]  }
  0x16   :  { %679 = vmatpush1.bf16.msra.mxu0 %v2136_v7  ;;  %2126 = vmatpush1.bf16.msra.mxu1 %v2136_v7  ;;  %v2227_v63 = vld [vmem:[%s2808_s0 + $0x1d4] ss:$8 sps:$4 sm:$0xff]   ;;  %v2203_v2 = vld [vmem:[%s2808_s0 + $0xe4] ss:$8 sps:$4 sm:$0xff]   ;;  %v2205_v4 = vld [vmem:[%s2808_s0 + $0xe0] ss:$8 sps:$4 sm:$0xff]  }
  0x17   :  { %680 = vmatprep.subr.bf16.mxu0 %v2236_v0  ;;  %2118 = vmatprep.subr.bf16.mxu1 %v2236_v0  ;;  %v2230_v3 = vld [vmem:[%s2808_s0 + $0x1e4] ss:$8 sps:$4 sm:$0xff]   ;;  %v2232_v5 = vld [vmem:[%s2808_s0 + $0x1e0] ss:$8 sps:$4 sm:$0xff]   ;;  %v2209_v6 = vld [vmem:[%s2808_s0 + $0xf4] ss:$8 sps:$4 sm:$0xff]  }
  0x18   :  { %v2233_v7 = vld [vmem:[%s2808_s0 + $0x1f4] ss:$8 sps:$4 sm:$0xff]   ;;  %v2211_v8 = vld [vmem:[%s2808_s0 + $0xf0] ss:$8 sps:$4 sm:$0xff]  }
  0x1a   :  { %681 = vmatpush1.bf16.msra.mxu0 %v2137_v9  ;;  %2127 = vmatpush1.bf16.msra.mxu1 %v2137_v9  ;;  %v2235_v9 = vld [vmem:[%s2808_s0 + $0x1f0] ss:$8 sps:$4 sm:$0xff]  }
  0x1b   :  { %682 = vmatprep.subr.bf16.mxu0 %v2236_v0  ;;  %2119 = vmatprep.subr.bf16.mxu1 %v2236_v0 }
  0x1e   :  { %683 = vmatpush1.bf16.msra.mxu0 %v2138_v10  ;;  %2128 = vmatpush1.bf16.msra.mxu1 %v2138_v10 }
  0x1f   :  { %684 = vmatprep.subr.bf16.mxu0 %v2236_v0  ;;  %2120 = vmatprep.subr.bf16.mxu1 %v2236_v0  ;;  %v2199_v0 = vld [vmem:[%s2808_s0 + $0xd0] ss:$8 sps:$4 sm:$0xff]  }
  0x22   :  { %685 = vmatpush1.bf16.msra.mxu0 %v2139_v11  ;;  %2129 = vmatpush1.bf16.msra.mxu1 %v2139_v11 }
  0x25   :  { %701 = vmatmul.mubr.bf16.vlgmr.msra.gmra.mrb[0].mxu0 %v2140_v12  ;;  %829 = vmatmul.mubr.bf16.vlgmr.msra.gmra.mrb[0].mxu1 %v2164_v14 }
  0x26   :  { %1762 = vmatprep.mubr.msk.bf16.mxu0 %vm571_vm0, %v2143_v13  ;;  %1778 = vmatprep.mubr.msk.bf16.mxu1 %vm571_vm0, %v2170_v15 }
  0x2d   :  { %709 = vmatmul.mubr.bf16.gmra.mrb[4].mxu0 %v2145_v16  ;;  %837 = vmatmul.mubr.bf16.gmra.mrb[4].mxu1 %v2172_v18 }
  0x2e   :  { %1763 = vmatprep.mubr.msk.bf16.mxu0 %vm571_vm0, %v2146_v17  ;;  %1779 = vmatprep.mubr.msk.bf16.mxu1 %vm571_vm0, %v2176_v19 }
  0x35   :  { %717 = vmatmul.mubr.bf16.gmra.mrb[8].mxu0 %v2148_v20  ;;  %845 = vmatmul.mubr.bf16.gmra.mrb[8].mxu1 %v2178_v22 }
  0x36   :  { %1764 = vmatprep.mubr.msk.bf16.mxu0 %vm571_vm0, %v2149_v21  ;;  %1780 = vmatprep.mubr.msk.bf16.mxu1 %vm571_vm0, %v2182_v23 }
  0x3d   :  { %725 = vmatmul.mubr.bf16.gmra.mrb[12].mxu0 %v2151_v24  ;;  %853 = vmatmul.mubr.bf16.gmra.mrb[12].mxu1 %v2184_v25 }
  0x3e   :  { %1765 = vmatprep.mubr.msk.bf16.mxu0 %vm571_vm0, %v2152_v26  ;;  %1781 = vmatprep.mubr.msk.bf16.mxu1 %vm571_vm0, %v2188_v27 }
  0x45   :  { %733 = vmatmul.mubr.bf16.gmra.mrb[16].mxu0 %v2154_v28  ;;  %861 = vmatmul.mubr.bf16.gmra.mrb[16].mxu1 %v2190_v29 }
  0x46   :  { %1766 = vmatprep.mubr.msk.bf16.mxu0 %vm571_vm0, %v2155_v30  ;;  %1782 = vmatprep.mubr.msk.bf16.mxu1 %vm571_vm0, %v2194_v31 }
  0x4d   :  { %741 = vmatmul.mubr.bf16.gmra.mrb[20].mxu0 %v2157_v32  ;;  %869 = vmatmul.mubr.bf16.gmra.mrb[20].mxu1 %v2196_v33 }
  0x4e   :  { %1767 = vmatprep.mubr.msk.bf16.mxu0 %vm571_vm0, %v2158_v34  ;;  %1783 = vmatprep.mubr.msk.bf16.mxu1 %vm571_vm0, %v2200_v35 }
  0x55   :  { %749 = vmatmul.mubr.bf16.gmra.mrb[24].mxu0 %v2160_v36  ;;  %877 = vmatmul.mubr.bf16.gmra.mrb[24].mxu1 %v2202_v37 }
  0x56   :  { %1768 = vmatprep.mubr.msk.bf16.mxu0 %vm571_vm0, %v2161_v38  ;;  %1784 = vmatprep.mubr.msk.bf16.mxu1 %vm571_vm0, %v2206_v39 }
  0x5d   :  { %757 = vmatmul.mubr.bf16.gmra.mrb[28].mxu0 %v2163_v40  ;;  %885 = vmatmul.mubr.bf16.gmra.mrb[28].mxu1 %v2208_v41 }
  0x5e   :  { %1769 = vmatprep.mubr.msk.bf16.mxu0 %vm571_vm0, %v2167_v42  ;;  %1785 = vmatprep.mubr.msk.bf16.mxu1 %vm571_vm0, %v2212_v43 }
  0x65   :  { %765 = vmatmul.mubr.bf16.gmra.mrb[32].mxu0 %v2169_v44  ;;  %893 = vmatmul.mubr.bf16.gmra.mrb[32].mxu1 %v2214_v45 }
  0x66   :  { %1770 = vmatprep.mubr.msk.bf16.mxu0 %vm571_vm0, %v2173_v46  ;;  %1786 = vmatprep.mubr.msk.bf16.mxu1 %vm571_vm0, %v2215_v47 }
  0x6d   :  { %773 = vmatmul.mubr.bf16.gmra.mrb[36].mxu0 %v2175_v48  ;;  %901 = vmatmul.mubr.bf16.gmra.mrb[36].mxu1 %v2217_v49 }
  0x6e   :  { %1771 = vmatprep.mubr.msk.bf16.mxu0 %vm571_vm0, %v2179_v50  ;;  %1787 = vmatprep.mubr.msk.bf16.mxu1 %vm571_vm0, %v2218_v51 }
  0x75   :  { %781 = vmatmul.mubr.bf16.gmra.mrb[40].mxu0 %v2181_v52  ;;  %909 = vmatmul.mubr.bf16.gmra.mrb[40].mxu1 %v2220_v53 }
  0x76   :  { %1772 = vmatprep.mubr.msk.bf16.mxu0 %vm571_vm0, %v2185_v54  ;;  %1788 = vmatprep.mubr.msk.bf16.mxu1 %vm571_vm0, %v2221_v55 }
  0x7d   :  { %789 = vmatmul.mubr.bf16.gmra.mrb[44].mxu0 %v2187_v56  ;;  %917 = vmatmul.mubr.bf16.gmra.mrb[44].mxu1 %v2223_v57 }
  0x7e   :  { %1773 = vmatprep.mubr.msk.bf16.mxu0 %vm571_vm0, %v2191_v58  ;;  %1789 = vmatprep.mubr.msk.bf16.mxu1 %vm571_vm0, %v2224_v59 }
  0x85   :  { %797 = vmatmul.mubr.bf16.gmra.mrb[48].mxu0 %v2193_v60  ;;  %925 = vmatmul.mubr.bf16.gmra.mrb[48].mxu1 %v2226_v61 }
  0x86   :  { %1774 = vmatprep.mubr.msk.bf16.mxu0 %vm571_vm0, %v2197_v62  ;;  %1790 = vmatprep.mubr.msk.bf16.mxu1 %vm571_vm0, %v2227_v63 }
  0x8d   :  { %805 = vmatmul.mubr.bf16.gmra.mrb[52].mxu0 %v2199_v0  ;;  %933 = vmatmul.mubr.bf16.gmra.mrb[52].mxu1 %v2229_v1 }
  0x8e   :  { %1775 = vmatprep.mubr.msk.bf16.mxu0 %vm571_vm0, %v2203_v2  ;;  %1791 = vmatprep.mubr.msk.bf16.mxu1 %vm571_vm0, %v2230_v3 }
  0x95   :  { %813 = vmatmul.mubr.bf16.gmra.mrb[56].mxu0 %v2205_v4  ;;  %941 = vmatmul.mubr.bf16.gmra.mrb[56].mxu1 %v2232_v5 }
  0x96   :  { %1776 = vmatprep.mubr.msk.bf16.mxu0 %vm571_vm0, %v2209_v6  ;;  %1792 = vmatprep.mubr.msk.bf16.mxu1 %vm571_vm0, %v2233_v7 }
  0x9d   :  { %821 = vmatmul.mubr.bf16.gmra.mrb[60].mxu0 %v2211_v8  ;;  %949 = vmatmul.mubr.bf16.gmra.mrb[60].mxu1 %v2235_v9 }
  0xf8   :  { %v702_v10 = vpop.f32.mrb[0].mxu0  ;;  %v2513_v11 = vpop.f32.mrb[0].mxu1 }
  0xf9   :  { %v704_v12 = vpop.f32.mrb[1].mxu0  ;;  %v832_v13 = vpop.f32.mrb[1].mxu1  ;;  %v1541_v14 = vmul.f32 %v702_v10, %v702_v10 }
  0xfa   :  { %v705_v15 = vpop.f32.mrb[2].mxu0  ;;  %v2515_v16 = vpop.f32.mrb[2].mxu1 }
  0xfb   :  { %v1924_v17 = vpack.c.bf16 %v705_v15, %v702_v10  ;;  %v1472_v18 = vadd.f32 %v705_v15, %v702_v10  ;;  %v1542_v19 = vmul.f32 %v705_v15, %v705_v15  ;;  %v707_v20 = vpop.f32.mrb[3].mxu0  ;;  %v2004_v21 = vpack.c.bf16 %v2515_v16, %v2513_v11  ;;  %v835_v22 = vpop.f32.mrb[3].mxu1 }
  0xfd   :  { %1925 = vst [vmem:[%s2809_s2] sm:$0xff] %v1924_v17   ;;  %v1605_v23 = vadd.f32 %v1542_v19, %v1541_v14  ;;  %2096 = vst [vmem:[%s2809_s2 + $0x80] sm:$0xff] %v2004_v21  }
 0x100   :  { %v710_v24 = vpop.f32.mrb[4].mxu0  ;;  %v2525_v25 = vpop.f32.mrb[4].mxu1 }
 0x101   :  { %v1473_v26 = vadd.f32 %v1472_v18, %v710_v24  ;;  %v1543_v27 = vmul.f32 %v710_v24, %v710_v24  ;;  %v712_v28 = vpop.f32.mrb[5].mxu0  ;;  %v840_v29 = vpop.f32.mrb[5].mxu1 }
 0x102   :  { %v713_v30 = vpop.f32.mrb[6].mxu0  ;;  %v2527_v31 = vpop.f32.mrb[6].mxu1 }
 0x103   :  { %v1606_v32 = vadd.f32 %v1605_v23, %v1543_v27  ;;  %v1929_v33 = vpack.c.bf16 %v713_v30, %v710_v24  ;;  %v1474_v34 = vadd.f32 %v1473_v26, %v713_v30  ;;  %v1544_v35 = vmul.f32 %v713_v30, %v713_v30  ;;  %v715_v36 = vpop.f32.mrb[7].mxu0  ;;  %v843_v37 = vpop.f32.mrb[7].mxu1 }
 0x104   :  { %v2009_v38 = vpack.c.bf16 %v2527_v31, %v2525_v25 }
 0x105   :  { %2081 = vst [vmem:[%s2809_s2 + $0x8] sm:$0xff] %v1929_v33   ;;  %v1607_v39 = vadd.f32 %v1606_v32, %v1544_v35 }
 0x106   :  { %2097 = vst [vmem:[%s2809_s2 + $0x88] sm:$0xff] %v2009_v38  }
 0x108   :  { %v718_v40 = vpop.f32.mrb[8].mxu0  ;;  %v2537_v41 = vpop.f32.mrb[8].mxu1 }
 0x109   :  { %v1475_v42 = vadd.f32 %v1474_v34, %v718_v40  ;;  %v1545_v43 = vmul.f32 %v718_v40, %v718_v40  ;;  %v720_v44 = vpop.f32.mrb[9].mxu0  ;;  %v848_v45 = vpop.f32.mrb[9].mxu1 }
 0x10a   :  { %v721_v46 = vpop.f32.mrb[10].mxu0  ;;  %v2539_v47 = vpop.f32.mrb[10].mxu1 }
 0x10b   :  { %v1608_v48 = vadd.f32 %v1607_v39, %v1545_v43  ;;  %v1934_v49 = vpack.c.bf16 %v721_v46, %v718_v40  ;;  %v1476_v50 = vadd.f32 %v1475_v42, %v721_v46  ;;  %v1546_v51 = vmul.f32 %v721_v46, %v721_v46  ;;  %v723_v52 = vpop.f32.mrb[11].mxu0  ;;  %v851_v53 = vpop.f32.mrb[11].mxu1 }
 0x10c   :  { %v2014_v54 = vpack.c.bf16 %v2539_v47, %v2537_v41 }
 0x10d   :  { %2082 = vst [vmem:[%s2809_s2 + $0x10] sm:$0xff] %v1934_v49   ;;  %v1609_v55 = vadd.f32 %v1608_v48, %v1546_v51 }
 0x10e   :  { %2098 = vst [vmem:[%s2809_s2 + $0x90] sm:$0xff] %v2014_v54  }
 0x110   :  { %v726_v56 = vpop.f32.mrb[12].mxu0  ;;  %v2549_v57 = vpop.f32.mrb[12].mxu1 }
 0x111   :  { %v1477_v58 = vadd.f32 %v1476_v50, %v726_v56  ;;  %v1547_v59 = vmul.f32 %v726_v56, %v726_v56  ;;  %v728_v60 = vpop.f32.mrb[13].mxu0  ;;  %v856_v61 = vpop.f32.mrb[13].mxu1 }
 0x112   :  { %v729_v62 = vpop.f32.mrb[14].mxu0  ;;  %v2551_v63 = vpop.f32.mrb[14].mxu1 }
 0x113   :  { %v1610_v0 = vadd.f32 %v1609_v55, %v1547_v59  ;;  %v1939_v1 = vpack.c.bf16 %v729_v62, %v726_v56  ;;  %v1478_v2 = vadd.f32 %v1477_v58, %v729_v62  ;;  %v1548_v3 = vmul.f32 %v729_v62, %v729_v62  ;;  %v731_v4 = vpop.f32.mrb[15].mxu0  ;;  %v859_v5 = vpop.f32.mrb[15].mxu1 }
 0x114   :  { %v2019_v6 = vpack.c.bf16 %v2551_v63, %v2549_v57 }
 0x115   :  { %2083 = vst [vmem:[%s2809_s2 + $0x18] sm:$0xff] %v1939_v1   ;;  %v1611_v7 = vadd.f32 %v1610_v0, %v1548_v3 }
 0x116   :  { %2099 = vst [vmem:[%s2809_s2 + $0x98] sm:$0xff] %v2019_v6  }
 0x118   :  { %v734_v8 = vpop.f32.mrb[16].mxu0  ;;  %v2561_v9 = vpop.f32.mrb[16].mxu1 }
 0x119   :  { %v1479_v10 = vadd.f32 %v1478_v2, %v734_v8  ;;  %v1549_v12 = vmul.f32 %v734_v8, %v734_v8  ;;  %v736_v13 = vpop.f32.mrb[17].mxu0  ;;  %v864_v14 = vpop.f32.mrb[17].mxu1 }
 0x11a   :  { %v737_v15 = vpop.f32.mrb[18].mxu0  ;;  %v2563_v17 = vpop.f32.mrb[18].mxu1 }
 0x11b   :  { %v1612_v18 = vadd.f32 %v1611_v7, %v1549_v12  ;;  %v1944_v19 = vpack.c.bf16 %v737_v15, %v734_v8  ;;  %v1480_v20 = vadd.f32 %v1479_v10, %v737_v15  ;;  %v1550_v21 = vmul.f32 %v737_v15, %v737_v15  ;;  %v739_v22 = vpop.f32.mrb[19].mxu0  ;;  %v867_v23 = vpop.f32.mrb[19].mxu1 }
 0x11c   :  { %v2024_v24 = vpack.c.bf16 %v2563_v17, %v2561_v9 }
 0x11d   :  { %2084 = vst [vmem:[%s2809_s2 + $0x20] sm:$0xff] %v1944_v19   ;;  %v1613_v26 = vadd.f32 %v1612_v18, %v1550_v21 }
 0x11e   :  { %2100 = vst [vmem:[%s2809_s2 + $0xa0] sm:$0xff] %v2024_v24  }
 0x120   :  { %v742_v27 = vpop.f32.mrb[20].mxu0  ;;  %v2573_v28 = vpop.f32.mrb[20].mxu1 }
 0x121   :  { %v1481_v29 = vadd.f32 %v1480_v20, %v742_v27  ;;  %v1551_v30 = vmul.f32 %v742_v27, %v742_v27  ;;  %v744_v32 = vpop.f32.mrb[21].mxu0  ;;  %v872_v33 = vpop.f32.mrb[21].mxu1 }
 0x122   :  { %v745_v34 = vpop.f32.mrb[22].mxu0  ;;  %v2575_v35 = vpop.f32.mrb[22].mxu1 }
 0x123   :  { %v1614_v36 = vadd.f32 %v1613_v26, %v1551_v30  ;;  %v1949_v37 = vpack.c.bf16 %v745_v34, %v742_v27  ;;  %v1482_v38 = vadd.f32 %v1481_v29, %v745_v34  ;;  %v1552_v39 = vmul.f32 %v745_v34, %v745_v34  ;;  %v747_v40 = vpop.f32.mrb[23].mxu0  ;;  %v875_v42 = vpop.f32.mrb[23].mxu1 }
 0x124   :  { %v2029_v43 = vpack.c.bf16 %v2575_v35, %v2573_v28 }
 0x125   :  { %2085 = vst [vmem:[%s2809_s2 + $0x28] sm:$0xff] %v1949_v37   ;;  %v1615_v44 = vadd.f32 %v1614_v36, %v1552_v39 }
 0x126   :  { %2101 = vst [vmem:[%s2809_s2 + $0xa8] sm:$0xff] %v2029_v43  }
 0x128   :  { %v750_v45 = vpop.f32.mrb[24].mxu0  ;;  %v2585_v46 = vpop.f32.mrb[24].mxu1 }
 0x129   :  { %v1483_v48 = vadd.f32 %v1482_v38, %v750_v45  ;;  %v1553_v49 = vmul.f32 %v750_v45, %v750_v45  ;;  %v752_v50 = vpop.f32.mrb[25].mxu0  ;;  %v880_v51 = vpop.f32.mrb[25].mxu1 }
 0x12a   :  { %v753_v52 = vpop.f32.mrb[26].mxu0  ;;  %v2587_v53 = vpop.f32.mrb[26].mxu1 }
 0x12b   :  { %v1616_v54 = vadd.f32 %v1615_v44, %v1553_v49  ;;  %v1954_v55 = vpack.c.bf16 %v753_v52, %v750_v45  ;;  %v1484_v56 = vadd.f32 %v1483_v48, %v753_v52  ;;  %v1554_v58 = vmul.f32 %v753_v52, %v753_v52  ;;  %v755_v59 = vpop.f32.mrb[27].mxu0  ;;  %v883_v60 = vpop.f32.mrb[27].mxu1 }
 0x12c   :  { %v2034_v61 = vpack.c.bf16 %v2587_v53, %v2585_v46 }
 0x12d   :  { %2086 = vst [vmem:[%s2809_s2 + $0x30] sm:$0xff] %v1954_v55   ;;  %v1617_v62 = vadd.f32 %v1616_v54, %v1554_v58 }
 0x12e   :  { %2102 = vst [vmem:[%s2809_s2 + $0xb0] sm:$0xff] %v2034_v61  }
 0x130   :  { %v758_v0 = vpop.f32.mrb[28].mxu0  ;;  %v2597_v1 = vpop.f32.mrb[28].mxu1 }
 0x131   :  { %v1485_v2 = vadd.f32 %v1484_v56, %v758_v0  ;;  %v1555_v3 = vmul.f32 %v758_v0, %v758_v0  ;;  %v760_v4 = vpop.f32.mrb[29].mxu0  ;;  %v888_v5 = vpop.f32.mrb[29].mxu1 }
 0x132   :  { %v761_v6 = vpop.f32.mrb[30].mxu0  ;;  %v2599_v7 = vpop.f32.mrb[30].mxu1 }
 0x133   :  { %v1618_v8 = vadd.f32 %v1617_v62, %v1555_v3  ;;  %v1959_v10 = vpack.c.bf16 %v761_v6, %v758_v0  ;;  %v1486_v12 = vadd.f32 %v1485_v2, %v761_v6  ;;  %v1556_v13 = vmul.f32 %v761_v6, %v761_v6  ;;  %v763_v14 = vpop.f32.mrb[31].mxu0  ;;  %v891_v15 = vpop.f32.mrb[31].mxu1 }
 0x134   :  { %v2039_v18 = vpack.c.bf16 %v2599_v7, %v2597_v1 }
 0x135   :  { %2087 = vst [vmem:[%s2809_s2 + $0x38] sm:$0xff] %v1959_v10   ;;  %v1619_v19 = vadd.f32 %v1618_v8, %v1556_v13 }
 0x136   :  { %2103 = vst [vmem:[%s2809_s2 + $0xb8] sm:$0xff] %v2039_v18  }
 0x138   :  { %v766_v20 = vpop.f32.mrb[32].mxu0  ;;  %v2609_v21 = vpop.f32.mrb[32].mxu1 }
 0x139   :  { %v1487_v22 = vadd.f32 %v1486_v12, %v766_v20  ;;  %v1557_v23 = vmul.f32 %v766_v20, %v766_v20  ;;  %v768_v24 = vpop.f32.mrb[33].mxu0  ;;  %v896_v26 = vpop.f32.mrb[33].mxu1 }
 0x13a   :  { %v769_v27 = vpop.f32.mrb[34].mxu0  ;;  %v2611_v29 = vpop.f32.mrb[34].mxu1 }
 0x13b   :  { %v1620_v30 = vadd.f32 %v1619_v19, %v1557_v23  ;;  %v1964_v32 = vpack.c.bf16 %v769_v27, %v766_v20  ;;  %v1488_v33 = vadd.f32 %v1487_v22, %v769_v27  ;;  %v1558_v34 = vmul.f32 %v769_v27, %v769_v27  ;;  %v771_v36 = vpop.f32.mrb[35].mxu0  ;;  %v899_v37 = vpop.f32.mrb[35].mxu1 }
 0x13c   :  { %v2044_v38 = vpack.c.bf16 %v2611_v29, %v2609_v21 }
 0x13d   :  { %2088 = vst [vmem:[%s2809_s2 + $0x40] sm:$0xff] %v1964_v32   ;;  %v1621_v39 = vadd.f32 %v1620_v30, %v1558_v34 }
 0x13e   :  { %2104 = vst [vmem:[%s2809_s2 + $0xc0] sm:$0xff] %v2044_v38  }
 0x140   :  { %v774_v40 = vpop.f32.mrb[36].mxu0  ;;  %v2621_v42 = vpop.f32.mrb[36].mxu1 }
 0x141   :  { %v1489_v43 = vadd.f32 %v1488_v33, %v774_v40  ;;  %v1559_v44 = vmul.f32 %v774_v40, %v774_v40  ;;  %v776_v45 = vpop.f32.mrb[37].mxu0  ;;  %v904_v48 = vpop.f32.mrb[37].mxu1 }
 0x142   :  { %v777_v49 = vpop.f32.mrb[38].mxu0  ;;  %v2623_v50 = vpop.f32.mrb[38].mxu1 }
 0x143   :  { %v1622_v51 = vadd.f32 %v1621_v39, %v1559_v44  ;;  %v1969_v52 = vpack.c.bf16 %v777_v49, %v774_v40  ;;  %v1490_v54 = vadd.f32 %v1489_v43, %v777_v49  ;;  %v1560_v55 = vmul.f32 %v777_v49, %v777_v49  ;;  %v779_v56 = vpop.f32.mrb[39].mxu0  ;;  %v907_v58 = vpop.f32.mrb[39].mxu1 }
 0x144   :  { %v2049_v59 = vpack.c.bf16 %v2623_v50, %v2621_v42 }
 0x145   :  { %2089 = vst [vmem:[%s2809_s2 + $0x48] sm:$0xff] %v1969_v52   ;;  %v1623_v60 = vadd.f32 %v1622_v51, %v1560_v55 }
 0x146   :  { %2105 = vst [vmem:[%s2809_s2 + $0xc8] sm:$0xff] %v2049_v59  }
 0x148   :  { %v782_v61 = vpop.f32.mrb[40].mxu0  ;;  %v2633_v62 = vpop.f32.mrb[40].mxu1 }
 0x149   :  { %v1491_v0 = vadd.f32 %v1490_v54, %v782_v61  ;;  %v1561_v2 = vmul.f32 %v782_v61, %v782_v61  ;;  %v784_v3 = vpop.f32.mrb[41].mxu0  ;;  %v912_v4 = vpop.f32.mrb[41].mxu1 }
 0x14a   :  { %v785_v5 = vpop.f32.mrb[42].mxu0  ;;  %v2635_v6 = vpop.f32.mrb[42].mxu1 }
 0x14b   :  { %v1624_v8 = vadd.f32 %v1623_v60, %v1561_v2  ;;  %v1974_v10 = vpack.c.bf16 %v785_v5, %v782_v61  ;;  %v1492_v12 = vadd.f32 %v1491_v0, %v785_v5  ;;  %v1562_v13 = vmul.f32 %v785_v5, %v785_v5  ;;  %v787_v14 = vpop.f32.mrb[43].mxu0  ;;  %v915_v15 = vpop.f32.mrb[43].mxu1 }
 0x14c   :  { %v2054_v18 = vpack.c.bf16 %v2635_v6, %v2633_v62 }
 0x14d   :  { %2090 = vst [vmem:[%s2809_s2 + $0x50] sm:$0xff] %v1974_v10   ;;  %v1625_v19 = vadd.f32 %v1624_v8, %v1562_v13 }
 0x14e   :  { %2106 = vst [vmem:[%s2809_s2 + $0xd0] sm:$0xff] %v2054_v18  }
 0x150   :  { %v790_v20 = vpop.f32.mrb[44].mxu0  ;;  %v2645_v22 = vpop.f32.mrb[44].mxu1 }
 0x151   :  { %v1493_v23 = vadd.f32 %v1492_v12, %v790_v20  ;;  %v1563_v24 = vmul.f32 %v790_v20, %v790_v20  ;;  %v792_v26 = vpop.f32.mrb[45].mxu0  ;;  %v920_v27 = vpop.f32.mrb[45].mxu1 }
 0x152   :  { %v793_v30 = vpop.f32.mrb[46].mxu0  ;;  %v2647_v32 = vpop.f32.mrb[46].mxu1 }
 0x153   :  { %v1626_v33 = vadd.f32 %v1625_v19, %v1563_v24  ;;  %v1979_v34 = vpack.c.bf16 %v793_v30, %v790_v20  ;;  %v1494_v36 = vadd.f32 %v1493_v23, %v793_v30  ;;  %v1564_v37 = vmul.f32 %v793_v30, %v793_v30  ;;  %v795_v38 = vpop.f32.mrb[47].mxu0  ;;  %v923_v39 = vpop.f32.mrb[47].mxu1 }
 0x154   :  { %v2059_v40 = vpack.c.bf16 %v2647_v32, %v2645_v22 }
 0x155   :  { %2091 = vst [vmem:[%s2809_s2 + $0x58] sm:$0xff] %v1979_v34   ;;  %v1627_v43 = vadd.f32 %v1626_v33, %v1564_v37 }
 0x156   :  { %2107 = vst [vmem:[%s2809_s2 + $0xd8] sm:$0xff] %v2059_v40  }
 0x158   :  { %v798_v44 = vpop.f32.mrb[48].mxu0  ;;  %v2657_v45 = vpop.f32.mrb[48].mxu1 }
 0x159   :  { %v1495_v48 = vadd.f32 %v1494_v36, %v798_v44  ;;  %v1565_v49 = vmul.f32 %v798_v44, %v798_v44  ;;  %v800_v51 = vpop.f32.mrb[49].mxu0  ;;  %v928_v52 = vpop.f32.mrb[49].mxu1 }
 0x15a   :  { %v801_v54 = vpop.f32.mrb[50].mxu0  ;;  %v2659_v55 = vpop.f32.mrb[50].mxu1 }
 0x15b   :  { %v1628_v56 = vadd.f32 %v1627_v43, %v1565_v49  ;;  %v1984_v58 = vpack.c.bf16 %v801_v54, %v798_v44  ;;  %v1496_v59 = vadd.f32 %v1495_v48, %v801_v54  ;;  %v1566_v60 = vmul.f32 %v801_v54, %v801_v54  ;;  %v803_v61 = vpop.f32.mrb[51].mxu0  ;;  %v931_v0 = vpop.f32.mrb[51].mxu1 }
 0x15c   :  { %v2064_v2 = vpack.c.bf16 %v2659_v55, %v2657_v45 }
 0x15d   :  { %2092 = vst [vmem:[%s2809_s2 + $0x60] sm:$0xff] %v1984_v58   ;;  %v1629_v3 = vadd.f32 %v1628_v56, %v1566_v60 }
 0x15e   :  { %2108 = vst [vmem:[%s2809_s2 + $0xe0] sm:$0xff] %v2064_v2  }
 0x160   :  { %v806_v4 = vpop.f32.mrb[52].mxu0  ;;  %v2669_v5 = vpop.f32.mrb[52].mxu1 }
 0x161   :  { %v1497_v8 = vadd.f32 %v1496_v59, %v806_v4  ;;  %v1567_v10 = vmul.f32 %v806_v4, %v806_v4  ;;  %v808_v12 = vpop.f32.mrb[53].mxu0  ;;  %v936_v13 = vpop.f32.mrb[53].mxu1 }
 0x162   :  { %v809_v14 = vpop.f32.mrb[54].mxu0  ;;  %v2671_v15 = vpop.f32.mrb[54].mxu1 }
 0x163   :  { %v1630_v18 = vadd.f32 %v1629_v3, %v1567_v10  ;;  %v1989_v19 = vpack.c.bf16 %v809_v14, %v806_v4  ;;  %v1498_v20 = vadd.f32 %v1497_v8, %v809_v14  ;;  %v1568_v23 = vmul.f32 %v809_v14, %v809_v14  ;;  %v811_v24 = vpop.f32.mrb[55].mxu0  ;;  %v939_v26 = vpop.f32.mrb[55].mxu1 }
 0x164   :  { %v2069_v27 = vpack.c.bf16 %v2671_v15, %v2669_v5 }
 0x165   :  { %2093 = vst [vmem:[%s2809_s2 + $0x68] sm:$0xff] %v1989_v19   ;;  %v1631_v30 = vadd.f32 %v1630_v18, %v1568_v23  ;;  %v1573_v23 = vmul.f32 %v2513_v11, %v2513_v11 }
 0x166   :  { %2109 = vst [vmem:[%s2809_s2 + $0xe8] sm:$0xff] %v2069_v27   ;;  %v1574_v27 = vmul.f32 %v2515_v16, %v2515_v16 }
 0x168   :  { %v814_v33 = vpop.f32.mrb[56].mxu0  ;;  %v2681_v34 = vpop.f32.mrb[56].mxu1 }
 0x169   :  { %v1499_v36 = vadd.f32 %v1498_v20, %v814_v33  ;;  %v1569_v37 = vmul.f32 %v814_v33, %v814_v33  ;;  %v816_v38 = vpop.f32.mrb[57].mxu0  ;;  %v944_v39 = vpop.f32.mrb[57].mxu1 }
 0x16a   :  { %v817_v40 = vpop.f32.mrb[58].mxu0  ;;  %v2683_v43 = vpop.f32.mrb[58].mxu1 }
 0x16b   :  { %v1632_v44 = vadd.f32 %v1631_v30, %v1569_v37  ;;  %v1994_v48 = vpack.c.bf16 %v817_v40, %v814_v33  ;;  %v1500_v49 = vadd.f32 %v1499_v36, %v817_v40  ;;  %v1570_v51 = vmul.f32 %v817_v40, %v817_v40  ;;  %v819_v52 = vpop.f32.mrb[59].mxu0  ;;  %v947_v54 = vpop.f32.mrb[59].mxu1 }
 0x16c   :  { %v2074_v56 = vpack.c.bf16 %v2683_v43, %v2681_v34  ;;  %v1575_v36 = vmul.f32 %v2525_v25, %v2525_v25 }
 0x16d   :  { %2094 = vst [vmem:[%s2809_s2 + $0x70] sm:$0xff] %v1994_v48   ;;  %v1633_v58 = vadd.f32 %v1632_v44, %v1570_v51  ;;  %v1577_v44 = vmul.f32 %v2537_v41, %v2537_v41 }
 0x16e   :  { %2110 = vst [vmem:[%s2809_s2 + $0xf0] sm:$0xff] %v2074_v56  }
 0x170   :  { %v822_v59 = vpop.f32.mrb[60].mxu0  ;;  %v2693_v60 = vpop.f32.mrb[60].mxu1 }
 0x171   :  { %v1501_v61 = vadd.f32 %v1500_v49, %v822_v59  ;;  %v1571_v0 = vmul.f32 %v822_v59, %v822_v59  ;;  %v824_v2 = vpop.f32.mrb[61].mxu0  ;;  %v952_v3 = vpop.f32.mrb[61].mxu1 }
 0x172   :  { %v825_v4 = vpop.f32.mrb[62].mxu0  ;;  %v2695_v8 = vpop.f32.mrb[62].mxu1 }
 0x173   :  { %v1634_v10 = vadd.f32 %v1633_v58, %v1571_v0  ;;  %v1999_v12 = vpack.c.bf16 %v825_v4, %v822_v59  ;;  %v1502_v13 = vadd.f32 %v1501_v61, %v825_v4  ;;  %v1572_v14 = vmul.f32 %v825_v4, %v825_v4  ;;  %v827_v18 = vpop.f32.mrb[63].mxu0  ;;  %v955_v19 = vpop.f32.mrb[63].mxu1 }
 0x174   :  { %v2079_v20 = vpack.c.bf16 %v2695_v8, %v2693_v60 }
 0x175   :  { %2095 = vst [vmem:[%s2809_s2 + $0x78] sm:$0xff] %v1999_v12   ;;  %v1503_v24 = vadd.f32 %v1502_v13, %v2513_v11  ;;  %v1635_v26 = vadd.f32 %v1634_v10, %v1572_v14  ;;  %v1576_v11 = vmul.f32 %v2527_v31, %v2527_v31 }
 0x176   :  { %2111 = vst [vmem:[%s2809_s2 + $0xf8] sm:$0xff] %v2079_v20  }
 0x177   :  { %v1504_v30 = vadd.f32 %v1503_v24, %v2515_v16  ;;  %v1636_v33 = vadd.f32 %v1635_v26, %v1573_v23  ;;  %v1578_v16 = vmul.f32 %v2539_v47, %v2539_v47 }
 0x179   :  { %v1505_v37 = vadd.f32 %v1504_v30, %v2525_v25  ;;  %v1637_v38 = vadd.f32 %v1636_v33, %v1574_v27  ;;  %v1579_v25 = vmul.f32 %v2549_v57, %v2549_v57  ;;  %v1589_v30 = vmul.f32 %v2609_v21, %v2609_v21 }
 0x17b   :  { %v1506_v39 = vadd.f32 %v1505_v37, %v2527_v31  ;;  %v1638_v40 = vadd.f32 %v1637_v38, %v1575_v36  ;;  %v1580_v31 = vmul.f32 %v2551_v63, %v2551_v63  ;;  %v1590_v37 = vmul.f32 %v2611_v29, %v2611_v29 }
 0x17d   :  { %v1507_v48 = vadd.f32 %v1506_v39, %v2537_v41  ;;  %v1639_v49 = vadd.f32 %v1638_v40, %v1576_v11  ;;  %v1581_v41 = vmul.f32 %v2561_v9, %v2561_v9  ;;  %v1591_v11 = vmul.f32 %v2621_v42, %v2621_v42 }
 0x17e   :  { %v1592_v40 = vmul.f32 %v2623_v50, %v2623_v50 }
 0x17f   :  { %v1508_v51 = vadd.f32 %v1507_v48, %v2539_v47  ;;  %v1640_v52 = vadd.f32 %v1639_v49, %v1577_v44  ;;  %v1582_v47 = vmul.f32 %v2563_v17, %v2563_v17  ;;  %v1593_v48 = vmul.f32 %v2633_v62, %v2633_v62 }
 0x181   :  { %v1509_v54 = vadd.f32 %v1508_v51, %v2549_v57  ;;  %v1641_v56 = vadd.f32 %v1640_v52, %v1578_v16  ;;  %v1583_v57 = vmul.f32 %v2573_v28, %v2573_v28  ;;  %v1594_v16 = vmul.f32 %v2635_v6, %v2635_v6 }
 0x182   :  { %v1595_v52 = vmul.f32 %v2645_v22, %v2645_v22 }
 0x183   :  { %v1510_v58 = vadd.f32 %v1509_v54, %v2551_v63  ;;  %v1642_v59 = vadd.f32 %v1641_v56, %v1579_v25  ;;  %v1584_v63 = vmul.f32 %v2575_v35, %v2575_v35  ;;  %v1596_v54 = vmul.f32 %v2647_v32, %v2647_v32 }
 0x185   :  { %v1643_v61 = vadd.f32 %v1642_v59, %v1580_v31  ;;  %v1511_v0 = vadd.f32 %v1510_v58, %v2561_v9  ;;  %v1585_v9 = vmul.f32 %v2585_v46, %v2585_v46  ;;  %v1597_v31 = vmul.f32 %v2657_v45, %v2657_v45 }
 0x186   :  { %v1598_v59 = vmul.f32 %v2659_v55, %v2659_v55 }
 0x187   :  { %v1512_v2 = vadd.f32 %v1511_v0, %v2563_v17  ;;  %v1644_v3 = vadd.f32 %v1643_v61, %v1581_v41  ;;  %v1586_v17 = vmul.f32 %v2587_v53, %v2587_v53  ;;  %v1599_v61 = vmul.f32 %v2669_v5, %v2669_v5 }
 0x189   :  { %v1513_v4 = vadd.f32 %v1512_v2, %v2573_v28  ;;  %v1645_v10 = vadd.f32 %v1644_v3, %v1582_v47  ;;  %v1587_v28 = vmul.f32 %v2597_v1, %v2597_v1  ;;  %v1600_v47 = vmul.f32 %v2671_v15, %v2671_v15 }
 0x18a   :  { %v1601_v3 = vmul.f32 %v2681_v34, %v2681_v34 }
 0x18b   :  { %v1514_v12 = vadd.f32 %v1513_v4, %v2575_v35  ;;  %v1646_v13 = vadd.f32 %v1645_v10, %v1583_v57  ;;  %v1588_v35 = vmul.f32 %v2599_v7, %v2599_v7  ;;  %v1602_v4 = vmul.f32 %v2683_v43, %v2683_v43 }
 0x18d   :  { %v1515_v14 = vadd.f32 %v1514_v12, %v2585_v46  ;;  %v1647_v18 = vadd.f32 %v1646_v13, %v1584_v63  ;;  %v1604_v13 = vmul.f32 %v2695_v8, %v2695_v8 }
 0x18f   :  { %v1516_v19 = vadd.f32 %v1515_v14, %v2587_v53  ;;  %v1648_v20 = vadd.f32 %v1647_v18, %v1585_v9 }
 0x191   :  { %v1517_v23 = vadd.f32 %v1516_v19, %v2597_v1  ;;  %v1649_v24 = vadd.f32 %v1648_v20, %v1586_v17 }
 0x193   :  { %v1518_v26 = vadd.f32 %v1517_v23, %v2599_v7  ;;  %v1650_v27 = vadd.f32 %v1649_v24, %v1587_v28 }
 0x195   :  { %v1519_v46 = vadd.f32 %v1518_v26, %v2609_v21  ;;  %v1651_v33 = vadd.f32 %v1650_v27, %v1588_v35 }
 0x197   :  { %v1652_v53 = vadd.f32 %v1651_v33, %v1589_v30  ;;  %v1520_v36 = vadd.f32 %v1519_v46, %v2611_v29 }
 0x199   :  { %v1653_v1 = vadd.f32 %v1652_v53, %v1590_v37  ;;  %v1521_v38 = vadd.f32 %v1520_v36, %v2621_v42 }
 0x19b   :  { %v1654_v7 = vadd.f32 %v1653_v1, %v1591_v11  ;;  %v1522_v39 = vadd.f32 %v1521_v38, %v2623_v50 }
 0x19d   :  { %v1655_v21 = vadd.f32 %v1654_v7, %v1592_v40  ;;  %v1523_v44 = vadd.f32 %v1522_v39, %v2633_v62 }
 0x19f   :  { %v1656_v49 = vadd.f32 %v1655_v21, %v1593_v48  ;;  %v1524_v29 = vadd.f32 %v1523_v44, %v2635_v6 }
 0x1a1   :  { %v1657_v51 = vadd.f32 %v1656_v49, %v1594_v16  ;;  %v1525_v42 = vadd.f32 %v1524_v29, %v2645_v22 }
 0x1a3   :  { %v1658_v25 = vadd.f32 %v1657_v51, %v1595_v52  ;;  %v1526_v50 = vadd.f32 %v1525_v42, %v2647_v32 }
 0x1a5   :  { %v1659_v56 = vadd.f32 %v1658_v25, %v1596_v54  ;;  %v1527_v62 = vadd.f32 %v1526_v50, %v2657_v45 }
 0x1a7   :  { %v1660_v58 = vadd.f32 %v1659_v56, %v1597_v31  ;;  %v1528_v6 = vadd.f32 %v1527_v62, %v2659_v55 }
 0x1a9   :  { %v1661_v41 = vadd.f32 %v1660_v58, %v1598_v59  ;;  %v1529_v22 = vadd.f32 %v1528_v6, %v2669_v5  ;;  %v1603_v5 = vmul.f32 %v2693_v60, %v2693_v60 }
 0x1ab   :  { %v1662_v0 = vadd.f32 %v1661_v41, %v1599_v61  ;;  %v1530_v32 = vadd.f32 %v1529_v22, %v2671_v15 }
 0x1ad   :  { %v1663_v2 = vadd.f32 %v1662_v0, %v1600_v47  ;;  %v1531_v45 = vadd.f32 %v1530_v32, %v2681_v34 }
 0x1af   :  { %v1664_v57 = vadd.f32 %v1663_v2, %v1601_v3  ;;  %v1532_v55 = vadd.f32 %v1531_v45, %v2683_v43 }
 0x1b1   :  { %v1665_v10 = vadd.f32 %v1664_v57, %v1602_v4  ;;  %v1533_v63 = vadd.f32 %v1532_v55, %v2693_v60 }
 0x1b3   :  { %v1666_v12 = vadd.f32 %v1665_v10, %v1603_v5  ;;  %v1534_v15 = vadd.f32 %v1533_v63, %v2695_v8 }
 0x1b5   :  { %v1535_v9 = vrot.slane %v1534_v15, 4  ;;  %v1667_v34 = vadd.f32 %v1666_v12, %v1604_v13 }
 0x1b7   :  { %v1536_v14 = vadd.f32 %v1535_v9, %v1534_v15  ;;  %v1668_v18 = vrot.slane %v1667_v34, 4 }
 0x1b9   :  { %v1537_v17 = vrot.slane %v1536_v14, 2  ;;  %v1669_v19 = vadd.f32 %v1668_v18, %v1667_v34 }
 0x1bb   :  { %v1538_v20 = vadd.f32 %v1537_v17, %v1536_v14  ;;  %v1670_v43 = vrot.slane %v1669_v19, 2 }
 0x1bd   :  { %v1539_v28 = vrot.slane %v1538_v20, 1  ;;  %v1671_v23 = vadd.f32 %v1670_v43, %v1669_v19 }
 0x1bf   :  { %v1540_v24 = vadd.f32 %v1539_v28, %v1538_v20  ;;  %v1672_v35 = vrot.slane %v1671_v23, 1 }
 0x1c1   :  { %v1673_v26 = vadd.f32 %v1672_v35, %v1671_v23  ;;  %1674 = vst [vmem:[%s2810_s3] sm:$0xff] %v1540_v24 }
 0x1c3   :  { %1675 = vst [vmem:[%s2811_s4] sm:$0xff] %v1673_v26 }

// kernel: _lambda_.13
= control target key start
LH: loop header
LB: loop body
LE: loop exit
PB: predicated region body
PF: predicated region fallthrough
CT: control target
= control target key end

     0   :  { %v700_v0 = vmov 0   ;;  %vm211_vm0 = vcmask 130048   ;;  %s851_s1 = inlined_call_operand.vmem [shape: bf16[144,128], index: 1, kind: input, shape index: {}]   ;;  %s852_s0 = inlined_call_operand.vmem [shape: bf16[128,144], index: 0, kind: input, shape index: {}]   ;;  %s853_s2 = inlined_call_operand.vmem [shape: bf16[128,128], index: 2, kind: output, shape index: {0}]   ;;  %s854_s3 = inlined_call_operand.vmem [shape: f32[8,128], index: 3, kind: output, shape index: {1}]   ;;  %s855_s4 = inlined_call_operand.vmem [shape: f32[8,128], index: 4, kind: output, shape index: {2}]  }
   0x1   :  { %236 = vmatprep.subr.bf16.mxu0 %v700_v0  ;;  %v667_v1 = vld [vmem:[%s851_s1] sm:$0xff]   ;;  %648 = vmatprep.subr.bf16.mxu1 %v700_v0  ;;  %v668_v2 = vld [vmem:[%s851_s1 + $0x8] sm:$0xff]   ;;  %v669_v3 = vld [vmem:[%s851_s1 + $0x10] sm:$0xff]  }
   0x2   :  { %237 = vmatpush1.bf16.msra.mxu0 %v667_v1  ;;  %657 = vmatpush1.bf16.msra.mxu1 %v667_v1  ;;  %v670_v4 = vld [vmem:[%s851_s1 + $0x18] sm:$0xff]   ;;  %v678_v5 = vld [vmem:[%s852_s0 + $0x4] ss:$8 sps:$4 sm:$0xff]   ;;  %v673_v9 = vld [vmem:[%s851_s1 + $0x30] sm:$0xff]  }
   0x3   :  { %238 = vmatprep.subr.bf16.mxu0 %v700_v0  ;;  %649 = vmatprep.subr.bf16.mxu1 %v700_v0  ;;  %v684_v6 = vld [vmem:[%s852_s0 + $0x44] ss:$8 sps:$4 sm:$0xff]   ;;  %v674_v10 = vld [vmem:[%s851_s1 + $0x38] sm:$0xff]   ;;  %v676_v12 = vld [vmem:[%s852_s0] ss:$8 sps:$4 sm:$0xff]  }
   0x4   :  { %561 = vmatprep.mubr.msk.bf16.mxu0 %vm211_vm0, %v678_v5  ;;  %v671_v7 = vld [vmem:[%s851_s1 + $0x20] sm:$0xff]   ;;  %565 = vmatprep.mubr.msk.bf16.mxu1 %vm211_vm0, %v684_v6  ;;  %v672_v8 = vld [vmem:[%s851_s1 + $0x28] sm:$0xff]   ;;  %v679_v14 = vld [vmem:[%s852_s0 + $0x14] ss:$8 sps:$4 sm:$0xff]  }
   0x5   :  { %v675_v11 = vld [vmem:[%s851_s1 + $0x40] sm:$0xff]   ;;  %v688_v15 = vld [vmem:[%s852_s0 + $0x54] ss:$8 sps:$4 sm:$0xff]   ;;  %v681_v16 = vld [vmem:[%s852_s0 + $0x10] ss:$8 sps:$4 sm:$0xff]  }
   0x6   :  { %239 = vmatpush1.bf16.msra.mxu0 %v668_v2  ;;  %658 = vmatpush1.bf16.msra.mxu1 %v668_v2  ;;  %v682_v13 = vld [vmem:[%s852_s0 + $0x40] ss:$8 sps:$4 sm:$0xff]   ;;  %v690_v17 = vld [vmem:[%s852_s0 + $0x50] ss:$8 sps:$4 sm:$0xff]   ;;  %v685_v18 = vld [vmem:[%s852_s0 + $0x24] ss:$8 sps:$4 sm:$0xff]  }
   0x7   :  { %240 = vmatprep.subr.bf16.mxu0 %v700_v0  ;;  %650 = vmatprep.subr.bf16.mxu1 %v700_v0  ;;  %v694_v19 = vld [vmem:[%s852_s0 + $0x64] ss:$8 sps:$4 sm:$0xff]   ;;  %v687_v20 = vld [vmem:[%s852_s0 + $0x20] ss:$8 sps:$4 sm:$0xff]   ;;  %v691_v22 = vld [vmem:[%s852_s0 + $0x34] ss:$8 sps:$4 sm:$0xff]  }
   0x8   :  { %v696_v21 = vld [vmem:[%s852_s0 + $0x60] ss:$8 sps:$4 sm:$0xff]   ;;  %v697_v23 = vld [vmem:[%s852_s0 + $0x74] ss:$8 sps:$4 sm:$0xff]   ;;  %v693_v24 = vld [vmem:[%s852_s0 + $0x30] ss:$8 sps:$4 sm:$0xff]  }
   0x9   :  { %v699_v25 = vld [vmem:[%s852_s0 + $0x70] ss:$8 sps:$4 sm:$0xff]  }
   0xa   :  { %241 = vmatpush1.bf16.msra.mxu0 %v669_v3  ;;  %659 = vmatpush1.bf16.msra.mxu1 %v669_v3 }
   0xb   :  { %242 = vmatprep.subr.bf16.mxu0 %v700_v0  ;;  %651 = vmatprep.subr.bf16.mxu1 %v700_v0 }
   0xe   :  { %243 = vmatpush1.bf16.msra.mxu0 %v670_v4  ;;  %660 = vmatpush1.bf16.msra.mxu1 %v670_v4 }
   0xf   :  { %244 = vmatprep.subr.bf16.mxu0 %v700_v0  ;;  %652 = vmatprep.subr.bf16.mxu1 %v700_v0 }
  0x12   :  { %245 = vmatpush1.bf16.msra.mxu0 %v671_v7  ;;  %661 = vmatpush1.bf16.msra.mxu1 %v671_v7 }
  0x13   :  { %246 = vmatprep.subr.bf16.mxu0 %v700_v0  ;;  %653 = vmatprep.subr.bf16.mxu1 %v700_v0 }
  0x16   :  { %247 = vmatpush1.bf16.msra.mxu0 %v672_v8  ;;  %662 = vmatpush1.bf16.msra.mxu1 %v672_v8 }
  0x17   :  { %248 = vmatprep.subr.bf16.mxu0 %v700_v0  ;;  %654 = vmatprep.subr.bf16.mxu1 %v700_v0 }
  0x1a   :  { %249 = vmatpush1.bf16.msra.mxu0 %v673_v9  ;;  %663 = vmatpush1.bf16.msra.mxu1 %v673_v9 }
  0x1b   :  { %250 = vmatprep.subr.bf16.mxu0 %v700_v0  ;;  %655 = vmatprep.subr.bf16.mxu1 %v700_v0 }
  0x1e   :  { %251 = vmatpush1.bf16.msra.mxu0 %v674_v10  ;;  %664 = vmatpush1.bf16.msra.mxu1 %v674_v10 }
  0x1f   :  { %252 = vmatprep.subr.bf16.mxu0 %v700_v0  ;;  %656 = vmatprep.subr.bf16.mxu1 %v700_v0 }
  0x22   :  { %253 = vmatpush1.bf16.msra.mxu0 %v675_v11  ;;  %665 = vmatpush1.bf16.msra.mxu1 %v675_v11 }
  0x25   :  { %269 = vmatmul.mubr.bf16.vlgmr.msra.gmra.mrb[0].mxu0 %v676_v12  ;;  %301 = vmatmul.mubr.bf16.vlgmr.msra.gmra.mrb[0].mxu1 %v682_v13 }
  0x26   :  { %562 = vmatprep.mubr.msk.bf16.mxu0 %vm211_vm0, %v679_v14  ;;  %566 = vmatprep.mubr.msk.bf16.mxu1 %vm211_vm0, %v688_v15 }
  0x2d   :  { %277 = vmatmul.mubr.bf16.gmra.mrb[4].mxu0 %v681_v16  ;;  %309 = vmatmul.mubr.bf16.gmra.mrb[4].mxu1 %v690_v17 }
  0x2e   :  { %563 = vmatprep.mubr.msk.bf16.mxu0 %vm211_vm0, %v685_v18  ;;  %567 = vmatprep.mubr.msk.bf16.mxu1 %vm211_vm0, %v694_v19 }
  0x35   :  { %285 = vmatmul.mubr.bf16.gmra.mrb[8].mxu0 %v687_v20  ;;  %317 = vmatmul.mubr.bf16.gmra.mrb[8].mxu1 %v696_v21 }
  0x36   :  { %564 = vmatprep.mubr.msk.bf16.mxu0 %vm211_vm0, %v691_v22  ;;  %568 = vmatprep.mubr.msk.bf16.mxu1 %vm211_vm0, %v697_v23 }
  0x3d   :  { %293 = vmatmul.mubr.bf16.gmra.mrb[12].mxu0 %v693_v24  ;;  %325 = vmatmul.mubr.bf16.gmra.mrb[12].mxu1 %v699_v25 }
  0xf8   :  { %v270_v26 = vpop.f32.mrb[0].mxu0  ;;  %v809_v27 = vpop.f32.mrb[0].mxu1 }
  0xf9   :  { %v272_v28 = vpop.f32.mrb[1].mxu0  ;;  %v304_v29 = vpop.f32.mrb[1].mxu1  ;;  %v485_v30 = vmul.f32 %v270_v26, %v270_v26  ;;  %v493_v23 = vmul.f32 %v809_v27, %v809_v27 }
  0xfa   :  { %v273_v31 = vpop.f32.mrb[2].mxu0  ;;  %v811_v32 = vpop.f32.mrb[2].mxu1 }
  0xfb   :  { %v604_v33 = vpack.c.bf16 %v273_v31, %v270_v26  ;;  %v464_v34 = vadd.f32 %v273_v31, %v270_v26  ;;  %v486_v35 = vmul.f32 %v273_v31, %v273_v31  ;;  %v275_v36 = vpop.f32.mrb[3].mxu0  ;;  %v624_v37 = vpack.c.bf16 %v811_v32, %v809_v27  ;;  %v307_v38 = vpop.f32.mrb[3].mxu1 }
  0xfc   :  { %v494_v26 = vmul.f32 %v811_v32, %v811_v32 }
  0xfd   :  { %605 = vst [vmem:[%s853_s2] sm:$0xff] %v604_v33   ;;  %v501_v39 = vadd.f32 %v486_v35, %v485_v30  ;;  %644 = vst [vmem:[%s853_s2 + $0x20] sm:$0xff] %v624_v37  }
 0x100   :  { %v278_v40 = vpop.f32.mrb[4].mxu0  ;;  %v310_v41 = vpop.f32.mrb[4].mxu1 }
 0x101   :  { %v465_v42 = vadd.f32 %v464_v34, %v278_v40  ;;  %v487_v43 = vmul.f32 %v278_v40, %v278_v40  ;;  %v280_v44 = vpop.f32.mrb[5].mxu0  ;;  %v312_v45 = vpop.f32.mrb[5].mxu1  ;;  %v495_v30 = vmul.f32 %v310_v41, %v310_v41 }
 0x102   :  { %v281_v46 = vpop.f32.mrb[6].mxu0  ;;  %v313_v47 = vpop.f32.mrb[6].mxu1 }
 0x103   :  { %v502_v48 = vadd.f32 %v501_v39, %v487_v43  ;;  %v609_v49 = vpack.c.bf16 %v281_v46, %v278_v40  ;;  %v466_v50 = vadd.f32 %v465_v42, %v281_v46  ;;  %v488_v51 = vmul.f32 %v281_v46, %v281_v46  ;;  %v283_v52 = vpop.f32.mrb[7].mxu0  ;;  %v315_v53 = vpop.f32.mrb[7].mxu1 }
 0x104   :  { %v629_v54 = vpack.c.bf16 %v313_v47, %v310_v41  ;;  %v496_v34 = vmul.f32 %v313_v47, %v313_v47 }
 0x105   :  { %641 = vst [vmem:[%s853_s2 + $0x8] sm:$0xff] %v609_v49   ;;  %v503_v55 = vadd.f32 %v502_v48, %v488_v51 }
 0x106   :  { %645 = vst [vmem:[%s853_s2 + $0x28] sm:$0xff] %v629_v54  }
 0x108   :  { %v286_v56 = vpop.f32.mrb[8].mxu0  ;;  %v318_v57 = vpop.f32.mrb[8].mxu1 }
 0x109   :  { %v467_v58 = vadd.f32 %v466_v50, %v286_v56  ;;  %v489_v59 = vmul.f32 %v286_v56, %v286_v56  ;;  %v288_v60 = vpop.f32.mrb[9].mxu0  ;;  %v320_v61 = vpop.f32.mrb[9].mxu1  ;;  %v497_v38 = vmul.f32 %v318_v57, %v318_v57 }
 0x10a   :  { %v289_v62 = vpop.f32.mrb[10].mxu0  ;;  %v321_v63 = vpop.f32.mrb[10].mxu1 }
 0x10b   :  { %v504_v0 = vadd.f32 %v503_v55, %v489_v59  ;;  %v614_v1 = vpack.c.bf16 %v289_v62, %v286_v56  ;;  %v468_v2 = vadd.f32 %v467_v58, %v289_v62  ;;  %v490_v3 = vmul.f32 %v289_v62, %v289_v62  ;;  %v291_v4 = vpop.f32.mrb[11].mxu0  ;;  %v323_v5 = vpop.f32.mrb[11].mxu1 }
 0x10c   :  { %v634_v6 = vpack.c.bf16 %v321_v63, %v318_v57  ;;  %v498_v42 = vmul.f32 %v321_v63, %v321_v63 }
 0x10d   :  { %642 = vst [vmem:[%s853_s2 + $0x10] sm:$0xff] %v614_v1   ;;  %v505_v7 = vadd.f32 %v504_v0, %v490_v3 }
 0x10e   :  { %646 = vst [vmem:[%s853_s2 + $0x30] sm:$0xff] %v634_v6  }
 0x110   :  { %v294_v8 = vpop.f32.mrb[12].mxu0  ;;  %v326_v9 = vpop.f32.mrb[12].mxu1 }
 0x111   :  { %v469_v10 = vadd.f32 %v468_v2, %v294_v8  ;;  %v491_v11 = vmul.f32 %v294_v8, %v294_v8  ;;  %v296_v12 = vpop.f32.mrb[13].mxu0  ;;  %v328_v13 = vpop.f32.mrb[13].mxu1  ;;  %v499_v43 = vmul.f32 %v326_v9, %v326_v9 }
 0x112   :  { %v297_v14 = vpop.f32.mrb[14].mxu0  ;;  %v329_v15 = vpop.f32.mrb[14].mxu1 }
 0x113   :  { %v506_v16 = vadd.f32 %v505_v7, %v491_v11  ;;  %v619_v17 = vpack.c.bf16 %v297_v14, %v294_v8  ;;  %v470_v18 = vadd.f32 %v469_v10, %v297_v14  ;;  %v492_v19 = vmul.f32 %v297_v14, %v297_v14  ;;  %v299_v20 = vpop.f32.mrb[15].mxu0  ;;  %v331_v21 = vpop.f32.mrb[15].mxu1 }
 0x114   :  { %v639_v22 = vpack.c.bf16 %v329_v15, %v326_v9  ;;  %v500_v49 = vmul.f32 %v329_v15, %v329_v15 }
 0x115   :  { %643 = vst [vmem:[%s853_s2 + $0x18] sm:$0xff] %v619_v17   ;;  %v471_v24 = vadd.f32 %v470_v18, %v809_v27  ;;  %v507_v25 = vadd.f32 %v506_v16, %v492_v19 }
 0x116   :  { %647 = vst [vmem:[%s853_s2 + $0x38] sm:$0xff] %v639_v22  }
 0x117   :  { %v472_v28 = vadd.f32 %v471_v24, %v811_v32  ;;  %v508_v29 = vadd.f32 %v507_v25, %v493_v23 }
 0x119   :  { %v509_v31 = vadd.f32 %v508_v29, %v494_v26  ;;  %v473_v33 = vadd.f32 %v472_v28, %v310_v41 }
 0x11b   :  { %v474_v35 = vadd.f32 %v473_v33, %v313_v47  ;;  %v510_v36 = vadd.f32 %v509_v31, %v495_v30 }
 0x11d   :  { %v475_v37 = vadd.f32 %v474_v35, %v318_v57  ;;  %v511_v27 = vadd.f32 %v510_v36, %v496_v34 }
 0x11f   :  { %v512_v39 = vadd.f32 %v511_v27, %v497_v38  ;;  %v476_v40 = vadd.f32 %v475_v37, %v321_v63 }
 0x121   :  { %v513_v44 = vadd.f32 %v512_v39, %v498_v42  ;;  %v477_v45 = vadd.f32 %v476_v40, %v326_v9 }
 0x123   :  { %v514_v46 = vadd.f32 %v513_v44, %v499_v43  ;;  %v478_v48 = vadd.f32 %v477_v45, %v329_v15 }
 0x125   :  { %v479_v32 = vrot.slane %v478_v48, 4  ;;  %v515_v50 = vadd.f32 %v514_v46, %v500_v49 }
 0x127   :  { %v480_v51 = vadd.f32 %v479_v32, %v478_v48  ;;  %v516_v52 = vrot.slane %v515_v50, 4 }
 0x129   :  { %v481_v41 = vrot.slane %v480_v51, 2  ;;  %v517_v53 = vadd.f32 %v516_v52, %v515_v50 }
 0x12b   :  { %v482_v47 = vadd.f32 %v481_v41, %v480_v51  ;;  %v518_v54 = vrot.slane %v517_v53, 2 }
 0x12d   :  { %v483_v55 = vrot.slane %v482_v47, 1  ;;  %v519_v56 = vadd.f32 %v518_v54, %v517_v53 }
 0x12f   :  { %v484_v57 = vadd.f32 %v483_v55, %v482_v47  ;;  %v520_v58 = vrot.slane %v519_v56, 1 }
 0x131   :  { %v521_v59 = vadd.f32 %v520_v58, %v519_v56  ;;  %522 = vst [vmem:[%s854_s3] sm:$0xff] %v484_v57 }
 0x133   :  { %523 = vst [vmem:[%s855_s4] sm:$0xff] %v521_v59 }

// kernel: _lambda_.14
= control target key start
LH: loop header
LB: loop body
LE: loop exit
PB: predicated region body
PF: predicated region fallthrough
CT: control target
= control target key end

     0   :  { %s422_s0 = inlined_call_operand.vmem [shape: bf16[128,128], index: 0, kind: input, shape index: {}]   ;;  %s423_s1 = inlined_call_operand.vmem [shape: f32[1,128], index: 1, kind: input, shape index: {}]   ;;  %s424_s2 = inlined_call_operand.vmem [shape: f32[1,128], index: 2, kind: input, shape index: {}]   ;;  %s425_s3 = inlined_call_operand.vmem [shape: bf16[128,128], index: 3, kind: output, shape index: {}]  }
   0x1   :  { %v227_v0 = vld [vmem:[%s422_s0] sm:$0xff]   ;;  %v298_v4 = vld [vmem:[%s422_s0 + $0x8] sm:$0xff]   ;;  %v299_v5 = vld [vmem:[%s422_s0 + $0x10] sm:$0xff]  }
   0x2   :  { %v338_v1 = vld [vmem:[%s423_s1] ss:$0 sm:$0xff]  ;;  %v228_v2 = vunpack.c.l.bf16 %v227_v0  ;;  %v229_v3 = vunpack.c.h.bf16 %v227_v0  ;;  %v300_v6 = vld [vmem:[%s422_s0 + $0x18] sm:$0xff]   ;;  %v232_v8 = vunpack.c.l.bf16 %v298_v4  ;;  %v233_v9 = vunpack.c.h.bf16 %v298_v4  ;;  %v302_v33 = vld [vmem:[%s422_s0 + $0x28] sm:$0xff]  }
   0x3   :  { %v352_v7 = vld [vmem:[%s424_s2] ss:$0 sm:$0xff]  ;;  %v236_v10 = vunpack.c.l.bf16 %v299_v5  ;;  %v237_v11 = vunpack.c.h.bf16 %v299_v5  ;;  %v240_v14 = vunpack.c.l.bf16 %v300_v6  ;;  %v241_v15 = vunpack.c.h.bf16 %v300_v6  ;;  %v303_v38 = vld [vmem:[%s422_s0 + $0x30] sm:$0xff]   ;;  %v304_v43 = vld [vmem:[%s422_s0 + $0x38] sm:$0xff]  }
   0x4   :  { %v53_v12 = vmul.f32 %v228_v2, %v338_v1  ;;  %v54_v13 = vmul.f32 %v229_v3, %v338_v1  ;;  %v55_v16 = vmul.f32 %v232_v8, %v338_v1  ;;  %v56_v17 = vmul.f32 %v233_v9, %v338_v1  ;;  %v301_v28 = vld [vmem:[%s422_s0 + $0x20] sm:$0xff]  }
   0x5   :  { %v57_v18 = vmul.f32 %v236_v10, %v338_v1  ;;  %v58_v19 = vmul.f32 %v237_v11, %v338_v1  ;;  %v59_v22 = vmul.f32 %v240_v14, %v338_v1  ;;  %v60_v23 = vmul.f32 %v241_v15, %v338_v1 }
   0x6   :  { %v76_v20 = vadd.f32 %v352_v7, %v53_v12  ;;  %v77_v21 = vadd.f32 %v352_v7, %v54_v13  ;;  %v78_v24 = vadd.f32 %v352_v7, %v55_v16  ;;  %v79_v25 = vadd.f32 %v352_v7, %v56_v17 }
   0x7   :  { %v80_v26 = vadd.f32 %v352_v7, %v57_v18  ;;  %v81_v27 = vadd.f32 %v352_v7, %v58_v19  ;;  %v82_v31 = vadd.f32 %v352_v7, %v59_v22  ;;  %v83_v32 = vadd.f32 %v352_v7, %v60_v23 }
   0x8   :  { %v92_v29 = vmax.f32 %v76_v20, 0.0  ;;  %v93_v30 = vmax.f32 %v77_v21, 0.0  ;;  %v94_v34 = vmax.f32 %v78_v24, 0.0  ;;  %v95_v35 = vmax.f32 %v79_v25, 0.0 }
   0x9   :  { %v96_v36 = vmax.f32 %v80_v26, 0.0  ;;  %v97_v37 = vmax.f32 %v81_v27, 0.0  ;;  %v98_v40 = vmax.f32 %v82_v31, 0.0  ;;  %v99_v41 = vmax.f32 %v83_v32, 0.0 }
   0xa   :  { %v261_v39 = vpack.c.bf16 %v93_v30, %v92_v29  ;;  %v244_v42 = vunpack.c.l.bf16 %v301_v28  ;;  %v266_v44 = vpack.c.bf16 %v95_v35, %v94_v34  ;;  %v245_v46 = vunpack.c.h.bf16 %v301_v28 }
   0xb   :  { %v271_v45 = vpack.c.bf16 %v97_v37, %v96_v36  ;;  %v248_v47 = vunpack.c.l.bf16 %v302_v33  ;;  %v276_v48 = vpack.c.bf16 %v99_v41, %v98_v40  ;;  %v249_v50 = vunpack.c.h.bf16 %v302_v33 }
   0xc   :  { %262 = vst [vmem:[%s425_s3] sm:$0xff] %v261_v39   ;;  %v61_v49 = vmul.f32 %v244_v42, %v338_v1  ;;  %v252_v51 = vunpack.c.l.bf16 %v303_v38  ;;  %305 = vst [vmem:[%s425_s3 + $0x8] sm:$0xff] %v266_v44   ;;  %v62_v52 = vmul.f32 %v245_v46, %v338_v1  ;;  %v253_v54 = vunpack.c.h.bf16 %v303_v38 }
   0xd   :  { %306 = vst [vmem:[%s425_s3 + $0x10] sm:$0xff] %v271_v45   ;;  %v63_v53 = vmul.f32 %v248_v47, %v338_v1  ;;  %v256_v55 = vunpack.c.l.bf16 %v304_v43  ;;  %307 = vst [vmem:[%s425_s3 + $0x18] sm:$0xff] %v276_v48   ;;  %v64_v57 = vmul.f32 %v249_v50, %v338_v1  ;;  %v257_v59 = vunpack.c.h.bf16 %v304_v43 }
   0xe   :  { %v84_v56 = vadd.f32 %v352_v7, %v61_v49  ;;  %v65_v58 = vmul.f32 %v252_v51, %v338_v1  ;;  %v85_v60 = vadd.f32 %v352_v7, %v62_v52  ;;  %v66_v62 = vmul.f32 %v253_v54, %v338_v1 }
   0xf   :  { %v86_v61 = vadd.f32 %v352_v7, %v63_v53  ;;  %v67_v63 = vmul.f32 %v256_v55, %v338_v1  ;;  %v87_v2 = vadd.f32 %v352_v7, %v64_v57  ;;  %v68_v4 = vmul.f32 %v257_v59, %v338_v1 }
  0x10   :  { %v100_v0 = vmax.f32 %v84_v56, 0.0  ;;  %v88_v3 = vadd.f32 %v352_v7, %v65_v58  ;;  %v101_v5 = vmax.f32 %v85_v60, 0.0  ;;  %v89_v8 = vadd.f32 %v352_v7, %v66_v62 }
  0x11   :  { %v102_v6 = vmax.f32 %v86_v61, 0.0  ;;  %v90_v9 = vadd.f32 %v352_v7, %v67_v63  ;;  %v103_v10 = vmax.f32 %v87_v2, 0.0  ;;  %v91_v12 = vadd.f32 %v352_v7, %v68_v4 }
  0x12   :  { %v104_v11 = vmax.f32 %v88_v3, 0.0  ;;  %v281_v13 = vpack.c.bf16 %v101_v5, %v100_v0  ;;  %v105_v14 = vmax.f32 %v89_v8, 0.0 }
  0x13   :  { %v106_v15 = vmax.f32 %v90_v9, 0.0  ;;  %v286_v16 = vpack.c.bf16 %v103_v10, %v102_v6  ;;  %v107_v17 = vmax.f32 %v91_v12, 0.0 }
  0x14   :  { %308 = vst [vmem:[%s425_s3 + $0x20] sm:$0xff] %v281_v13   ;;  %v291_v1 = vpack.c.bf16 %v105_v14, %v104_v11 }
  0x15   :  { %309 = vst [vmem:[%s425_s3 + $0x28] sm:$0xff] %v286_v16   ;;  %v296_v18 = vpack.c.bf16 %v107_v17, %v106_v15 }
  0x16   :  { %310 = vst [vmem:[%s425_s3 + $0x30] sm:$0xff] %v291_v1  }
  0x17   :  { %311 = vst [vmem:[%s425_s3 + $0x38] sm:$0xff] %v296_v18  }

// kernel: _lambda_.15
= control target key start
LH: loop header
LB: loop body
LE: loop exit
PB: predicated region body
PF: predicated region fallthrough
CT: control target
= control target key end

     0   :  { %vm209_vm0 = vcmask 261120   ;;  %s605_s1 = inlined_call_operand.vmem [shape: bf16[288,128], index: 1, kind: input, shape index: {}]   ;;  %s606_s0 = inlined_call_operand.vmem [shape: bf16[32,288], index: 0, kind: input, shape index: {}]   ;;  %s607_s2 = inlined_call_operand.vmem [shape: bf16[32,128], index: 2, kind: output, shape index: {0}]   ;;  %s608_s3 = inlined_call_operand.vmem [shape: f32[8,128], index: 3, kind: output, shape index: {1}]   ;;  %s609_s4 = inlined_call_operand.vmem [shape: f32[8,128], index: 4, kind: output, shape index: {2}]  }
   0x1   :  { %v470_v0 = vld [vmem:[%s605_s1 + $0x40] sm:$0xff]   ;;  %v472_v2 = vld [vmem:[%s605_s1 + $0x48] sm:$0xff]   ;;  %v474_v4 = vld [vmem:[%s605_s1 + $0x50] sm:$0xff]  }
   0x2   :  { %v471_v1 = vld [vmem:[%s605_s1] sm:$0xff]   ;;  %430 = vmatprep.subr.bf16.mxu0 %v470_v0  ;;  %v473_v3 = vld [vmem:[%s605_s1 + $0x8] sm:$0xff]   ;;  %v475_v5 = vld [vmem:[%s605_s1 + $0x10] sm:$0xff]  }
   0x3   :  { %431 = vmatpush3.bf16.msra.mxu0 %v471_v1  ;;  %v476_v6 = vld [vmem:[%s605_s1 + $0x58] sm:$0xff]   ;;  %v478_v8 = vld [vmem:[%s605_s1 + $0x60] sm:$0xff]   ;;  %v480_v11 = vld [vmem:[%s605_s1 + $0x68] sm:$0xff]  }
   0x4   :  { %432 = vmatprep.subr.bf16.mxu0 %v472_v2  ;;  %v477_v7 = vld [vmem:[%s605_s1 + $0x18] sm:$0xff]   ;;  %v484_v9 = vld [vmem:[%s605_s1 + $0x80] sm:$0xff]   ;;  %v481_v12 = vld [vmem:[%s605_s1 + $0x28] sm:$0xff]  }
   0x5   :  { %v479_v10 = vld [vmem:[%s605_s1 + $0x20] sm:$0xff]   ;;  %462 = vmatprep.subr.bf16.mxu1 %v484_v9  ;;  %v487_v13 = vld [vmem:[%s605_s1 + $0x88] sm:$0xff]   ;;  %v482_v14 = vld [vmem:[%s605_s1 + $0x70] sm:$0xff]  }
   0x6   :  { %463 = vmatpush3.bf16.msra.mxu1 %v484_v9  ;;  %v490_v15 = vld [vmem:[%s606_s0 + $0x4] ss:$12 sps:$4 sm:$0xff]   ;;  %v491_v16 = vld [vmem:[%s606_s0 + $0x8] ss:$12 sps:$4 sm:$0xff]   ;;  %v492_v17 = vld [vmem:[%s606_s0 + $0x20] ss:$12 sps:$4 sm:$0xff]  }
   0x7   :  { %433 = vmatpush3.bf16.msra.mxu0 %v473_v3  ;;  %464 = vmatprep.subr.bf16.mxu1 %v487_v13  ;;  %v483_v18 = vld [vmem:[%s605_s1 + $0x30] sm:$0xff]   ;;  %v485_v19 = vld [vmem:[%s605_s1 + $0x78] sm:$0xff]   ;;  %v488_v21 = vld [vmem:[%s606_s0] ss:$12 sps:$4 sm:$0xff]  }
   0x8   :  { %434 = vmatprep.subr.bf16.mxu0 %v474_v4  ;;  %248 = vmatprep.mubr.bf16.mxu0 %v490_v15  ;;  %v486_v20 = vld [vmem:[%s605_s1 + $0x38] sm:$0xff]  }
   0x9   :  { %466 = vmatprep.mubr.msk.bf16.mxu1 %vm209_vm0, %v491_v16  ;;  %v493_v22 = vld [vmem:[%s606_s0 + $0x1c] ss:$12 sps:$4 sm:$0xff]   ;;  %v495_v23 = vld [vmem:[%s606_s0 + $0x18] ss:$12 sps:$4 sm:$0xff]  }
   0xa   :  { %465 = vmatpush3.bf16.msra.mxu1 %v487_v13 }
   0xb   :  { %435 = vmatpush3.bf16.msra.mxu0 %v475_v5 }
   0xc   :  { %436 = vmatprep.subr.bf16.mxu0 %v476_v6 }
   0xd   :  { %467 = vmatmul.mubr.msk.bf16.vlgmr.msra.gmra.mrb[0].mxu1 %vm209_vm0, %v492_v17 }
   0xf   :  { %437 = vmatpush3.bf16.msra.mxu0 %v477_v7 }
  0x10   :  { %438 = vmatprep.subr.bf16.mxu0 %v478_v8 }
  0x13   :  { %439 = vmatpush3.bf16.msra.mxu0 %v479_v10 }
  0x14   :  { %440 = vmatprep.subr.bf16.mxu0 %v480_v11 }
  0x17   :  { %441 = vmatpush3.bf16.msra.mxu0 %v481_v12 }
  0x18   :  { %442 = vmatprep.subr.bf16.mxu0 %v482_v14 }
  0x1b   :  { %443 = vmatpush3.bf16.msra.mxu0 %v483_v18 }
  0x1c   :  { %444 = vmatprep.subr.bf16.mxu0 %v485_v19 }
  0x1f   :  { %445 = vmatpush3.bf16.msra.mxu0 %v486_v20 }
  0x22   :  { %249 = vmatmul.mubr.bf16.vlgmr.msra.gmra.mrb[0].mxu0 %v488_v21 }
  0x23   :  { %256 = vmatprep.mubr.bf16.mxu0 %v493_v22 }
  0x2a   :  { %257 = vmatmul.mubr.bf16.gmra.mrb[4].mxu0 %v495_v23 }
  0xe0   :  { %v468_v24 = vpop.f32.mrb[0].mxu1 }
  0xe1   :  { %v299_v25 = vpop.f32.mrb[1].mxu1 }
  0xe2   :  { %v469_v26 = vpop.f32.mrb[2].mxu1 }
  0xe3   :  { %v302_v27 = vpop.f32.mrb[3].mxu1 }
  0xf5   :  { %v446_v28 = vpop.f32.mrb[0].mxu0 }
  0xf6   :  { %v447_v29 = vpop.f32.mrb[1].mxu0 }
  0xf7   :  { %v448_v30 = vadd.f32 %v447_v29, %v446_v28  ;;  %v449_v31 = vpop.f32.mrb[2].mxu0 }
  0xf8   :  { %v450_v32 = vpop.f32.mrb[3].mxu0 }
  0xf9   :  { %v451_v33 = vadd.f32 %v450_v32, %v449_v31  ;;  %v300_v34 = vadd.f32 %v448_v30, %v299_v25 }
  0xfb   :  { %v303_v35 = vadd.f32 %v451_v33, %v302_v27  ;;  %v358_v36 = vmul.f32 %v300_v34, %v300_v34 }
  0xfd   :  { %v422_v37 = vpack.c.bf16 %v303_v35, %v300_v34  ;;  %v349_v38 = vadd.f32 %v303_v35, %v300_v34  ;;  %v359_v39 = vmul.f32 %v303_v35, %v303_v35  ;;  %v452_v40 = vpop.f32.mrb[4].mxu0 }
  0xfe   :  { %v453_v41 = vpop.f32.mrb[5].mxu0 }
  0xff   :  { %423 = vst [vmem:[%s607_s2] sm:$0xff] %v422_v37   ;;  %v362_v42 = vadd.f32 %v359_v39, %v358_v36  ;;  %v454_v43 = vadd.f32 %v453_v41, %v452_v40  ;;  %v455_v44 = vpop.f32.mrb[6].mxu0 }
 0x100   :  { %v456_v45 = vpop.f32.mrb[7].mxu0 }
 0x101   :  { %v308_v46 = vadd.f32 %v468_v24, %v454_v43  ;;  %v457_v47 = vadd.f32 %v456_v45, %v455_v44 }
 0x103   :  { %v350_v48 = vadd.f32 %v349_v38, %v308_v46  ;;  %v360_v49 = vmul.f32 %v308_v46, %v308_v46  ;;  %v311_v50 = vadd.f32 %v469_v26, %v457_v47 }
 0x105   :  { %v363_v51 = vadd.f32 %v362_v42, %v360_v49  ;;  %v427_v52 = vpack.c.bf16 %v311_v50, %v308_v46  ;;  %v351_v53 = vadd.f32 %v350_v48, %v311_v50  ;;  %v361_v54 = vmul.f32 %v311_v50, %v311_v50 }
 0x107   :  { %429 = vst [vmem:[%s607_s2 + $0x8] sm:$0xff] %v427_v52   ;;  %v352_v55 = vrot.slane %v351_v53, 4  ;;  %v364_v56 = vadd.f32 %v363_v51, %v361_v54 }
 0x109   :  { %v353_v57 = vadd.f32 %v352_v55, %v351_v53  ;;  %v365_v58 = vrot.slane %v364_v56, 4 }
 0x10b   :  { %v354_v59 = vrot.slane %v353_v57, 2  ;;  %v366_v60 = vadd.f32 %v365_v58, %v364_v56 }
 0x10d   :  { %v355_v61 = vadd.f32 %v354_v59, %v353_v57  ;;  %v367_v62 = vrot.slane %v366_v60, 2 }
 0x10f   :  { %v356_v63 = vrot.slane %v355_v61, 1  ;;  %v368_v0 = vadd.f32 %v367_v62, %v366_v60 }
 0x111   :  { %v357_v1 = vadd.f32 %v356_v63, %v355_v61  ;;  %v369_v2 = vrot.slane %v368_v0, 1 }
 0x113   :  { %v370_v3 = vadd.f32 %v369_v2, %v368_v0  ;;  %371 = vst [vmem:[%s608_s3] sm:$0xff] %v357_v1 }
 0x115   :  { %372 = vst [vmem:[%s609_s4] sm:$0xff] %v370_v3 }

// kernel: _lambda_.16
= control target key start
LH: loop header
LB: loop body
LE: loop exit
PB: predicated region body
PF: predicated region fallthrough
CT: control target
= control target key end

     0   :  { %s140_s0 = inlined_call_operand.vmem [shape: bf16[32,128], index: 0, kind: input, shape index: {}]   ;;  %s141_s1 = inlined_call_operand.vmem [shape: f32[1,128], index: 1, kind: input, shape index: {}]   ;;  %s142_s2 = inlined_call_operand.vmem [shape: f32[1,128], index: 2, kind: input, shape index: {}]   ;;  %s143_s3 = inlined_call_operand.vmem [shape: bf16[32,128], index: 3, kind: output, shape index: {}]  }
   0x1   :  { %v83_v0 = vld [vmem:[%s140_s0] sm:$0xff]   ;;  %v100_v4 = vld [vmem:[%s140_s0 + $0x8] sm:$0xff]  }
   0x2   :  { %v72_v1 = vld [vmem:[%s141_s1] ss:$0 sm:$0xff]  ;;  %v84_v2 = vunpack.c.l.bf16 %v83_v0  ;;  %v85_v3 = vunpack.c.h.bf16 %v83_v0  ;;  %v88_v6 = vunpack.c.l.bf16 %v100_v4  ;;  %v89_v7 = vunpack.c.h.bf16 %v100_v4 }
   0x3   :  { %v73_v5 = vld [vmem:[%s142_s2] ss:$0 sm:$0xff] }
   0x4   :  { %v29_v8 = vmul.f32 %v84_v2, %v72_v1  ;;  %v30_v9 = vmul.f32 %v85_v3, %v72_v1  ;;  %v31_v10 = vmul.f32 %v88_v6, %v72_v1  ;;  %v32_v11 = vmul.f32 %v89_v7, %v72_v1 }
   0x6   :  { %v40_v12 = vadd.f32 %v73_v5, %v29_v8  ;;  %v41_v13 = vadd.f32 %v73_v5, %v30_v9  ;;  %v42_v14 = vadd.f32 %v73_v5, %v31_v10  ;;  %v43_v15 = vadd.f32 %v73_v5, %v32_v11 }
   0x8   :  { %v44_v16 = vmax.f32 %v40_v12, 0.0  ;;  %v45_v17 = vmax.f32 %v41_v13, 0.0  ;;  %v46_v18 = vmax.f32 %v42_v14, 0.0  ;;  %v47_v19 = vmax.f32 %v43_v15, 0.0 }
   0xa   :  { %v93_v20 = vpack.c.bf16 %v45_v17, %v44_v16  ;;  %v98_v21 = vpack.c.bf16 %v47_v19, %v46_v18 }
   0xc   :  { %94 = vst [vmem:[%s143_s3] sm:$0xff] %v93_v20   ;;  %101 = vst [vmem:[%s143_s3 + $0x8] sm:$0xff] %v98_v21  }

// kernel: _lambda_.17
= control target key start
LH: loop header
LB: loop body
LE: loop exit
PB: predicated region body
PF: predicated region fallthrough
CT: control target
= control target key end

     0   :  { %vm14_vm0 = vcmask 516096   ;;  %v81_v0 = vmov 0.0   ;;  %vm26_vm1 = vcmask 523264   ;;  %s133_s0 = inlined_call_operand.vmem [shape: bf16[32,64], index: 0, kind: input, shape index: {}]   ;;  %s134_s1 = inlined_call_operand.vmem [shape: f32[1,64], index: 1, kind: output, shape index: {0}]   ;;  %s135_s2 = inlined_call_operand.vmem [shape: f32[1,64], index: 2, kind: output, shape index: {1}]  }
   0x1   :  { %15 = vst.msk [vmem:[%s134_s1] sm:$0x1] %vm14_vm0, %v81_v0  ;;  %v72_v1 = vld [vmem:[%s133_s0] sm:$0xff]   ;;  %v79_v2 = vld [vmem:[%s133_s0 + $0x8] sm:$0xff]   ;;  %16 = vst.msk [vmem:[%s135_s2] sm:$0x1] %vm14_vm0, %v81_v0 }
   0x2   :  { %v73_v3 = vunpack.c.l.bf16 %v72_v1  ;;  %v74_v4 = vunpack.c.h.bf16 %v72_v1  ;;  %v77_v5 = vunpack.c.l.bf16 %v79_v2  ;;  %v78_v6 = vunpack.c.h.bf16 %v79_v2 }
   0x4   :  { %v27_v7 = vsel %vm26_vm1, %v73_v3, 0.0  ;;  %v28_v8 = vsel %vm26_vm1, %v74_v4, 0.0  ;;  %v30_v9 = vsel %vm26_vm1, %v77_v5, 0.0  ;;  %v44_v11 = vmul.f32 %v73_v3, %v73_v3 }
   0x5   :  { %v29_v10 = vadd.f32 %v28_v8, %v27_v7  ;;  %v45_v12 = vmul.f32 %v74_v4, %v74_v4  ;;  %v46_v13 = vmul.f32 %v77_v5, %v77_v5  ;;  %v32_v14 = vsel %vm26_vm1, %v78_v6, 0.0 }
   0x6   :  { %v47_v15 = vmul.f32 %v78_v6, %v78_v6  ;;  %v48_v17 = vsel %vm26_vm1, %v44_v11, 0.0 }
   0x7   :  { %v31_v16 = vadd.f32 %v30_v9, %v29_v10  ;;  %v49_v18 = vsel %vm26_vm1, %v45_v12, 0.0  ;;  %v51_v19 = vsel %vm26_vm1, %v46_v13, 0.0 }
   0x8   :  { %v50_v20 = vadd.f32 %v49_v18, %v48_v17  ;;  %v53_v22 = vsel %vm26_vm1, %v47_v15, 0.0  ;;  %v25_v33 = vld [vmem:[%s134_s1] sm:$0x1] }
   0x9   :  { %v33_v21 = vadd.f32 %v32_v14, %v31_v16  ;;  %v43_v38 = vld [vmem:[%s135_s2] sm:$0x1] }
   0xa   :  { %v52_v23 = vadd.f32 %v51_v19, %v50_v20 }
   0xb   :  { %v34_v24 = vrot.slane %v33_v21, 4 }
   0xc   :  { %v54_v25 = vadd.f32 %v53_v22, %v52_v23 }
   0xd   :  { %v35_v26 = vadd.f32 %v34_v24, %v33_v21 }
   0xe   :  { %v55_v27 = vrot.slane %v54_v25, 4 }
   0xf   :  { %v36_v28 = vrot.slane %v35_v26, 2 }
  0x10   :  { %v56_v29 = vadd.f32 %v55_v27, %v54_v25 }
  0x11   :  { %v37_v30 = vadd.f32 %v36_v28, %v35_v26 }
  0x12   :  { %v57_v31 = vrot.slane %v56_v29, 2 }
  0x13   :  { %v38_v32 = vrot.slane %v37_v30, 1 }
  0x14   :  { %v58_v34 = vadd.f32 %v57_v31, %v56_v29 }
  0x15   :  { %v39_v35 = vadd.f32 %v38_v32, %v37_v30 }
  0x16   :  { %v59_v36 = vrot.slane %v58_v34, 1 }
  0x17   :  { %v40_v37 = vadd.f32 %v39_v35, %v25_v33 }
  0x18   :  { %v60_v39 = vadd.f32 %v59_v36, %v58_v34 }
  0x19   :  { %42 = vst.msk [vmem:[%s134_s1] sm:$0x1] %vm14_vm0, %v40_v37 }
  0x1a   :  { %v61_v40 = vadd.f32 %v60_v39, %v43_v38 }
  0x1c   :  { %62 = vst.msk [vmem:[%s135_s2] sm:$0x1] %vm14_vm0, %v61_v40 }

// kernel: _lambda_.18
= control target key start
LH: loop header
LB: loop body
LE: loop exit
PB: predicated region body
PF: predicated region fallthrough
CT: control target
= control target key end

     0   :  { %vm64_vm0 = vcmask 519168   ;;  %s136_s0 = inlined_call_operand.vmem [shape: bf16[32,64], index: 0, kind: input, shape index: {}]   ;;  %s137_s1 = inlined_call_operand.vmem [shape: f32[1,64], index: 1, kind: input, shape index: {}]   ;;  %s138_s2 = inlined_call_operand.vmem [shape: f32[1,64], index: 2, kind: input, shape index: {}]   ;;  %s139_s3 = inlined_call_operand.vmem [shape: bf16[32,64], index: 3, kind: output, shape index: {}]  }
   0x1   :  { %v84_v0 = vld [vmem:[%s136_s0] sm:$0xff]   ;;  %v91_v4 = vld [vmem:[%s136_s0 + $0x8] sm:$0xff]  }
   0x2   :  { %v73_v1 = vld [vmem:[%s137_s1] ss:$0 sm:$0xff]  ;;  %v85_v2 = vunpack.c.l.bf16 %v84_v0  ;;  %v86_v3 = vunpack.c.h.bf16 %v84_v0  ;;  %v89_v6 = vunpack.c.l.bf16 %v91_v4  ;;  %v90_v7 = vunpack.c.h.bf16 %v91_v4 }
   0x3   :  { %v74_v5 = vld [vmem:[%s138_s2] ss:$0 sm:$0xff] }
   0x4   :  { %v29_v8 = vmul.f32 %v85_v2, %v73_v1  ;;  %v30_v9 = vmul.f32 %v86_v3, %v73_v1  ;;  %v31_v10 = vmul.f32 %v89_v6, %v73_v1  ;;  %v32_v11 = vmul.f32 %v90_v7, %v73_v1 }
   0x6   :  { %v40_v12 = vadd.f32 %v74_v5, %v29_v8  ;;  %v41_v13 = vadd.f32 %v74_v5, %v30_v9  ;;  %v42_v14 = vadd.f32 %v74_v5, %v31_v10  ;;  %v43_v15 = vadd.f32 %v74_v5, %v32_v11 }
   0x8   :  { %v44_v16 = vmax.f32 %v40_v12, 0.0  ;;  %v45_v17 = vmax.f32 %v41_v13, 0.0  ;;  %v46_v18 = vmax.f32 %v42_v14, 0.0  ;;  %v47_v19 = vmax.f32 %v43_v15, 0.0 }
   0xa   :  { %v79_v20 = vpack.c.bf16 %v44_v16, %v44_v16  ;;  %v80_v21 = vpack.c.bf16 %v45_v17, %v45_v17  ;;  %v81_v22 = vpack.c.bf16 %v46_v18, %v46_v18  ;;  %v82_v23 = vpack.c.bf16 %v47_v19, %v47_v19 }
   0xc   :  { %65 = vst.msk [vmem:[%s139_s3] sm:$0xf] %vm64_vm0, %v79_v20  ;;  %66 = vst.msk [vmem:[%s139_s3 + $0x4] sm:$0xf] %vm64_vm0, %v80_v21 }
   0xd   :  { %67 = vst.msk [vmem:[%s139_s3 + $0x8] sm:$0xf] %vm64_vm0, %v81_v22  ;;  %68 = vst.msk [vmem:[%s139_s3 + $0xc] sm:$0xf] %vm64_vm0, %v82_v23 }

// kernel: _lambda_.19
= control target key start
LH: loop header
LB: loop body
LE: loop exit
PB: predicated region body
PF: predicated region fallthrough
CT: control target
= control target key end

     0   :  { %10 = vsyncpa [#allocation4], 0  ;;  %v266_v1 = vmov 0.0   ;;  %vm267_vm0 = vmmov 0   ;;  %s344_s0 = inlined_call_operand.vmem [shape: bf16[16,65], index: 0, kind: input, shape index: {}]   ;;  %s345_s1 = inlined_call_operand.vmem [shape: bf16[65,128], index: 1, kind: input, shape index: {}]   ;;  %s346_s2 = inlined_call_operand.vmem [shape: f32[16,128], index: 2, kind: output, shape index: {0}]   ;;  %s347_s3 = inlined_call_operand.hbm [shape: f32[8,128], index: 3, kind: output, shape index: {1}]   ;;  %s348_s4 = inlined_call_operand.hbm [shape: f32[8,128], index: 4, kind: output, shape index: {2}]  }
   0x1   :  { %v212_v0 = vld [vmem:[%s345_s1] sm:$0xff]   ;;  %193 = vmatprep.subr.bf16.mxu0 %v266_v1  ;;  %v213_v2 = vld [vmem:[%s345_s1 + $0x8] sm:$0xff]   ;;  %203 = vmatprep.mubr.msk.bf16.mxu0 %vm267_vm0, %v266_v1  ;;  %v214_v3 = vld [vmem:[%s345_s1 + $0x10] sm:$0xff]  }
   0x2   :  { %194 = vmatpush3.bf16.msra.mxu0 %v212_v0 }
   0x3   :  { %195 = vmatprep.subr.bf16.mxu0 %v266_v1 }
   0x6   :  { %196 = vmatpush3.bf16.msra.mxu0 %v213_v2 }
   0x7   :  { %11 = vsyncpa [#allocation6], 0  ;;  %197 = vmatprep.subr.bf16.mxu0 %v266_v1  ;;  %vm72_vm1 = vcmask 1040384   ;;  %v215_v4 = vld [vmem:[%s345_s1 + $0x18] sm:$0xff]   ;;  %v268_v6 = vmov 0   ;;  %v217_v9 = vld [vmem:[%s344_s0] sm:$0xff]  }
   0x8   :  { %v216_v5 = vld [vmem:[%s345_s1 + $0x20] ss:$0 sps:$4 sm:$0x11]   ;;  %v74_v7 = vsel %vm72_vm1, 65535, %v268_v6  ;;  %vm68_vm2 = vcmask 531456   ;;  %s269_s0 = smov [#allocation3]  }
   0x9   :  { %v76_v8 = vand.u32 %v216_v5, %v74_v7  ;;  %s156_s30 = sshll.u32 %s269_s0, 4  ;;  %s270_s5 = smov [#allocation5]   ;;  %s157_s30 = int_to_ptr.vmem [resolvable:$true] %s156_s30 }
   0xa   :  { %198 = vmatpush3.bf16.msra.mxu0 %v214_v3  ;;  %s166_s6 = sshll.u32 %s270_s5, 4  ;;  %p223_p1 = scmp.lt.s32.totalorder %s157_s30, %s157_s30  ;;  %s167_s6 = int_to_ptr.vmem [resolvable:$true] %s166_s6 }
   0xb   :  { %199 = vmatprep.subr.bf16.mxu0 %v266_v1 }
   0xe   :  { %200 = vmatpush3.bf16.msra.mxu0 %v215_v4 }
   0xf   :  { %201 = vmatprep.subr.bf16.mxu0 %v266_v1 }
  0x12   :  { %202 = vmatpush3.bf16.msra.mxu0 %v76_v8 }
  0x15   :  { %204 = vmatmul.mubr.msk.bf16.vlgmr.msra.gmra.mrb[0].mxu0 %vm68_vm2, %v217_v9 }
  0xe8   :  { %v112_v10 = vpop.f32.mrb[0].mxu0 }
  0xe9   :  { %128 = vst [vmem:[%s346_s2] sm:$0xff] %v112_v10  ;;  %v205_v11 = vpop.f32.mrb[1].mxu0  ;;  %v137_v13 = vmul.f32 %v112_v10, %v112_v10 }
  0xea   :  { %v115_v12 = vpop.f32.mrb[2].mxu0 }
  0xeb   :  { %129 = vst [vmem:[%s346_s2 + $0x8] sm:$0xff] %v115_v12  ;;  %v130_v14 = vadd.f32 %v115_v12, %v112_v10  ;;  %v138_v15 = vmul.f32 %v115_v12, %v115_v12  ;;  %v206_v16 = vpop.f32.mrb[3].mxu0  ;;  %s218_s2 = scalar_lea.vmem %s157_s30, 128 }
  0xec   :  { %p219_p0 = scmp.ne.s32.totalorder %s157_s30, %s218_s2  ;;  %p224_p2 = scmp.lt.s32.totalorder %s218_s2, %s218_s2 }
  0xed   :  { %v131_v17 = vrot.slane %v130_v14, 4  ;;  %v139_v18 = vadd.f32 %v138_v15, %v137_v13 }
  0xee   :  { %p225_p3 = por %p224_p2, %p223_p1 }
  0xef   :  { %v140_v19 = vrot.slane %v139_v18, 4  ;;  %v132_v20 = vadd.f32 %v131_v17, %v130_v14 }
  0xf0   :  { %p226_p4 = pnand %p225_p3, %p219_p0 }
  0xf1   :  { %v133_v21 = vrot.slane %v132_v20, 2  ;;  %v141_v22 = vadd.f32 %v140_v19, %v139_v18 }
  0xf3   :  { %v134_v23 = vadd.f32 %v133_v21, %v132_v20  ;;  %v142_v24 = vrot.slane %v141_v22, 2 }
  0xf5   :  { %v135_v25 = vrot.slane %v134_v23, 1  ;;  %v143_v26 = vadd.f32 %v142_v24, %v141_v22 }
  0xf7   :  { %v136_v27 = vadd.f32 %v135_v25, %v134_v23  ;;  %v144_v28 = vrot.slane %v143_v26, 1 }
  0xf9   :  { %146 = vst [vmem:[#allocation3] sm:$0xff] %v136_v27  ;;  %v145_v29 = vadd.f32 %v144_v28, %v143_v26 }
  0xfa   :  { %229 = shalt.err (!%p226_p4)
}
  0xfb   :  { %s230_s9 = scalar_lea.hbm %s347_s3, 128 }
  0xfc   :  { %p231_p5 = scmp.ne.s32.totalorder %s347_s3, %s230_s9  ;;  %p234_p6 = scmp.lt.u32.totalorder %s230_s9, %s347_s3 }
  0xfe   :  { %p236_p7 = pnand %p234_p6, %p231_p5 }
 0x100   :  { %239 = shalt.err (!%p236_p7)
}
 0x101   :  { %159 = dma.vmem_to_hbm [thread:$0]  %s157_s30, 128, %s347_s3, [#allocation4]   ;;  %147 = vst [vmem:[#allocation5] sm:$0xff] %v145_v29 }
 0x102   :  { %s240_s16 = scalar_lea.vmem %s167_s6, 128  ;;  %p245_p9 = scmp.lt.s32.totalorder %s167_s6, %s167_s6 }
 0x103   :  { %p241_p8 = scmp.ne.s32.totalorder %s167_s6, %s240_s16  ;;  %p246_p10 = scmp.lt.s32.totalorder %s240_s16, %s240_s16 }
 0x105   :  { %p247_p11 = por %p246_p10, %p245_p9 }
 0x107   :  { %p248_p12 = pnand %p247_p11, %p241_p8 }
 0x109   :  { %251 = shalt.err (!%p248_p12)
}
 0x10a   :  { %s252_s19 = scalar_lea.hbm %s348_s4, 128 }
 0x10b   :  { %p253_p13 = scmp.ne.s32.totalorder %s348_s4, %s252_s19  ;;  %p256_p0 = scmp.lt.u32.totalorder %s252_s19, %s348_s4 }
 0x10d   :  { %p258_p1 = pnand %p256_p0, %p253_p13 }
 0x10f   :  { %261 = shalt.err (!%p258_p1)
}
 0x110   :  { %169 = dma.vmem_to_hbm [thread:$0]  %s167_s6, 128, %s348_s4, [#allocation6]  }
 0x111   :  { %262 = dma.done.wait [#allocation4], 128  }
 0x112   :  { %263 = vsyncadd [#allocation4], 4294967168 }
 0x113   :  { %264 = dma.done.wait [#allocation6], 128  }
 0x114   :  { %265 = vsyncadd [#allocation6], 4294967168 }
 0x115   :  { %178 = vsyncpa [#allocation4], 1 }
 0x116   :  { %179 = vsyncpa [#allocation6], 1 }

</bundles_post_ra>
